<compile_context>
chip_gen: v7x
topology: tpu7x:2x2x1
jax: 0.10.0
libtpu: 0.0.40
codegen_flags: <defaults>
</compile_context>

<pallas_src>
import functools
import math

import jax
import jax.numpy as jnp
from jax.experimental import pallas as pl
from jax.experimental.pallas import tpu as pltpu


def _round_up(x, m):
    return ((x + m - 1) // m) * m


# -----------------------------------------------------------------------------
# Tiling helpers
# -----------------------------------------------------------------------------
def _choose_time_block(T, B_pad, Hp, G, stream_budget_bytes=24 << 20):
    """Largest time block whose double-buffered bf16 streams fit the budget."""
    if T <= 8:
        return max(T, 1)
    # bf16 bytes per timestep: (ipre + out) x 2 directions x 2 buffers
    per_t = 2 * 2 * B_pad * (G + Hp) * 2
    tt_max = max(8, stream_budget_bytes // per_t)
    for cand in (128, 64, 32, 16, 8):
        if cand <= tt_max and cand <= _round_up(T, 8):
            return cand
    return 8


def _vmem_limit_bytes(TT, B_pad, Hp, G):
    stream = 2 * 2 * TT * B_pad * (G + Hp) * 2          # bf16 ipre+out, 2 dirs, dbl buf
    weights = 2 * (2 * Hp * G * 4 + 2 * 8 * G * 4)      # wh + bh (sublane padded)
    misc = 2 * (B_pad * 128 * 4)                        # lens (lane padded)
    misc += 2 * (2 * B_pad * Hp * 4)                    # hlast output
    misc += 2 * (B_pad * Hp * 4)                        # h scratches
    need = stream + weights + misc + (4 << 20)          # headroom
    return int(min(64 << 20, max(32 << 20, need)))


# -----------------------------------------------------------------------------
# Pallas kernel: both GRU directions interleaved in one time-blocked loop.
#   grid = (nT,); forward walks time blocks 0..nT-1, backward walks nT-1..0.
# -----------------------------------------------------------------------------
def _bigru_kernel(ipre_f_ref, ipre_b_ref, lens_ref, wh_ref, bh_ref,
                  out_f_ref, out_b_ref, hlast_ref, hf_scr, hb_scr):
    """One grid step processes TT timesteps of BOTH directions.

    ipre_f_ref: (TT, B_pad, 3*Hp) bf16  fwd input-gate pre-acts (b_i folded in)
    ipre_b_ref: (TT, B_pad, 3*Hp) bf16  bwd input-gate pre-acts (time block nT-1-s)
    lens_ref  : (B_pad, 1) int32        sequence lengths
    wh_ref    : (2, Hp, 3*Hp) f32       fused hidden->gate weights [r|z|n]
    bh_ref    : (2, 1, 3*Hp) f32        hidden biases
    out_f_ref : (TT, B_pad, Hp) bf16    fwd hidden per step (zeroed at padding)
    out_b_ref : (TT, B_pad, Hp) bf16    bwd hidden per step
    hlast_ref : (2, B_pad, Hp) f32      final hidden state per direction
    hf_scr/hb_scr: (B_pad, Hp) f32      carries across time blocks
    """
    s = pl.program_id(0)
    nT = pl.num_programs(0)
    TT, B_pad, Hp = out_f_ref.shape
    G = 3 * Hp

    @pl.when(s == 0)
    def _():
        hf_scr[...] = jnp.zeros_like(hf_scr)
        hb_scr[...] = jnp.zeros_like(hb_scr)

    # Hoisted out of the serial loop (no CSE inside the loop).
    wh_f = wh_ref[0]                                        # (Hp, G)
    wh_b = wh_ref[1]
    bias_f = jnp.broadcast_to(bh_ref[0], (B_pad, G))
    bias_b = jnp.broadcast_to(bh_ref[1], (B_pad, G))
    lens = lens_ref[...]                                    # (B_pad, 1) int32

    t0_f = s * TT                       # global time of local index 0 (fwd block)
    t0_b = (nT - 1 - s) * TT            # global time of local index 0 (bwd block)

    def gate(i_pre, hg, h):
        r = jax.nn.sigmoid(i_pre[:, 0:Hp] + hg[:, 0:Hp])
        z = jax.nn.sigmoid(i_pre[:, Hp:2 * Hp] + hg[:, Hp:2 * Hp])
        n = jnp.tanh(i_pre[:, 2 * Hp:3 * Hp] + r * hg[:, 2 * Hp:3 * Hp])
        return (1.0 - z) * n + z * h

    def step(i, carry):
        h_f, h_b = carry
        tb = TT - 1 - i                 # backward walks the block in reverse

        ipf = ipre_f_ref[i].astype(jnp.float32)             # (B_pad, G)
        ipb = ipre_b_ref[tb].astype(jnp.float32)

        # Two independent MXU pushes per serial step (interleaved chains).
        hg_f = jnp.dot(h_f, wh_f, preferred_element_type=jnp.float32) + bias_f
        hg_b = jnp.dot(h_b, wh_b, preferred_element_type=jnp.float32) + bias_b

        hf_new = gate(ipf, hg_f, h_f)
        hb_new = gate(ipb, hg_b, h_b)

        # Packed-sequence semantics: freeze past sequence end, zero pad output.
        mf = (lens > (t0_f + i)).astype(jnp.float32)         # (B_pad, 1)
        mb = (lens > (t0_b + tb)).astype(jnp.float32)

        h_f2 = mf * hf_new + (1.0 - mf) * h_f
        h_b2 = mb * hb_new + (1.0 - mb) * h_b

        out_f_ref[i] = (h_f2 * mf).astype(out_f_ref.dtype)
        out_b_ref[tb] = (h_b2 * mb).astype(out_b_ref.dtype)
        return (h_f2, h_b2)

    unroll = TT if TT <= 8 else 8
    h_f, h_b = jax.lax.fori_loop(0, TT, step, (hf_scr[...], hb_scr[...]),
                                 unroll=unroll)
    hf_scr[...] = h_f
    hb_scr[...] = h_b

    @pl.when(s == nT - 1)
    def _():
        hlast_ref[0] = h_f
        hlast_ref[1] = h_b


def _bigru_pallas(ipre_f, ipre_b, lens, wh, bh, TT):
    """ipre_f/ipre_b: (T_pad, B_pad, 3*Hp) bf16; lens: (B_pad, 1) int32;
       wh: (2, Hp, 3*Hp) f32; bh: (2, 1, 3*Hp) f32."""
    T_pad, B_pad, G = ipre_f.shape
    Hp = G // 3
    nT = T_pad // TT

    grid_spec = pltpu.PrefetchScalarGridSpec(
        num_scalar_prefetch=0,
        grid=(nT,),
        in_specs=[
            pl.BlockSpec((TT, B_pad, G), lambda s: (s, 0, 0)),
            pl.BlockSpec((TT, B_pad, G), lambda s: (nT - 1 - s, 0, 0)),
            pl.BlockSpec((B_pad, 1), lambda s: (0, 0)),
            pl.BlockSpec((2, Hp, G), lambda s: (0, 0, 0)),
            pl.BlockSpec((2, 1, G), lambda s: (0, 0, 0)),
        ],
        out_specs=[
            pl.BlockSpec((TT, B_pad, Hp), lambda s: (s, 0, 0)),
            pl.BlockSpec((TT, B_pad, Hp), lambda s: (nT - 1 - s, 0, 0)),
            pl.BlockSpec((2, B_pad, Hp), lambda s: (0, 0, 0)),
        ],
        scratch_shapes=[
            pltpu.VMEM((B_pad, Hp), jnp.float32),
            pltpu.VMEM((B_pad, Hp), jnp.float32),
        ],
    )
    out_f, out_b, h_last = pl.pallas_call(
        _bigru_kernel,
        out_shape=(
            jax.ShapeDtypeStruct((T_pad, B_pad, Hp), jnp.bfloat16),
            jax.ShapeDtypeStruct((T_pad, B_pad, Hp), jnp.bfloat16),
            jax.ShapeDtypeStruct((2, B_pad, Hp), jnp.float32),
        ),
        grid_spec=grid_spec,
        compiler_params=pltpu.CompilerParams(
            dimension_semantics=("arbitrary",),
            vmem_limit_bytes=_vmem_limit_bytes(TT, B_pad, Hp, G)),
    )(ipre_f, ipre_b, lens, wh, bh)
    return out_f, out_b, h_last


# -----------------------------------------------------------------------------
# Parameters: raw per-gate params (for the reference) + packed/padded layout
# for the kernel (gates at 128-aligned lane offsets, zeros in padded region).
# -----------------------------------------------------------------------------
def init_params(key, num_embeddings, embedding_size, rnn_hidden_size):
    E, H = embedding_size, rnn_hidden_size
    Hp = _round_up(H, 128)
    G = 3 * Hp
    scale = 1.0 / math.sqrt(H)

    keys = jax.random.split(key, 9)
    emb = jax.random.normal(keys[0], (num_embeddings, E), jnp.float32)
    emb = emb.at[0].set(0.0)  # padding_idx=0

    wi_p = jnp.zeros((2, E, G), jnp.float32)
    bi_p = jnp.zeros((2, G), jnp.float32)
    wh_p = jnp.zeros((2, Hp, G), jnp.float32)
    bh_p = jnp.zeros((2, 1, G), jnp.float32)
    raw_dirs = []
    for d in range(2):
        k0, k1, k2, k3 = keys[1 + 4 * d: 1 + 4 * (d + 1)]
        wi3 = jax.random.uniform(k0, (3, E, H), jnp.float32, -scale, scale)
        wh3 = jax.random.uniform(k1, (3, H, H), jnp.float32, -scale, scale)
        bi3 = jax.random.uniform(k2, (3, H), jnp.float32, -scale, scale)
        bh3 = jax.random.uniform(k3, (3, H), jnp.float32, -scale, scale)
        raw_dirs.append({"wi": wi3, "wh": wh3, "bi": bi3, "bh": bh3})
        for g in range(3):
            off = g * Hp
            wi_p = wi_p.at[d, :, off:off + H].set(wi3[g])
            wh_p = wh_p.at[d, :H, off:off + H].set(wh3[g])
            bi_p = bi_p.at[d, off:off + H].set(bi3[g])
            bh_p = bh_p.at[d, 0, off:off + H].set(bh3[g])

    packed = {"embedding": emb, "wi": wi_p, "bi": bi_p, "wh": wh_p, "bh": bh_p}
    raw = {"embedding": emb, "dirs": raw_dirs}
    return packed, raw


# -----------------------------------------------------------------------------
# Forward pass (big GEMM + layout plumbing in XLA, recurrence in Pallas).
# -----------------------------------------------------------------------------
@functools.partial(jax.jit, static_argnames=("rnn_hidden_size",))
def nmt_encoder_forward(params, x_source, x_lengths, *, rnn_hidden_size):
    """x_source: (B, T) int32, x_lengths: (B,) int32.

    Returns:
      x_unpacked: (B, T, 2H) float32
      x_birnn_h : (B, 2H)    float32
    """
    B, T = x_source.shape
    H = rnn_hidden_size
    Hp = params["wh"].shape[1]
    G = params["wh"].shape[2]

    x_embedded = jnp.take(params["embedding"], x_source, axis=0)   # (B, T, E)

    # Pad the SMALL embedding tensor (not the big ipre intermediate).
    B_pad = _round_up(B, 16)                 # native bf16 sublane tile
    TT = _choose_time_block(T, B_pad, Hp, G)
    T_pad = _round_up(T, TT)
    x_emb_p = jnp.pad(x_embedded, ((0, B_pad - B), (0, T_pad - T), (0, 0)))

    # Hoisted input projections: one big MXU-friendly GEMM per direction for
    # all timesteps, input biases folded in, streamed to the kernel in bf16.
    ipre_f = (jnp.einsum("bte,eg->tbg", x_emb_p, params["wi"][0])
              + params["bi"][0]).astype(jnp.bfloat16)               # (T,B,G)
    ipre_b = (jnp.einsum("bte,eg->tbg", x_emb_p, params["wi"][1])
              + params["bi"][1]).astype(jnp.bfloat16)

    lens = jnp.pad(x_lengths.astype(jnp.int32), (0, B_pad - B)).reshape(B_pad, 1)

    out_f, out_b, h_last = _bigru_pallas(ipre_f, ipre_b, lens,
                                         params["wh"], params["bh"], TT)

    out_f = jnp.transpose(out_f[:T, :B, :H], (1, 0, 2)).astype(jnp.float32)
    out_b = jnp.transpose(out_b[:T, :B, :H], (1, 0, 2)).astype(jnp.float32)
    x_unpacked = jnp.concatenate([out_f, out_b], axis=-1)           # (B, T, 2H)
    x_birnn_h = jnp.concatenate([h_last[0, :B, :H], h_last[1, :B, :H]],
                                axis=-1)                            # (B, 2H)
    return x_unpacked, x_birnn_h


# -----------------------------------------------------------------------------
# Pure-JAX reference (lax.scan), full bidirectional sanity check.
# -----------------------------------------------------------------------------
def _ref_gru_direction(x_tbe, mask_tb1, wi3, wh3, bi3, bh3):
    B = x_tbe.shape[1]
    H = wh3.shape[-1]

    def step(h, inp):
        x_t, m = inp
        i_r = x_t @ wi3[0] + bi3[0]
        i_z = x_t @ wi3[1] + bi3[1]
        i_n = x_t @ wi3[2] + bi3[2]
        h_r = h @ wh3[0] + bh3[0]
        h_z = h @ wh3[1] + bh3[1]
        h_n = h @ wh3[2] + bh3[2]
        r = jax.nn.sigmoid(i_r + h_r)
        z = jax.nn.sigmoid(i_z + h_z)
        n = jnp.tanh(i_n + r * h_n)
        h_new = (1.0 - z) * n + z * h
        h_upd = jnp.where(m > 0.5, h_new, h)
        return h_upd, h_upd * m

    h0 = jnp.zeros((B, H), jnp.float32)
    return jax.lax.scan(step, h0, (x_tbe, mask_tb1))


def reference_forward(raw, x_source, x_lengths):
    emb = raw["embedding"]
    B, T = x_source.shape
    x_embedded = jnp.take(emb, x_source, axis=0)
    t_idx = jnp.arange(T)[None, :]
    mask_bt = (t_idx < x_lengths[:, None]).astype(jnp.float32)
    m_f = jnp.transpose(mask_bt)[:, :, None]

    d0 = raw["dirs"][0]
    x_f = jnp.transpose(x_embedded, (1, 0, 2))
    h_f, out_f = _ref_gru_direction(x_f, m_f, d0["wi"], d0["wh"], d0["bi"], d0["bh"])
    out_f = jnp.transpose(out_f, (1, 0, 2))

    d1 = raw["dirs"][1]
    lens = x_lengths[:, None]
    rev_idx = jnp.where(t_idx < lens, lens - 1 - t_idx, t_idx)
    x_rev = jnp.take_along_axis(x_embedded, rev_idx[:, :, None], axis=1)
    x_b = jnp.transpose(x_rev, (1, 0, 2))
    h_b, out_b = _ref_gru_direction(x_b, m_f, d1["wi"], d1["wh"], d1["bi"], d1["bh"])
    out_b = jnp.transpose(out_b, (1, 0, 2))
    out_b = jnp.take_along_axis(out_b, rev_idx[:, :, None], axis=1)
    out_b = out_b * mask_bt[:, :, None]

    return (jnp.concatenate([out_f, out_b], axis=-1),
            jnp.concatenate([h_f, h_b], axis=-1))


if __name__ == "__main__":
    B, T, E, H, VOCAB = 2, 8, 32, 32, 20

    key = jax.random.PRNGKey(0)
    kp, kx = jax.random.split(key)
    params, raw = init_params(kp, VOCAB, E, H)

    # lengths sorted descending (pack_padded_sequence enforce_sorted default)
    x_lengths = jnp.array([8, 5], dtype=jnp.int32)
    x_source = jax.random.randint(kx, (B, T), 1, VOCAB, dtype=jnp.int32)
    pad_mask = jnp.arange(T)[None, :] < x_lengths[:, None]
    x_source = jnp.where(pad_mask, x_source, 0)   # padding token index 0

    x_unpacked, x_birnn_h = nmt_encoder_forward(
        params, x_source, x_lengths, rnn_hidden_size=H)
    jax.block_until_ready((x_unpacked, x_birnn_h))

    assert x_unpacked.shape == (B, T, 2 * H)
    assert x_birnn_h.shape == (B, 2 * H)

    # Full bidirectional check vs. the pure-JAX scan reference.  Streams are
    # bf16 in the kernel, so tolerances are widened accordingly.
    ref_out, ref_h = reference_forward(raw, x_source, x_lengths)
    assert jnp.allclose(x_unpacked, ref_out, atol=3e-2, rtol=3e-2), \
        float(jnp.max(jnp.abs(x_unpacked - ref_out)))
    assert jnp.allclose(x_birnn_h, ref_h, atol=3e-2, rtol=3e-2), \
        float(jnp.max(jnp.abs(x_birnn_h - ref_h)))

    print("KERNEL_OK")
</pallas_src>

<mosaic_0001>
module attributes {stable_mosaic.version = 11 : i64} {
  func.func @_bigru_kernel(%arg0: i32, %arg1: memref<8x16x384xbf16, #tpu.memory_space<vmem>>, %arg2: memref<8x16x384xbf16, #tpu.memory_space<vmem>>, %arg3: memref<16x1xi32, #tpu.memory_space<vmem>>, %arg4: memref<2x128x384xf32, #tpu.memory_space<vmem>>, %arg5: memref<2x1x384xf32, #tpu.memory_space<vmem>>, %arg6: memref<8x16x128xbf16, #tpu.memory_space<vmem>>, %arg7: memref<8x16x128xbf16, #tpu.memory_space<vmem>>, %arg8: memref<2x16x128xf32, #tpu.memory_space<vmem>>, %arg9: memref<16x128xf32, #tpu.memory_space<vmem>>, %arg10: memref<16x128xf32, #tpu.memory_space<vmem>>) attributes {dimension_semantics = [#tpu.dimension_semantics<arbitrary>], iteration_bounds = array<i64: 1>, scalar_prefetch = 0 : i64, scratch_operands = 2 : i64, tpu.core_type = #tpu.core_type<tc>, window_params = [{transform_indices = @transform_0, window_bounds = array<i64: 8, 16, 384>}, {transform_indices = @transform_1, window_bounds = array<i64: 8, 16, 384>}, {pipeline_mode = #tpu.pipeline_mode<synchronous>, transform_indices = @transform_2, window_bounds = array<i64: 16, 1>}, {pipeline_mode = #tpu.pipeline_mode<synchronous>, transform_indices = @transform_3, window_bounds = array<i64: 2, 128, 384>}, {pipeline_mode = #tpu.pipeline_mode<synchronous>, transform_indices = @transform_4, window_bounds = array<i64: 2, 1, 384>}, {transform_indices = @transform_5, window_bounds = array<i64: 8, 16, 128>}, {transform_indices = @transform_6, window_bounds = array<i64: 8, 16, 128>}, {pipeline_mode = #tpu.pipeline_mode<synchronous>, transform_indices = @transform_7, window_bounds = array<i64: 2, 16, 128>}]} {
    %c0_i32 = arith.constant 0 : i32
    %0 = arith.cmpi eq, %arg0, %c0_i32 : i32
    %1 = arith.extui %0 : i1 to i32
    %c0_i32_0 = arith.constant 0 : i32
    %2 = arith.cmpi ne, %1, %c0_i32_0 : i32
    scf.if %2 {
      %cst_178 = arith.constant 0.000000e+00 : f32
      %850 = vector.broadcast %cst_178 : f32 to vector<16x128xf32>
      %c0_179 = arith.constant 0 : index
      %c0_180 = arith.constant 0 : index
      %851 = vector.load %arg9[%c0_179, %c0_180] : memref<16x128xf32, #tpu.memory_space<vmem>>, vector<16x128xf32>
      tpu.vector_store %arg9[%c0_179, %c0_180], %850 {strides = array<i32>} : memref<16x128xf32, #tpu.memory_space<vmem>>, vector<16x128xf32>,
      %cst_181 = arith.constant 0.000000e+00 : f32
      %852 = vector.broadcast %cst_181 : f32 to vector<16x128xf32>
      %c0_182 = arith.constant 0 : index
      %c0_183 = arith.constant 0 : index
      %853 = vector.load %arg10[%c0_182, %c0_183] : memref<16x128xf32, #tpu.memory_space<vmem>>, vector<16x128xf32>
      tpu.vector_store %arg10[%c0_182, %c0_183], %852 {strides = array<i32>} : memref<16x128xf32, #tpu.memory_space<vmem>>, vector<16x128xf32>,
    } else {
    }
    %c0 = arith.constant 0 : index
    %c0_1 = arith.constant 0 : index
    %c0_2 = arith.constant 0 : index
    %3 = vector.load %arg4[%c0, %c0_1, %c0_2] : memref<2x128x384xf32, #tpu.memory_space<vmem>>, vector<1x128x384xf32>
    %4 = vector.shape_cast %3 : vector<1x128x384xf32> to vector<128x384xf32>
    %c1 = arith.constant 1 : index
    %c0_3 = arith.constant 0 : index
    %c0_4 = arith.constant 0 : index
    %5 = vector.load %arg4[%c1, %c0_3, %c0_4] : memref<2x128x384xf32, #tpu.memory_space<vmem>>, vector<1x128x384xf32>
    %6 = vector.shape_cast %5 : vector<1x128x384xf32> to vector<128x384xf32>
    %c0_5 = arith.constant 0 : index
    %c0_6 = arith.constant 0 : index
    %c0_7 = arith.constant 0 : index
    %7 = vector.load %arg5[%c0_5, %c0_6, %c0_7] : memref<2x1x384xf32, #tpu.memory_space<vmem>>, vector<1x1x384xf32>
    %8 = vector.shape_cast %7 : vector<1x1x384xf32> to vector<1x384xf32>
    %9 = vector.shape_cast %8 : vector<1x384xf32> to vector<1x384xf32>
    %10 = vector.broadcast %9 : vector<1x384xf32> to vector<16x384xf32>
    %c1_8 = arith.constant 1 : index
    %c0_9 = arith.constant 0 : index
    %c0_10 = arith.constant 0 : index
    %11 = vector.load %arg5[%c1_8, %c0_9, %c0_10] : memref<2x1x384xf32, #tpu.memory_space<vmem>>, vector<1x1x384xf32>
    %12 = vector.shape_cast %11 : vector<1x1x384xf32> to vector<1x384xf32>
    %13 = vector.shape_cast %12 : vector<1x384xf32> to vector<1x384xf32>
    %14 = vector.broadcast %13 : vector<1x384xf32> to vector<16x384xf32>
    %c0_11 = arith.constant 0 : index
    %c0_12 = arith.constant 0 : index
    %15 = vector.load %arg3[%c0_11, %c0_12] : memref<16x1xi32, #tpu.memory_space<vmem>>, vector<16x1xi32>
    %c8_i32 = arith.constant 8 : i32
    %16 = arith.muli %arg0, %c8_i32 : i32
    %c0_i32_13 = arith.constant 0 : i32
    %17 = arith.subi %c0_i32_13, %arg0 : i32
    %c8_i32_14 = arith.constant 8 : i32
    %18 = arith.muli %17, %c8_i32_14 : i32
    %c0_15 = arith.constant 0 : index
    %c0_16 = arith.constant 0 : index
    %19 = vector.load %arg9[%c0_15, %c0_16] : memref<16x128xf32, #tpu.memory_space<vmem>>, vector<16x128xf32>
    %c0_17 = arith.constant 0 : index
    %c0_18 = arith.constant 0 : index
    %20 = vector.load %arg10[%c0_17, %c0_18] : memref<16x128xf32, #tpu.memory_space<vmem>>, vector<16x128xf32>
    %c0_i32_19 = arith.constant 0 : i32
    %c7_i32 = arith.constant 7 : i32
    %21 = arith.subi %c7_i32, %c0_i32_19 : i32
    %22 = arith.index_cast %c0_i32_19 : i32 to index
    %c0_20 = arith.constant 0 : index
    %c0_21 = arith.constant 0 : index
    %23 = vector.load %arg1[%22, %c0_20, %c0_21] : memref<8x16x384xbf16, #tpu.memory_space<vmem>>, vector<1x16x384xbf16>
    %24 = vector.shape_cast %23 : vector<1x16x384xbf16> to vector<16x384xbf16>
    %25 = arith.extf %24 : vector<16x384xbf16> to vector<16x384xf32>
    %26 = arith.index_cast %21 : i32 to index
    %c0_22 = arith.constant 0 : index
    %c0_23 = arith.constant 0 : index
    %27 = vector.load %arg2[%26, %c0_22, %c0_23] : memref<8x16x384xbf16, #tpu.memory_space<vmem>>, vector<1x16x384xbf16>
    %28 = vector.shape_cast %27 : vector<1x16x384xbf16> to vector<16x384xbf16>
    %29 = arith.extf %28 : vector<16x384xbf16> to vector<16x384xf32>
    %cst = arith.constant dense<0.000000e+00> : vector<16x384xf32>
    %30 = tpu.matmul %19, %4, %cst {dimension_numbers = #tpu.dot_dimension_numbers<[1], [0], [0], [1], [0, 0, 1, 1], [], []>} : vector<16x128xf32>, vector<128x384xf32>, vector<16x384xf32> -> vector<16x384xf32>
    %31 = arith.addf %30, %10 : vector<16x384xf32>
    %cst_24 = arith.constant dense<0.000000e+00> : vector<16x384xf32>
    %32 = tpu.matmul %20, %6, %cst_24 {dimension_numbers = #tpu.dot_dimension_numbers<[1], [0], [0], [1], [0, 0, 1, 1], [], []>} : vector<16x128xf32>, vector<128x384xf32>, vector<16x384xf32> -> vector<16x384xf32>
    %33 = arith.addf %32, %14 : vector<16x384xf32>
    %34 = vector.extract_strided_slice %25 {offsets = [0, 0], sizes = [16, 128], strides = [1, 1]} : vector<16x384xf32> to vector<16x128xf32>
    %35 = vector.extract_strided_slice %31 {offsets = [0, 0], sizes = [16, 128], strides = [1, 1]} : vector<16x384xf32> to vector<16x128xf32>
    %36 = arith.addf %34, %35 : vector<16x128xf32>
    %37 = arith.negf %36 : vector<16x128xf32>
    %38 = math.exp %37 : vector<16x128xf32>
    %cst_25 = arith.constant 1.000000e+00 : f32
    %39 = vector.broadcast %cst_25 : f32 to vector<16x128xf32>
    %40 = arith.addf %39, %38 : vector<16x128xf32>
    %41 = arith.divf %39, %40 : vector<16x128xf32>
    %42 = vector.extract_strided_slice %25 {offsets = [0, 128], sizes = [16, 128], strides = [1, 1]} : vector<16x384xf32> to vector<16x128xf32>
    %43 = vector.extract_strided_slice %31 {offsets = [0, 128], sizes = [16, 128], strides = [1, 1]} : vector<16x384xf32> to vector<16x128xf32>
    %44 = arith.addf %42, %43 : vector<16x128xf32>
    %45 = arith.negf %44 : vector<16x128xf32>
    %46 = math.exp %45 : vector<16x128xf32>
    %cst_26 = arith.constant 1.000000e+00 : f32
    %47 = vector.broadcast %cst_26 : f32 to vector<16x128xf32>
    %48 = arith.addf %47, %46 : vector<16x128xf32>
    %49 = arith.divf %47, %48 : vector<16x128xf32>
    %50 = vector.extract_strided_slice %25 {offsets = [0, 256], sizes = [16, 128], strides = [1, 1]} : vector<16x384xf32> to vector<16x128xf32>
    %51 = vector.extract_strided_slice %31 {offsets = [0, 256], sizes = [16, 128], strides = [1, 1]} : vector<16x384xf32> to vector<16x128xf32>
    %52 = arith.mulf %41, %51 : vector<16x128xf32>
    %53 = arith.addf %50, %52 : vector<16x128xf32>
    %54 = math.tanh %53 : vector<16x128xf32>
    %cst_27 = arith.constant 1.000000e+00 : f32
    %55 = vector.broadcast %cst_27 : f32 to vector<16x128xf32>
    %56 = arith.subf %55, %49 : vector<16x128xf32>
    %57 = arith.mulf %56, %54 : vector<16x128xf32>
    %58 = arith.mulf %49, %19 : vector<16x128xf32>
    %59 = arith.addf %57, %58 : vector<16x128xf32>
    %60 = vector.extract_strided_slice %29 {offsets = [0, 0], sizes = [16, 128], strides = [1, 1]} : vector<16x384xf32> to vector<16x128xf32>
    %61 = vector.extract_strided_slice %33 {offsets = [0, 0], sizes = [16, 128], strides = [1, 1]} : vector<16x384xf32> to vector<16x128xf32>
    %62 = arith.addf %60, %61 : vector<16x128xf32>
    %63 = arith.negf %62 : vector<16x128xf32>
    %64 = math.exp %63 : vector<16x128xf32>
    %cst_28 = arith.constant 1.000000e+00 : f32
    %65 = vector.broadcast %cst_28 : f32 to vector<16x128xf32>
    %66 = arith.addf %65, %64 : vector<16x128xf32>
    %67 = arith.divf %65, %66 : vector<16x128xf32>
    %68 = vector.extract_strided_slice %29 {offsets = [0, 128], sizes = [16, 128], strides = [1, 1]} : vector<16x384xf32> to vector<16x128xf32>
    %69 = vector.extract_strided_slice %33 {offsets = [0, 128], sizes = [16, 128], strides = [1, 1]} : vector<16x384xf32> to vector<16x128xf32>
    %70 = arith.addf %68, %69 : vector<16x128xf32>
    %71 = arith.negf %70 : vector<16x128xf32>
    %72 = math.exp %71 : vector<16x128xf32>
    %cst_29 = arith.constant 1.000000e+00 : f32
    %73 = vector.broadcast %cst_29 : f32 to vector<16x128xf32>
    %74 = arith.addf %73, %72 : vector<16x128xf32>
    %75 = arith.divf %73, %74 : vector<16x128xf32>
    %76 = vector.extract_strided_slice %29 {offsets = [0, 256], sizes = [16, 128], strides = [1, 1]} : vector<16x384xf32> to vector<16x128xf32>
    %77 = vector.extract_strided_slice %33 {offsets = [0, 256], sizes = [16, 128], strides = [1, 1]} : vector<16x384xf32> to vector<16x128xf32>
    %78 = arith.mulf %67, %77 : vector<16x128xf32>
    %79 = arith.addf %76, %78 : vector<16x128xf32>
    %80 = math.tanh %79 : vector<16x128xf32>
    %cst_30 = arith.constant 1.000000e+00 : f32
    %81 = vector.broadcast %cst_30 : f32 to vector<16x128xf32>
    %82 = arith.subf %81, %75 : vector<16x128xf32>
    %83 = arith.mulf %82, %80 : vector<16x128xf32>
    %84 = arith.mulf %75, %20 : vector<16x128xf32>
    %85 = arith.addf %83, %84 : vector<16x128xf32>
    %86 = arith.addi %16, %c0_i32_19 : i32
    %87 = vector.broadcast %86 : i32 to vector<16x1xi32>
    %88 = arith.cmpi sgt, %15, %87 : vector<16x1xi32>
    %89 = arith.extui %88 : vector<16x1xi1> to vector<16x1xi32>
    %90 = arith.sitofp %89 : vector<16x1xi32> to vector<16x1xf32>
    %91 = arith.addi %18, %21 : i32
    %92 = vector.broadcast %91 : i32 to vector<16x1xi32>
    %93 = arith.cmpi sgt, %15, %92 : vector<16x1xi32>
    %94 = arith.extui %93 : vector<16x1xi1> to vector<16x1xi32>
    %95 = arith.sitofp %94 : vector<16x1xi32> to vector<16x1xf32>
    %96 = vector.broadcast %90 : vector<16x1xf32> to vector<16x128xf32>
    %97 = arith.mulf %96, %59 : vector<16x128xf32>
    %cst_31 = arith.constant 1.000000e+00 : f32
    %98 = vector.broadcast %cst_31 : f32 to vector<16x1xf32>
    %99 = arith.subf %98, %90 : vector<16x1xf32>
    %100 = vector.broadcast %99 : vector<16x1xf32> to vector<16x128xf32>
    %101 = arith.mulf %100, %19 : vector<16x128xf32>
    %102 = arith.addf %97, %101 : vector<16x128xf32>
    %103 = vector.broadcast %95 : vector<16x1xf32> to vector<16x128xf32>
    %104 = arith.mulf %103, %85 : vector<16x128xf32>
    %cst_32 = arith.constant 1.000000e+00 : f32
    %105 = vector.broadcast %cst_32 : f32 to vector<16x1xf32>
    %106 = arith.subf %105, %95 : vector<16x1xf32>
    %107 = vector.broadcast %106 : vector<16x1xf32> to vector<16x128xf32>
    %108 = arith.mulf %107, %20 : vector<16x128xf32>
    %109 = arith.addf %104, %108 : vector<16x128xf32>
    %110 = vector.broadcast %90 : vector<16x1xf32> to vector<16x128xf32>
    %111 = arith.mulf %102, %110 : vector<16x128xf32>
    %112 = arith.truncf %111 : vector<16x128xf32> to vector<16x128xbf16>
    %113 = arith.index_cast %c0_i32_19 : i32 to index
    %c0_33 = arith.constant 0 : index
    %c0_34 = arith.constant 0 : index
    %114 = vector.load %arg6[%113, %c0_33, %c0_34] : memref<8x16x128xbf16, #tpu.memory_space<vmem>>, vector<1x16x128xbf16>
    %115 = vector.shape_cast %114 : vector<1x16x128xbf16> to vector<16x128xbf16>
    %116 = vector.shape_cast %112 : vector<16x128xbf16> to vector<1x16x128xbf16>
    tpu.vector_store %arg6[%113, %c0_33, %c0_34], %116 {strides = array<i32>} : memref<8x16x128xbf16, #tpu.memory_space<vmem>>, vector<1x16x128xbf16>,
    %117 = vector.broadcast %95 : vector<16x1xf32> to vector<16x128xf32>
    %118 = arith.mulf %109, %117 : vector<16x128xf32>
    %119 = arith.truncf %118 : vector<16x128xf32> to vector<16x128xbf16>
    %120 = arith.index_cast %21 : i32 to index
    %c0_35 = arith.constant 0 : index
    %c0_36 = arith.constant 0 : index
    %121 = vector.load %arg7[%120, %c0_35, %c0_36] : memref<8x16x128xbf16, #tpu.memory_space<vmem>>, vector<1x16x128xbf16>
    %122 = vector.shape_cast %121 : vector<1x16x128xbf16> to vector<16x128xbf16>
    %123 = vector.shape_cast %119 : vector<16x128xbf16> to vector<1x16x128xbf16>
    tpu.vector_store %arg7[%120, %c0_35, %c0_36], %123 {strides = array<i32>} : memref<8x16x128xbf16, #tpu.memory_space<vmem>>, vector<1x16x128xbf16>,
    %c1_i32 = arith.constant 1 : i32
    %c7_i32_37 = arith.constant 7 : i32
    %124 = arith.subi %c7_i32_37, %c1_i32 : i32
    %125 = arith.index_cast %c1_i32 : i32 to index
    %c0_38 = arith.constant 0 : index
    %c0_39 = arith.constant 0 : index
    %126 = vector.load %arg1[%125, %c0_38, %c0_39] : memref<8x16x384xbf16, #tpu.memory_space<vmem>>, vector<1x16x384xbf16>
    %127 = vector.shape_cast %126 : vector<1x16x384xbf16> to vector<16x384xbf16>
    %128 = arith.extf %127 : vector<16x384xbf16> to vector<16x384xf32>
    %129 = arith.index_cast %124 : i32 to index
    %c0_40 = arith.constant 0 : index
    %c0_41 = arith.constant 0 : index
    %130 = vector.load %arg2[%129, %c0_40, %c0_41] : memref<8x16x384xbf16, #tpu.memory_space<vmem>>, vector<1x16x384xbf16>
    %131 = vector.shape_cast %130 : vector<1x16x384xbf16> to vector<16x384xbf16>
    %132 = arith.extf %131 : vector<16x384xbf16> to vector<16x384xf32>
    %cst_42 = arith.constant dense<0.000000e+00> : vector<16x384xf32>
    %133 = tpu.matmul %102, %4, %cst_42 {dimension_numbers = #tpu.dot_dimension_numbers<[1], [0], [0], [1], [0, 0, 1, 1], [], []>} : vector<16x128xf32>, vector<128x384xf32>, vector<16x384xf32> -> vector<16x384xf32>
    %134 = arith.addf %133, %10 : vector<16x384xf32>
    %cst_43 = arith.constant dense<0.000000e+00> : vector<16x384xf32>
    %135 = tpu.matmul %109, %6, %cst_43 {dimension_numbers = #tpu.dot_dimension_numbers<[1], [0], [0], [1], [0, 0, 1, 1], [], []>} : vector<16x128xf32>, vector<128x384xf32>, vector<16x384xf32> -> vector<16x384xf32>
    %136 = arith.addf %135, %14 : vector<16x384xf32>
    %137 = vector.extract_strided_slice %128 {offsets = [0, 0], sizes = [16, 128], strides = [1, 1]} : vector<16x384xf32> to vector<16x128xf32>
    %138 = vector.extract_strided_slice %134 {offsets = [0, 0], sizes = [16, 128], strides = [1, 1]} : vector<16x384xf32> to vector<16x128xf32>
    %139 = arith.addf %137, %138 : vector<16x128xf32>
    %140 = arith.negf %139 : vector<16x128xf32>
    %141 = math.exp %140 : vector<16x128xf32>
    %cst_44 = arith.constant 1.000000e+00 : f32
    %142 = vector.broadcast %cst_44 : f32 to vector<16x128xf32>
    %143 = arith.addf %142, %141 : vector<16x128xf32>
    %144 = arith.divf %142, %143 : vector<16x128xf32>
    %145 = vector.extract_strided_slice %128 {offsets = [0, 128], sizes = [16, 128], strides = [1, 1]} : vector<16x384xf32> to vector<16x128xf32>
    %146 = vector.extract_strided_slice %134 {offsets = [0, 128], sizes = [16, 128], strides = [1, 1]} : vector<16x384xf32> to vector<16x128xf32>
    %147 = arith.addf %145, %146 : vector<16x128xf32>
    %148 = arith.negf %147 : vector<16x128xf32>
    %149 = math.exp %148 : vector<16x128xf32>
    %cst_45 = arith.constant 1.000000e+00 : f32
    %150 = vector.broadcast %cst_45 : f32 to vector<16x128xf32>
    %151 = arith.addf %150, %149 : vector<16x128xf32>
    %152 = arith.divf %150, %151 : vector<16x128xf32>
    %153 = vector.extract_strided_slice %128 {offsets = [0, 256], sizes = [16, 128], strides = [1, 1]} : vector<16x384xf32> to vector<16x128xf32>
    %154 = vector.extract_strided_slice %134 {offsets = [0, 256], sizes = [16, 128], strides = [1, 1]} : vector<16x384xf32> to vector<16x128xf32>
    %155 = arith.mulf %144, %154 : vector<16x128xf32>
    %156 = arith.addf %153, %155 : vector<16x128xf32>
    %157 = math.tanh %156 : vector<16x128xf32>
    %cst_46 = arith.constant 1.000000e+00 : f32
    %158 = vector.broadcast %cst_46 : f32 to vector<16x128xf32>
    %159 = arith.subf %158, %152 : vector<16x128xf32>
    %160 = arith.mulf %159, %157 : vector<16x128xf32>
    %161 = arith.mulf %152, %102 : vector<16x128xf32>
    %162 = arith.addf %160, %161 : vector<16x128xf32>
    %163 = vector.extract_strided_slice %132 {offsets = [0, 0], sizes = [16, 128], strides = [1, 1]} : vector<16x384xf32> to vector<16x128xf32>
    %164 = vector.extract_strided_slice %136 {offsets = [0, 0], sizes = [16, 128], strides = [1, 1]} : vector<16x384xf32> to vector<16x128xf32>
    %165 = arith.addf %163, %164 : vector<16x128xf32>
    %166 = arith.negf %165 : vector<16x128xf32>
    %167 = math.exp %166 : vector<16x128xf32>
    %cst_47 = arith.constant 1.000000e+00 : f32
    %168 = vector.broadcast %cst_47 : f32 to vector<16x128xf32>
    %169 = arith.addf %168, %167 : vector<16x128xf32>
    %170 = arith.divf %168, %169 : vector<16x128xf32>
    %171 = vector.extract_strided_slice %132 {offsets = [0, 128], sizes = [16, 128], strides = [1, 1]} : vector<16x384xf32> to vector<16x128xf32>
    %172 = vector.extract_strided_slice %136 {offsets = [0, 128], sizes = [16, 128], strides = [1, 1]} : vector<16x384xf32> to vector<16x128xf32>
    %173 = arith.addf %171, %172 : vector<16x128xf32>
    %174 = arith.negf %173 : vector<16x128xf32>
    %175 = math.exp %174 : vector<16x128xf32>
    %cst_48 = arith.constant 1.000000e+00 : f32
    %176 = vector.broadcast %cst_48 : f32 to vector<16x128xf32>
    %177 = arith.addf %176, %175 : vector<16x128xf32>
    %178 = arith.divf %176, %177 : vector<16x128xf32>
    %179 = vector.extract_strided_slice %132 {offsets = [0, 256], sizes = [16, 128], strides = [1, 1]} : vector<16x384xf32> to vector<16x128xf32>
    %180 = vector.extract_strided_slice %136 {offsets = [0, 256], sizes = [16, 128], strides = [1, 1]} : vector<16x384xf32> to vector<16x128xf32>
    %181 = arith.mulf %170, %180 : vector<16x128xf32>
    %182 = arith.addf %179, %181 : vector<16x128xf32>
    %183 = math.tanh %182 : vector<16x128xf32>
    %cst_49 = arith.constant 1.000000e+00 : f32
    %184 = vector.broadcast %cst_49 : f32 to vector<16x128xf32>
    %185 = arith.subf %184, %178 : vector<16x128xf32>
    %186 = arith.mulf %185, %183 : vector<16x128xf32>
    %187 = arith.mulf %178, %109 : vector<16x128xf32>
    %188 = arith.addf %186, %187 : vector<16x128xf32>
    %189 = arith.addi %16, %c1_i32 : i32
    %190 = vector.broadcast %189 : i32 to vector<16x1xi32>
    %191 = arith.cmpi sgt, %15, %190 : vector<16x1xi32>
    %192 = arith.extui %191 : vector<16x1xi1> to vector<16x1xi32>
    %193 = arith.sitofp %192 : vector<16x1xi32> to vector<16x1xf32>
    %194 = arith.addi %18, %124 : i32
    %195 = vector.broadcast %194 : i32 to vector<16x1xi32>
    %196 = arith.cmpi sgt, %15, %195 : vector<16x1xi32>
    %197 = arith.extui %196 : vector<16x1xi1> to vector<16x1xi32>
    %198 = arith.sitofp %197 : vector<16x1xi32> to vector<16x1xf32>
    %199 = vector.broadcast %193 : vector<16x1xf32> to vector<16x128xf32>
    %200 = arith.mulf %199, %162 : vector<16x128xf32>
    %cst_50 = arith.constant 1.000000e+00 : f32
    %201 = vector.broadcast %cst_50 : f32 to vector<16x1xf32>
    %202 = arith.subf %201, %193 : vector<16x1xf32>
    %203 = vector.broadcast %202 : vector<16x1xf32> to vector<16x128xf32>
    %204 = arith.mulf %203, %102 : vector<16x128xf32>
    %205 = arith.addf %200, %204 : vector<16x128xf32>
    %206 = vector.broadcast %198 : vector<16x1xf32> to vector<16x128xf32>
    %207 = arith.mulf %206, %188 : vector<16x128xf32>
    %cst_51 = arith.constant 1.000000e+00 : f32
    %208 = vector.broadcast %cst_51 : f32 to vector<16x1xf32>
    %209 = arith.subf %208, %198 : vector<16x1xf32>
    %210 = vector.broadcast %209 : vector<16x1xf32> to vector<16x128xf32>
    %211 = arith.mulf %210, %109 : vector<16x128xf32>
    %212 = arith.addf %207, %211 : vector<16x128xf32>
    %213 = vector.broadcast %193 : vector<16x1xf32> to vector<16x128xf32>
    %214 = arith.mulf %205, %213 : vector<16x128xf32>
    %215 = arith.truncf %214 : vector<16x128xf32> to vector<16x128xbf16>
    %216 = arith.index_cast %c1_i32 : i32 to index
    %c0_52 = arith.constant 0 : index
    %c0_53 = arith.constant 0 : index
    %217 = vector.load %arg6[%216, %c0_52, %c0_53] : memref<8x16x128xbf16, #tpu.memory_space<vmem>>, vector<1x16x128xbf16>
    %218 = vector.shape_cast %217 : vector<1x16x128xbf16> to vector<16x128xbf16>
    %219 = vector.shape_cast %215 : vector<16x128xbf16> to vector<1x16x128xbf16>
    tpu.vector_store %arg6[%216, %c0_52, %c0_53], %219 {strides = array<i32>} : memref<8x16x128xbf16, #tpu.memory_space<vmem>>, vector<1x16x128xbf16>,
    %220 = vector.broadcast %198 : vector<16x1xf32> to vector<16x128xf32>
    %221 = arith.mulf %212, %220 : vector<16x128xf32>
    %222 = arith.truncf %221 : vector<16x128xf32> to vector<16x128xbf16>
    %223 = arith.index_cast %124 : i32 to index
    %c0_54 = arith.constant 0 : index
    %c0_55 = arith.constant 0 : index
    %224 = vector.load %arg7[%223, %c0_54, %c0_55] : memref<8x16x128xbf16, #tpu.memory_space<vmem>>, vector<1x16x128xbf16>
    %225 = vector.shape_cast %224 : vector<1x16x128xbf16> to vector<16x128xbf16>
    %226 = vector.shape_cast %222 : vector<16x128xbf16> to vector<1x16x128xbf16>
    tpu.vector_store %arg7[%223, %c0_54, %c0_55], %226 {strides = array<i32>} : memref<8x16x128xbf16, #tpu.memory_space<vmem>>, vector<1x16x128xbf16>,
    %c2_i32 = arith.constant 2 : i32
    %c7_i32_56 = arith.constant 7 : i32
    %227 = arith.subi %c7_i32_56, %c2_i32 : i32
    %228 = arith.index_cast %c2_i32 : i32 to index
    %c0_57 = arith.constant 0 : index
    %c0_58 = arith.constant 0 : index
    %229 = vector.load %arg1[%228, %c0_57, %c0_58] : memref<8x16x384xbf16, #tpu.memory_space<vmem>>, vector<1x16x384xbf16>
    %230 = vector.shape_cast %229 : vector<1x16x384xbf16> to vector<16x384xbf16>
    %231 = arith.extf %230 : vector<16x384xbf16> to vector<16x384xf32>
    %232 = arith.index_cast %227 : i32 to index
    %c0_59 = arith.constant 0 : index
    %c0_60 = arith.constant 0 : index
    %233 = vector.load %arg2[%232, %c0_59, %c0_60] : memref<8x16x384xbf16, #tpu.memory_space<vmem>>, vector<1x16x384xbf16>
    %234 = vector.shape_cast %233 : vector<1x16x384xbf16> to vector<16x384xbf16>
    %235 = arith.extf %234 : vector<16x384xbf16> to vector<16x384xf32>
    %cst_61 = arith.constant dense<0.000000e+00> : vector<16x384xf32>
    %236 = tpu.matmul %205, %4, %cst_61 {dimension_numbers = #tpu.dot_dimension_numbers<[1], [0], [0], [1], [0, 0, 1, 1], [], []>} : vector<16x128xf32>, vector<128x384xf32>, vector<16x384xf32> -> vector<16x384xf32>
    %237 = arith.addf %236, %10 : vector<16x384xf32>
    %cst_62 = arith.constant dense<0.000000e+00> : vector<16x384xf32>
    %238 = tpu.matmul %212, %6, %cst_62 {dimension_numbers = #tpu.dot_dimension_numbers<[1], [0], [0], [1], [0, 0, 1, 1], [], []>} : vector<16x128xf32>, vector<128x384xf32>, vector<16x384xf32> -> vector<16x384xf32>
    %239 = arith.addf %238, %14 : vector<16x384xf32>
    %240 = vector.extract_strided_slice %231 {offsets = [0, 0], sizes = [16, 128], strides = [1, 1]} : vector<16x384xf32> to vector<16x128xf32>
    %241 = vector.extract_strided_slice %237 {offsets = [0, 0], sizes = [16, 128], strides = [1, 1]} : vector<16x384xf32> to vector<16x128xf32>
    %242 = arith.addf %240, %241 : vector<16x128xf32>
    %243 = arith.negf %242 : vector<16x128xf32>
    %244 = math.exp %243 : vector<16x128xf32>
    %cst_63 = arith.constant 1.000000e+00 : f32
    %245 = vector.broadcast %cst_63 : f32 to vector<16x128xf32>
    %246 = arith.addf %245, %244 : vector<16x128xf32>
    %247 = arith.divf %245, %246 : vector<16x128xf32>
    %248 = vector.extract_strided_slice %231 {offsets = [0, 128], sizes = [16, 128], strides = [1, 1]} : vector<16x384xf32> to vector<16x128xf32>
    %249 = vector.extract_strided_slice %237 {offsets = [0, 128], sizes = [16, 128], strides = [1, 1]} : vector<16x384xf32> to vector<16x128xf32>
    %250 = arith.addf %248, %249 : vector<16x128xf32>
    %251 = arith.negf %250 : vector<16x128xf32>
    %252 = math.exp %251 : vector<16x128xf32>
    %cst_64 = arith.constant 1.000000e+00 : f32
    %253 = vector.broadcast %cst_64 : f32 to vector<16x128xf32>
    %254 = arith.addf %253, %252 : vector<16x128xf32>
    %255 = arith.divf %253, %254 : vector<16x128xf32>
    %256 = vector.extract_strided_slice %231 {offsets = [0, 256], sizes = [16, 128], strides = [1, 1]} : vector<16x384xf32> to vector<16x128xf32>
    %257 = vector.extract_strided_slice %237 {offsets = [0, 256], sizes = [16, 128], strides = [1, 1]} : vector<16x384xf32> to vector<16x128xf32>
    %258 = arith.mulf %247, %257 : vector<16x128xf32>
    %259 = arith.addf %256, %258 : vector<16x128xf32>
    %260 = math.tanh %259 : vector<16x128xf32>
    %cst_65 = arith.constant 1.000000e+00 : f32
    %261 = vector.broadcast %cst_65 : f32 to vector<16x128xf32>
    %262 = arith.subf %261, %255 : vector<16x128xf32>
    %263 = arith.mulf %262, %260 : vector<16x128xf32>
    %264 = arith.mulf %255, %205 : vector<16x128xf32>
    %265 = arith.addf %263, %264 : vector<16x128xf32>
    %266 = vector.extract_strided_slice %235 {offsets = [0, 0], sizes = [16, 128], strides = [1, 1]} : vector<16x384xf32> to vector<16x128xf32>
    %267 = vector.extract_strided_slice %239 {offsets = [0, 0], sizes = [16, 128], strides = [1, 1]} : vector<16x384xf32> to vector<16x128xf32>
    %268 = arith.addf %266, %267 : vector<16x128xf32>
    %269 = arith.negf %268 : vector<16x128xf32>
    %270 = math.exp %269 : vector<16x128xf32>
    %cst_66 = arith.constant 1.000000e+00 : f32
    %271 = vector.broadcast %cst_66 : f32 to vector<16x128xf32>
    %272 = arith.addf %271, %270 : vector<16x128xf32>
    %273 = arith.divf %271, %272 : vector<16x128xf32>
    %274 = vector.extract_strided_slice %235 {offsets = [0, 128], sizes = [16, 128], strides = [1, 1]} : vector<16x384xf32> to vector<16x128xf32>
    %275 = vector.extract_strided_slice %239 {offsets = [0, 128], sizes = [16, 128], strides = [1, 1]} : vector<16x384xf32> to vector<16x128xf32>
    %276 = arith.addf %274, %275 : vector<16x128xf32>
    %277 = arith.negf %276 : vector<16x128xf32>
    %278 = math.exp %277 : vector<16x128xf32>
    %cst_67 = arith.constant 1.000000e+00 : f32
    %279 = vector.broadcast %cst_67 : f32 to vector<16x128xf32>
    %280 = arith.addf %279, %278 : vector<16x128xf32>
    %281 = arith.divf %279, %280 : vector<16x128xf32>
    %282 = vector.extract_strided_slice %235 {offsets = [0, 256], sizes = [16, 128], strides = [1, 1]} : vector<16x384xf32> to vector<16x128xf32>
    %283 = vector.extract_strided_slice %239 {offsets = [0, 256], sizes = [16, 128], strides = [1, 1]} : vector<16x384xf32> to vector<16x128xf32>
    %284 = arith.mulf %273, %283 : vector<16x128xf32>
    %285 = arith.addf %282, %284 : vector<16x128xf32>
    %286 = math.tanh %285 : vector<16x128xf32>
    %cst_68 = arith.constant 1.000000e+00 : f32
    %287 = vector.broadcast %cst_68 : f32 to vector<16x128xf32>
    %288 = arith.subf %287, %281 : vector<16x128xf32>
    %289 = arith.mulf %288, %286 : vector<16x128xf32>
    %290 = arith.mulf %281, %212 : vector<16x128xf32>
    %291 = arith.addf %289, %290 : vector<16x128xf32>
    %292 = arith.addi %16, %c2_i32 : i32
    %293 = vector.broadcast %292 : i32 to vector<16x1xi32>
    %294 = arith.cmpi sgt, %15, %293 : vector<16x1xi32>
    %295 = arith.extui %294 : vector<16x1xi1> to vector<16x1xi32>
    %296 = arith.sitofp %295 : vector<16x1xi32> to vector<16x1xf32>
    %297 = arith.addi %18, %227 : i32
    %298 = vector.broadcast %297 : i32 to vector<16x1xi32>
    %299 = arith.cmpi sgt, %15, %298 : vector<16x1xi32>
    %300 = arith.extui %299 : vector<16x1xi1> to vector<16x1xi32>
    %301 = arith.sitofp %300 : vector<16x1xi32> to vector<16x1xf32>
    %302 = vector.broadcast %296 : vector<16x1xf32> to vector<16x128xf32>
    %303 = arith.mulf %302, %265 : vector<16x128xf32>
    %cst_69 = arith.constant 1.000000e+00 : f32
    %304 = vector.broadcast %cst_69 : f32 to vector<16x1xf32>
    %305 = arith.subf %304, %296 : vector<16x1xf32>
    %306 = vector.broadcast %305 : vector<16x1xf32> to vector<16x128xf32>
    %307 = arith.mulf %306, %205 : vector<16x128xf32>
    %308 = arith.addf %303, %307 : vector<16x128xf32>
    %309 = vector.broadcast %301 : vector<16x1xf32> to vector<16x128xf32>
    %310 = arith.mulf %309, %291 : vector<16x128xf32>
    %cst_70 = arith.constant 1.000000e+00 : f32
    %311 = vector.broadcast %cst_70 : f32 to vector<16x1xf32>
    %312 = arith.subf %311, %301 : vector<16x1xf32>
    %313 = vector.broadcast %312 : vector<16x1xf32> to vector<16x128xf32>
    %314 = arith.mulf %313, %212 : vector<16x128xf32>
    %315 = arith.addf %310, %314 : vector<16x128xf32>
    %316 = vector.broadcast %296 : vector<16x1xf32> to vector<16x128xf32>
    %317 = arith.mulf %308, %316 : vector<16x128xf32>
    %318 = arith.truncf %317 : vector<16x128xf32> to vector<16x128xbf16>
    %319 = arith.index_cast %c2_i32 : i32 to index
    %c0_71 = arith.constant 0 : index
    %c0_72 = arith.constant 0 : index
    %320 = vector.load %arg6[%319, %c0_71, %c0_72] : memref<8x16x128xbf16, #tpu.memory_space<vmem>>, vector<1x16x128xbf16>
    %321 = vector.shape_cast %320 : vector<1x16x128xbf16> to vector<16x128xbf16>
    %322 = vector.shape_cast %318 : vector<16x128xbf16> to vector<1x16x128xbf16>
    tpu.vector_store %arg6[%319, %c0_71, %c0_72], %322 {strides = array<i32>} : memref<8x16x128xbf16, #tpu.memory_space<vmem>>, vector<1x16x128xbf16>,
    %323 = vector.broadcast %301 : vector<16x1xf32> to vector<16x128xf32>
    %324 = arith.mulf %315, %323 : vector<16x128xf32>
    %325 = arith.truncf %324 : vector<16x128xf32> to vector<16x128xbf16>
    %326 = arith.index_cast %227 : i32 to index
    %c0_73 = arith.constant 0 : index
    %c0_74 = arith.constant 0 : index
    %327 = vector.load %arg7[%326, %c0_73, %c0_74] : memref<8x16x128xbf16, #tpu.memory_space<vmem>>, vector<1x16x128xbf16>
    %328 = vector.shape_cast %327 : vector<1x16x128xbf16> to vector<16x128xbf16>
    %329 = vector.shape_cast %325 : vector<16x128xbf16> to vector<1x16x128xbf16>
    tpu.vector_store %arg7[%326, %c0_73, %c0_74], %329 {strides = array<i32>} : memref<8x16x128xbf16, #tpu.memory_space<vmem>>, vector<1x16x128xbf16>,
    %c3_i32 = arith.constant 3 : i32
    %c7_i32_75 = arith.constant 7 : i32
    %330 = arith.subi %c7_i32_75, %c3_i32 : i32
    %331 = arith.index_cast %c3_i32 : i32 to index
    %c0_76 = arith.constant 0 : index
    %c0_77 = arith.constant 0 : index
    %332 = vector.load %arg1[%331, %c0_76, %c0_77] : memref<8x16x384xbf16, #tpu.memory_space<vmem>>, vector<1x16x384xbf16>
    %333 = vector.shape_cast %332 : vector<1x16x384xbf16> to vector<16x384xbf16>
    %334 = arith.extf %333 : vector<16x384xbf16> to vector<16x384xf32>
    %335 = arith.index_cast %330 : i32 to index
    %c0_78 = arith.constant 0 : index
    %c0_79 = arith.constant 0 : index
    %336 = vector.load %arg2[%335, %c0_78, %c0_79] : memref<8x16x384xbf16, #tpu.memory_space<vmem>>, vector<1x16x384xbf16>
    %337 = vector.shape_cast %336 : vector<1x16x384xbf16> to vector<16x384xbf16>
    %338 = arith.extf %337 : vector<16x384xbf16> to vector<16x384xf32>
    %cst_80 = arith.constant dense<0.000000e+00> : vector<16x384xf32>
    %339 = tpu.matmul %308, %4, %cst_80 {dimension_numbers = #tpu.dot_dimension_numbers<[1], [0], [0], [1], [0, 0, 1, 1], [], []>} : vector<16x128xf32>, vector<128x384xf32>, vector<16x384xf32> -> vector<16x384xf32>
    %340 = arith.addf %339, %10 : vector<16x384xf32>
    %cst_81 = arith.constant dense<0.000000e+00> : vector<16x384xf32>
    %341 = tpu.matmul %315, %6, %cst_81 {dimension_numbers = #tpu.dot_dimension_numbers<[1], [0], [0], [1], [0, 0, 1, 1], [], []>} : vector<16x128xf32>, vector<128x384xf32>, vector<16x384xf32> -> vector<16x384xf32>
    %342 = arith.addf %341, %14 : vector<16x384xf32>
    %343 = vector.extract_strided_slice %334 {offsets = [0, 0], sizes = [16, 128], strides = [1, 1]} : vector<16x384xf32> to vector<16x128xf32>
    %344 = vector.extract_strided_slice %340 {offsets = [0, 0], sizes = [16, 128], strides = [1, 1]} : vector<16x384xf32> to vector<16x128xf32>
    %345 = arith.addf %343, %344 : vector<16x128xf32>
    %346 = arith.negf %345 : vector<16x128xf32>
    %347 = math.exp %346 : vector<16x128xf32>
    %cst_82 = arith.constant 1.000000e+00 : f32
    %348 = vector.broadcast %cst_82 : f32 to vector<16x128xf32>
    %349 = arith.addf %348, %347 : vector<16x128xf32>
    %350 = arith.divf %348, %349 : vector<16x128xf32>
    %351 = vector.extract_strided_slice %334 {offsets = [0, 128], sizes = [16, 128], strides = [1, 1]} : vector<16x384xf32> to vector<16x128xf32>
    %352 = vector.extract_strided_slice %340 {offsets = [0, 128], sizes = [16, 128], strides = [1, 1]} : vector<16x384xf32> to vector<16x128xf32>
    %353 = arith.addf %351, %352 : vector<16x128xf32>
    %354 = arith.negf %353 : vector<16x128xf32>
    %355 = math.exp %354 : vector<16x128xf32>
    %cst_83 = arith.constant 1.000000e+00 : f32
    %356 = vector.broadcast %cst_83 : f32 to vector<16x128xf32>
    %357 = arith.addf %356, %355 : vector<16x128xf32>
    %358 = arith.divf %356, %357 : vector<16x128xf32>
    %359 = vector.extract_strided_slice %334 {offsets = [0, 256], sizes = [16, 128], strides = [1, 1]} : vector<16x384xf32> to vector<16x128xf32>
    %360 = vector.extract_strided_slice %340 {offsets = [0, 256], sizes = [16, 128], strides = [1, 1]} : vector<16x384xf32> to vector<16x128xf32>
    %361 = arith.mulf %350, %360 : vector<16x128xf32>
    %362 = arith.addf %359, %361 : vector<16x128xf32>
    %363 = math.tanh %362 : vector<16x128xf32>
    %cst_84 = arith.constant 1.000000e+00 : f32
    %364 = vector.broadcast %cst_84 : f32 to vector<16x128xf32>
    %365 = arith.subf %364, %358 : vector<16x128xf32>
    %366 = arith.mulf %365, %363 : vector<16x128xf32>
    %367 = arith.mulf %358, %308 : vector<16x128xf32>
    %368 = arith.addf %366, %367 : vector<16x128xf32>
    %369 = vector.extract_strided_slice %338 {offsets = [0, 0], sizes = [16, 128], strides = [1, 1]} : vector<16x384xf32> to vector<16x128xf32>
    %370 = vector.extract_strided_slice %342 {offsets = [0, 0], sizes = [16, 128], strides = [1, 1]} : vector<16x384xf32> to vector<16x128xf32>
    %371 = arith.addf %369, %370 : vector<16x128xf32>
    %372 = arith.negf %371 : vector<16x128xf32>
    %373 = math.exp %372 : vector<16x128xf32>
    %cst_85 = arith.constant 1.000000e+00 : f32
    %374 = vector.broadcast %cst_85 : f32 to vector<16x128xf32>
    %375 = arith.addf %374, %373 : vector<16x128xf32>
    %376 = arith.divf %374, %375 : vector<16x128xf32>
    %377 = vector.extract_strided_slice %338 {offsets = [0, 128], sizes = [16, 128], strides = [1, 1]} : vector<16x384xf32> to vector<16x128xf32>
    %378 = vector.extract_strided_slice %342 {offsets = [0, 128], sizes = [16, 128], strides = [1, 1]} : vector<16x384xf32> to vector<16x128xf32>
    %379 = arith.addf %377, %378 : vector<16x128xf32>
    %380 = arith.negf %379 : vector<16x128xf32>
    %381 = math.exp %380 : vector<16x128xf32>
    %cst_86 = arith.constant 1.000000e+00 : f32
    %382 = vector.broadcast %cst_86 : f32 to vector<16x128xf32>
    %383 = arith.addf %382, %381 : vector<16x128xf32>
    %384 = arith.divf %382, %383 : vector<16x128xf32>
    %385 = vector.extract_strided_slice %338 {offsets = [0, 256], sizes = [16, 128], strides = [1, 1]} : vector<16x384xf32> to vector<16x128xf32>
    %386 = vector.extract_strided_slice %342 {offsets = [0, 256], sizes = [16, 128], strides = [1, 1]} : vector<16x384xf32> to vector<16x128xf32>
    %387 = arith.mulf %376, %386 : vector<16x128xf32>
    %388 = arith.addf %385, %387 : vector<16x128xf32>
    %389 = math.tanh %388 : vector<16x128xf32>
    %cst_87 = arith.constant 1.000000e+00 : f32
    %390 = vector.broadcast %cst_87 : f32 to vector<16x128xf32>
    %391 = arith.subf %390, %384 : vector<16x128xf32>
    %392 = arith.mulf %391, %389 : vector<16x128xf32>
    %393 = arith.mulf %384, %315 : vector<16x128xf32>
    %394 = arith.addf %392, %393 : vector<16x128xf32>
    %395 = arith.addi %16, %c3_i32 : i32
    %396 = vector.broadcast %395 : i32 to vector<16x1xi32>
    %397 = arith.cmpi sgt, %15, %396 : vector<16x1xi32>
    %398 = arith.extui %397 : vector<16x1xi1> to vector<16x1xi32>
    %399 = arith.sitofp %398 : vector<16x1xi32> to vector<16x1xf32>
    %400 = arith.addi %18, %330 : i32
    %401 = vector.broadcast %400 : i32 to vector<16x1xi32>
    %402 = arith.cmpi sgt, %15, %401 : vector<16x1xi32>
    %403 = arith.extui %402 : vector<16x1xi1> to vector<16x1xi32>
    %404 = arith.sitofp %403 : vector<16x1xi32> to vector<16x1xf32>
    %405 = vector.broadcast %399 : vector<16x1xf32> to vector<16x128xf32>
    %406 = arith.mulf %405, %368 : vector<16x128xf32>
    %cst_88 = arith.constant 1.000000e+00 : f32
    %407 = vector.broadcast %cst_88 : f32 to vector<16x1xf32>
    %408 = arith.subf %407, %399 : vector<16x1xf32>
    %409 = vector.broadcast %408 : vector<16x1xf32> to vector<16x128xf32>
    %410 = arith.mulf %409, %308 : vector<16x128xf32>
    %411 = arith.addf %406, %410 : vector<16x128xf32>
    %412 = vector.broadcast %404 : vector<16x1xf32> to vector<16x128xf32>
    %413 = arith.mulf %412, %394 : vector<16x128xf32>
    %cst_89 = arith.constant 1.000000e+00 : f32
    %414 = vector.broadcast %cst_89 : f32 to vector<16x1xf32>
    %415 = arith.subf %414, %404 : vector<16x1xf32>
    %416 = vector.broadcast %415 : vector<16x1xf32> to vector<16x128xf32>
    %417 = arith.mulf %416, %315 : vector<16x128xf32>
    %418 = arith.addf %413, %417 : vector<16x128xf32>
    %419 = vector.broadcast %399 : vector<16x1xf32> to vector<16x128xf32>
    %420 = arith.mulf %411, %419 : vector<16x128xf32>
    %421 = arith.truncf %420 : vector<16x128xf32> to vector<16x128xbf16>
    %422 = arith.index_cast %c3_i32 : i32 to index
    %c0_90 = arith.constant 0 : index
    %c0_91 = arith.constant 0 : index
    %423 = vector.load %arg6[%422, %c0_90, %c0_91] : memref<8x16x128xbf16, #tpu.memory_space<vmem>>, vector<1x16x128xbf16>
    %424 = vector.shape_cast %423 : vector<1x16x128xbf16> to vector<16x128xbf16>
    %425 = vector.shape_cast %421 : vector<16x128xbf16> to vector<1x16x128xbf16>
    tpu.vector_store %arg6[%422, %c0_90, %c0_91], %425 {strides = array<i32>} : memref<8x16x128xbf16, #tpu.memory_space<vmem>>, vector<1x16x128xbf16>,
    %426 = vector.broadcast %404 : vector<16x1xf32> to vector<16x128xf32>
    %427 = arith.mulf %418, %426 : vector<16x128xf32>
    %428 = arith.truncf %427 : vector<16x128xf32> to vector<16x128xbf16>
    %429 = arith.index_cast %330 : i32 to index
    %c0_92 = arith.constant 0 : index
    %c0_93 = arith.constant 0 : index
    %430 = vector.load %arg7[%429, %c0_92, %c0_93] : memref<8x16x128xbf16, #tpu.memory_space<vmem>>, vector<1x16x128xbf16>
    %431 = vector.shape_cast %430 : vector<1x16x128xbf16> to vector<16x128xbf16>
    %432 = vector.shape_cast %428 : vector<16x128xbf16> to vector<1x16x128xbf16>
    tpu.vector_store %arg7[%429, %c0_92, %c0_93], %432 {strides = array<i32>} : memref<8x16x128xbf16, #tpu.memory_space<vmem>>, vector<1x16x128xbf16>,
    %c4_i32 = arith.constant 4 : i32
    %c7_i32_94 = arith.constant 7 : i32
    %433 = arith.subi %c7_i32_94, %c4_i32 : i32
    %434 = arith.index_cast %c4_i32 : i32 to index
    %c0_95 = arith.constant 0 : index
    %c0_96 = arith.constant 0 : index
    %435 = vector.load %arg1[%434, %c0_95, %c0_96] : memref<8x16x384xbf16, #tpu.memory_space<vmem>>, vector<1x16x384xbf16>
    %436 = vector.shape_cast %435 : vector<1x16x384xbf16> to vector<16x384xbf16>
    %437 = arith.extf %436 : vector<16x384xbf16> to vector<16x384xf32>
    %438 = arith.index_cast %433 : i32 to index
    %c0_97 = arith.constant 0 : index
    %c0_98 = arith.constant 0 : index
    %439 = vector.load %arg2[%438, %c0_97, %c0_98] : memref<8x16x384xbf16, #tpu.memory_space<vmem>>, vector<1x16x384xbf16>
    %440 = vector.shape_cast %439 : vector<1x16x384xbf16> to vector<16x384xbf16>
    %441 = arith.extf %440 : vector<16x384xbf16> to vector<16x384xf32>
    %cst_99 = arith.constant dense<0.000000e+00> : vector<16x384xf32>
    %442 = tpu.matmul %411, %4, %cst_99 {dimension_numbers = #tpu.dot_dimension_numbers<[1], [0], [0], [1], [0, 0, 1, 1], [], []>} : vector<16x128xf32>, vector<128x384xf32>, vector<16x384xf32> -> vector<16x384xf32>
    %443 = arith.addf %442, %10 : vector<16x384xf32>
    %cst_100 = arith.constant dense<0.000000e+00> : vector<16x384xf32>
    %444 = tpu.matmul %418, %6, %cst_100 {dimension_numbers = #tpu.dot_dimension_numbers<[1], [0], [0], [1], [0, 0, 1, 1], [], []>} : vector<16x128xf32>, vector<128x384xf32>, vector<16x384xf32> -> vector<16x384xf32>
    %445 = arith.addf %444, %14 : vector<16x384xf32>
    %446 = vector.extract_strided_slice %437 {offsets = [0, 0], sizes = [16, 128], strides = [1, 1]} : vector<16x384xf32> to vector<16x128xf32>
    %447 = vector.extract_strided_slice %443 {offsets = [0, 0], sizes = [16, 128], strides = [1, 1]} : vector<16x384xf32> to vector<16x128xf32>
    %448 = arith.addf %446, %447 : vector<16x128xf32>
    %449 = arith.negf %448 : vector<16x128xf32>
    %450 = math.exp %449 : vector<16x128xf32>
    %cst_101 = arith.constant 1.000000e+00 : f32
    %451 = vector.broadcast %cst_101 : f32 to vector<16x128xf32>
    %452 = arith.addf %451, %450 : vector<16x128xf32>
    %453 = arith.divf %451, %452 : vector<16x128xf32>
    %454 = vector.extract_strided_slice %437 {offsets = [0, 128], sizes = [16, 128], strides = [1, 1]} : vector<16x384xf32> to vector<16x128xf32>
    %455 = vector.extract_strided_slice %443 {offsets = [0, 128], sizes = [16, 128], strides = [1, 1]} : vector<16x384xf32> to vector<16x128xf32>
    %456 = arith.addf %454, %455 : vector<16x128xf32>
    %457 = arith.negf %456 : vector<16x128xf32>
    %458 = math.exp %457 : vector<16x128xf32>
    %cst_102 = arith.constant 1.000000e+00 : f32
    %459 = vector.broadcast %cst_102 : f32 to vector<16x128xf32>
    %460 = arith.addf %459, %458 : vector<16x128xf32>
    %461 = arith.divf %459, %460 : vector<16x128xf32>
    %462 = vector.extract_strided_slice %437 {offsets = [0, 256], sizes = [16, 128], strides = [1, 1]} : vector<16x384xf32> to vector<16x128xf32>
    %463 = vector.extract_strided_slice %443 {offsets = [0, 256], sizes = [16, 128], strides = [1, 1]} : vector<16x384xf32> to vector<16x128xf32>
    %464 = arith.mulf %453, %463 : vector<16x128xf32>
    %465 = arith.addf %462, %464 : vector<16x128xf32>
    %466 = math.tanh %465 : vector<16x128xf32>
    %cst_103 = arith.constant 1.000000e+00 : f32
    %467 = vector.broadcast %cst_103 : f32 to vector<16x128xf32>
    %468 = arith.subf %467, %461 : vector<16x128xf32>
    %469 = arith.mulf %468, %466 : vector<16x128xf32>
    %470 = arith.mulf %461, %411 : vector<16x128xf32>
    %471 = arith.addf %469, %470 : vector<16x128xf32>
    %472 = vector.extract_strided_slice %441 {offsets = [0, 0], sizes = [16, 128], strides = [1, 1]} : vector<16x384xf32> to vector<16x128xf32>
    %473 = vector.extract_strided_slice %445 {offsets = [0, 0], sizes = [16, 128], strides = [1, 1]} : vector<16x384xf32> to vector<16x128xf32>
    %474 = arith.addf %472, %473 : vector<16x128xf32>
    %475 = arith.negf %474 : vector<16x128xf32>
    %476 = math.exp %475 : vector<16x128xf32>
    %cst_104 = arith.constant 1.000000e+00 : f32
    %477 = vector.broadcast %cst_104 : f32 to vector<16x128xf32>
    %478 = arith.addf %477, %476 : vector<16x128xf32>
    %479 = arith.divf %477, %478 : vector<16x128xf32>
    %480 = vector.extract_strided_slice %441 {offsets = [0, 128], sizes = [16, 128], strides = [1, 1]} : vector<16x384xf32> to vector<16x128xf32>
    %481 = vector.extract_strided_slice %445 {offsets = [0, 128], sizes = [16, 128], strides = [1, 1]} : vector<16x384xf32> to vector<16x128xf32>
    %482 = arith.addf %480, %481 : vector<16x128xf32>
    %483 = arith.negf %482 : vector<16x128xf32>
    %484 = math.exp %483 : vector<16x128xf32>
    %cst_105 = arith.constant 1.000000e+00 : f32
    %485 = vector.broadcast %cst_105 : f32 to vector<16x128xf32>
    %486 = arith.addf %485, %484 : vector<16x128xf32>
    %487 = arith.divf %485, %486 : vector<16x128xf32>
    %488 = vector.extract_strided_slice %441 {offsets = [0, 256], sizes = [16, 128], strides = [1, 1]} : vector<16x384xf32> to vector<16x128xf32>
    %489 = vector.extract_strided_slice %445 {offsets = [0, 256], sizes = [16, 128], strides = [1, 1]} : vector<16x384xf32> to vector<16x128xf32>
    %490 = arith.mulf %479, %489 : vector<16x128xf32>
    %491 = arith.addf %488, %490 : vector<16x128xf32>
    %492 = math.tanh %491 : vector<16x128xf32>
    %cst_106 = arith.constant 1.000000e+00 : f32
    %493 = vector.broadcast %cst_106 : f32 to vector<16x128xf32>
    %494 = arith.subf %493, %487 : vector<16x128xf32>
    %495 = arith.mulf %494, %492 : vector<16x128xf32>
    %496 = arith.mulf %487, %418 : vector<16x128xf32>
    %497 = arith.addf %495, %496 : vector<16x128xf32>
    %498 = arith.addi %16, %c4_i32 : i32
    %499 = vector.broadcast %498 : i32 to vector<16x1xi32>
    %500 = arith.cmpi sgt, %15, %499 : vector<16x1xi32>
    %501 = arith.extui %500 : vector<16x1xi1> to vector<16x1xi32>
    %502 = arith.sitofp %501 : vector<16x1xi32> to vector<16x1xf32>
    %503 = arith.addi %18, %433 : i32
    %504 = vector.broadcast %503 : i32 to vector<16x1xi32>
    %505 = arith.cmpi sgt, %15, %504 : vector<16x1xi32>
    %506 = arith.extui %505 : vector<16x1xi1> to vector<16x1xi32>
    %507 = arith.sitofp %506 : vector<16x1xi32> to vector<16x1xf32>
    %508 = vector.broadcast %502 : vector<16x1xf32> to vector<16x128xf32>
    %509 = arith.mulf %508, %471 : vector<16x128xf32>
    %cst_107 = arith.constant 1.000000e+00 : f32
    %510 = vector.broadcast %cst_107 : f32 to vector<16x1xf32>
    %511 = arith.subf %510, %502 : vector<16x1xf32>
    %512 = vector.broadcast %511 : vector<16x1xf32> to vector<16x128xf32>
    %513 = arith.mulf %512, %411 : vector<16x128xf32>
    %514 = arith.addf %509, %513 : vector<16x128xf32>
    %515 = vector.broadcast %507 : vector<16x1xf32> to vector<16x128xf32>
    %516 = arith.mulf %515, %497 : vector<16x128xf32>
    %cst_108 = arith.constant 1.000000e+00 : f32
    %517 = vector.broadcast %cst_108 : f32 to vector<16x1xf32>
    %518 = arith.subf %517, %507 : vector<16x1xf32>
    %519 = vector.broadcast %518 : vector<16x1xf32> to vector<16x128xf32>
    %520 = arith.mulf %519, %418 : vector<16x128xf32>
    %521 = arith.addf %516, %520 : vector<16x128xf32>
    %522 = vector.broadcast %502 : vector<16x1xf32> to vector<16x128xf32>
    %523 = arith.mulf %514, %522 : vector<16x128xf32>
    %524 = arith.truncf %523 : vector<16x128xf32> to vector<16x128xbf16>
    %525 = arith.index_cast %c4_i32 : i32 to index
    %c0_109 = arith.constant 0 : index
    %c0_110 = arith.constant 0 : index
    %526 = vector.load %arg6[%525, %c0_109, %c0_110] : memref<8x16x128xbf16, #tpu.memory_space<vmem>>, vector<1x16x128xbf16>
    %527 = vector.shape_cast %526 : vector<1x16x128xbf16> to vector<16x128xbf16>
    %528 = vector.shape_cast %524 : vector<16x128xbf16> to vector<1x16x128xbf16>
    tpu.vector_store %arg6[%525, %c0_109, %c0_110], %528 {strides = array<i32>} : memref<8x16x128xbf16, #tpu.memory_space<vmem>>, vector<1x16x128xbf16>,
    %529 = vector.broadcast %507 : vector<16x1xf32> to vector<16x128xf32>
    %530 = arith.mulf %521, %529 : vector<16x128xf32>
    %531 = arith.truncf %530 : vector<16x128xf32> to vector<16x128xbf16>
    %532 = arith.index_cast %433 : i32 to index
    %c0_111 = arith.constant 0 : index
    %c0_112 = arith.constant 0 : index
    %533 = vector.load %arg7[%532, %c0_111, %c0_112] : memref<8x16x128xbf16, #tpu.memory_space<vmem>>, vector<1x16x128xbf16>
    %534 = vector.shape_cast %533 : vector<1x16x128xbf16> to vector<16x128xbf16>
    %535 = vector.shape_cast %531 : vector<16x128xbf16> to vector<1x16x128xbf16>
    tpu.vector_store %arg7[%532, %c0_111, %c0_112], %535 {strides = array<i32>} : memref<8x16x128xbf16, #tpu.memory_space<vmem>>, vector<1x16x128xbf16>,
    %c5_i32 = arith.constant 5 : i32
    %c7_i32_113 = arith.constant 7 : i32
    %536 = arith.subi %c7_i32_113, %c5_i32 : i32
    %537 = arith.index_cast %c5_i32 : i32 to index
    %c0_114 = arith.constant 0 : index
    %c0_115 = arith.constant 0 : index
    %538 = vector.load %arg1[%537, %c0_114, %c0_115] : memref<8x16x384xbf16, #tpu.memory_space<vmem>>, vector<1x16x384xbf16>
    %539 = vector.shape_cast %538 : vector<1x16x384xbf16> to vector<16x384xbf16>
    %540 = arith.extf %539 : vector<16x384xbf16> to vector<16x384xf32>
    %541 = arith.index_cast %536 : i32 to index
    %c0_116 = arith.constant 0 : index
    %c0_117 = arith.constant 0 : index
    %542 = vector.load %arg2[%541, %c0_116, %c0_117] : memref<8x16x384xbf16, #tpu.memory_space<vmem>>, vector<1x16x384xbf16>
    %543 = vector.shape_cast %542 : vector<1x16x384xbf16> to vector<16x384xbf16>
    %544 = arith.extf %543 : vector<16x384xbf16> to vector<16x384xf32>
    %cst_118 = arith.constant dense<0.000000e+00> : vector<16x384xf32>
    %545 = tpu.matmul %514, %4, %cst_118 {dimension_numbers = #tpu.dot_dimension_numbers<[1], [0], [0], [1], [0, 0, 1, 1], [], []>} : vector<16x128xf32>, vector<128x384xf32>, vector<16x384xf32> -> vector<16x384xf32>
    %546 = arith.addf %545, %10 : vector<16x384xf32>
    %cst_119 = arith.constant dense<0.000000e+00> : vector<16x384xf32>
    %547 = tpu.matmul %521, %6, %cst_119 {dimension_numbers = #tpu.dot_dimension_numbers<[1], [0], [0], [1], [0, 0, 1, 1], [], []>} : vector<16x128xf32>, vector<128x384xf32>, vector<16x384xf32> -> vector<16x384xf32>
    %548 = arith.addf %547, %14 : vector<16x384xf32>
    %549 = vector.extract_strided_slice %540 {offsets = [0, 0], sizes = [16, 128], strides = [1, 1]} : vector<16x384xf32> to vector<16x128xf32>
    %550 = vector.extract_strided_slice %546 {offsets = [0, 0], sizes = [16, 128], strides = [1, 1]} : vector<16x384xf32> to vector<16x128xf32>
    %551 = arith.addf %549, %550 : vector<16x128xf32>
    %552 = arith.negf %551 : vector<16x128xf32>
    %553 = math.exp %552 : vector<16x128xf32>
    %cst_120 = arith.constant 1.000000e+00 : f32
    %554 = vector.broadcast %cst_120 : f32 to vector<16x128xf32>
    %555 = arith.addf %554, %553 : vector<16x128xf32>
    %556 = arith.divf %554, %555 : vector<16x128xf32>
    %557 = vector.extract_strided_slice %540 {offsets = [0, 128], sizes = [16, 128], strides = [1, 1]} : vector<16x384xf32> to vector<16x128xf32>
    %558 = vector.extract_strided_slice %546 {offsets = [0, 128], sizes = [16, 128], strides = [1, 1]} : vector<16x384xf32> to vector<16x128xf32>
    %559 = arith.addf %557, %558 : vector<16x128xf32>
    %560 = arith.negf %559 : vector<16x128xf32>
    %561 = math.exp %560 : vector<16x128xf32>
    %cst_121 = arith.constant 1.000000e+00 : f32
    %562 = vector.broadcast %cst_121 : f32 to vector<16x128xf32>
    %563 = arith.addf %562, %561 : vector<16x128xf32>
    %564 = arith.divf %562, %563 : vector<16x128xf32>
    %565 = vector.extract_strided_slice %540 {offsets = [0, 256], sizes = [16, 128], strides = [1, 1]} : vector<16x384xf32> to vector<16x128xf32>
    %566 = vector.extract_strided_slice %546 {offsets = [0, 256], sizes = [16, 128], strides = [1, 1]} : vector<16x384xf32> to vector<16x128xf32>
    %567 = arith.mulf %556, %566 : vector<16x128xf32>
    %568 = arith.addf %565, %567 : vector<16x128xf32>
    %569 = math.tanh %568 : vector<16x128xf32>
    %cst_122 = arith.constant 1.000000e+00 : f32
    %570 = vector.broadcast %cst_122 : f32 to vector<16x128xf32>
    %571 = arith.subf %570, %564 : vector<16x128xf32>
    %572 = arith.mulf %571, %569 : vector<16x128xf32>
    %573 = arith.mulf %564, %514 : vector<16x128xf32>
    %574 = arith.addf %572, %573 : vector<16x128xf32>
    %575 = vector.extract_strided_slice %544 {offsets = [0, 0], sizes = [16, 128], strides = [1, 1]} : vector<16x384xf32> to vector<16x128xf32>
    %576 = vector.extract_strided_slice %548 {offsets = [0, 0], sizes = [16, 128], strides = [1, 1]} : vector<16x384xf32> to vector<16x128xf32>
    %577 = arith.addf %575, %576 : vector<16x128xf32>
    %578 = arith.negf %577 : vector<16x128xf32>
    %579 = math.exp %578 : vector<16x128xf32>
    %cst_123 = arith.constant 1.000000e+00 : f32
    %580 = vector.broadcast %cst_123 : f32 to vector<16x128xf32>
    %581 = arith.addf %580, %579 : vector<16x128xf32>
    %582 = arith.divf %580, %581 : vector<16x128xf32>
    %583 = vector.extract_strided_slice %544 {offsets = [0, 128], sizes = [16, 128], strides = [1, 1]} : vector<16x384xf32> to vector<16x128xf32>
    %584 = vector.extract_strided_slice %548 {offsets = [0, 128], sizes = [16, 128], strides = [1, 1]} : vector<16x384xf32> to vector<16x128xf32>
    %585 = arith.addf %583, %584 : vector<16x128xf32>
    %586 = arith.negf %585 : vector<16x128xf32>
    %587 = math.exp %586 : vector<16x128xf32>
    %cst_124 = arith.constant 1.000000e+00 : f32
    %588 = vector.broadcast %cst_124 : f32 to vector<16x128xf32>
    %589 = arith.addf %588, %587 : vector<16x128xf32>
    %590 = arith.divf %588, %589 : vector<16x128xf32>
    %591 = vector.extract_strided_slice %544 {offsets = [0, 256], sizes = [16, 128], strides = [1, 1]} : vector<16x384xf32> to vector<16x128xf32>
    %592 = vector.extract_strided_slice %548 {offsets = [0, 256], sizes = [16, 128], strides = [1, 1]} : vector<16x384xf32> to vector<16x128xf32>
    %593 = arith.mulf %582, %592 : vector<16x128xf32>
    %594 = arith.addf %591, %593 : vector<16x128xf32>
    %595 = math.tanh %594 : vector<16x128xf32>
    %cst_125 = arith.constant 1.000000e+00 : f32
    %596 = vector.broadcast %cst_125 : f32 to vector<16x128xf32>
    %597 = arith.subf %596, %590 : vector<16x128xf32>
    %598 = arith.mulf %597, %595 : vector<16x128xf32>
    %599 = arith.mulf %590, %521 : vector<16x128xf32>
    %600 = arith.addf %598, %599 : vector<16x128xf32>
    %601 = arith.addi %16, %c5_i32 : i32
    %602 = vector.broadcast %601 : i32 to vector<16x1xi32>
    %603 = arith.cmpi sgt, %15, %602 : vector<16x1xi32>
    %604 = arith.extui %603 : vector<16x1xi1> to vector<16x1xi32>
    %605 = arith.sitofp %604 : vector<16x1xi32> to vector<16x1xf32>
    %606 = arith.addi %18, %536 : i32
    %607 = vector.broadcast %606 : i32 to vector<16x1xi32>
    %608 = arith.cmpi sgt, %15, %607 : vector<16x1xi32>
    %609 = arith.extui %608 : vector<16x1xi1> to vector<16x1xi32>
    %610 = arith.sitofp %609 : vector<16x1xi32> to vector<16x1xf32>
    %611 = vector.broadcast %605 : vector<16x1xf32> to vector<16x128xf32>
    %612 = arith.mulf %611, %574 : vector<16x128xf32>
    %cst_126 = arith.constant 1.000000e+00 : f32
    %613 = vector.broadcast %cst_126 : f32 to vector<16x1xf32>
    %614 = arith.subf %613, %605 : vector<16x1xf32>
    %615 = vector.broadcast %614 : vector<16x1xf32> to vector<16x128xf32>
    %616 = arith.mulf %615, %514 : vector<16x128xf32>
    %617 = arith.addf %612, %616 : vector<16x128xf32>
    %618 = vector.broadcast %610 : vector<16x1xf32> to vector<16x128xf32>
    %619 = arith.mulf %618, %600 : vector<16x128xf32>
    %cst_127 = arith.constant 1.000000e+00 : f32
    %620 = vector.broadcast %cst_127 : f32 to vector<16x1xf32>
    %621 = arith.subf %620, %610 : vector<16x1xf32>
    %622 = vector.broadcast %621 : vector<16x1xf32> to vector<16x128xf32>
    %623 = arith.mulf %622, %521 : vector<16x128xf32>
    %624 = arith.addf %619, %623 : vector<16x128xf32>
    %625 = vector.broadcast %605 : vector<16x1xf32> to vector<16x128xf32>
    %626 = arith.mulf %617, %625 : vector<16x128xf32>
    %627 = arith.truncf %626 : vector<16x128xf32> to vector<16x128xbf16>
    %628 = arith.index_cast %c5_i32 : i32 to index
    %c0_128 = arith.constant 0 : index
    %c0_129 = arith.constant 0 : index
    %629 = vector.load %arg6[%628, %c0_128, %c0_129] : memref<8x16x128xbf16, #tpu.memory_space<vmem>>, vector<1x16x128xbf16>
    %630 = vector.shape_cast %629 : vector<1x16x128xbf16> to vector<16x128xbf16>
    %631 = vector.shape_cast %627 : vector<16x128xbf16> to vector<1x16x128xbf16>
    tpu.vector_store %arg6[%628, %c0_128, %c0_129], %631 {strides = array<i32>} : memref<8x16x128xbf16, #tpu.memory_space<vmem>>, vector<1x16x128xbf16>,
    %632 = vector.broadcast %610 : vector<16x1xf32> to vector<16x128xf32>
    %633 = arith.mulf %624, %632 : vector<16x128xf32>
    %634 = arith.truncf %633 : vector<16x128xf32> to vector<16x128xbf16>
    %635 = arith.index_cast %536 : i32 to index
    %c0_130 = arith.constant 0 : index
    %c0_131 = arith.constant 0 : index
    %636 = vector.load %arg7[%635, %c0_130, %c0_131] : memref<8x16x128xbf16, #tpu.memory_space<vmem>>, vector<1x16x128xbf16>
    %637 = vector.shape_cast %636 : vector<1x16x128xbf16> to vector<16x128xbf16>
    %638 = vector.shape_cast %634 : vector<16x128xbf16> to vector<1x16x128xbf16>
    tpu.vector_store %arg7[%635, %c0_130, %c0_131], %638 {strides = array<i32>} : memref<8x16x128xbf16, #tpu.memory_space<vmem>>, vector<1x16x128xbf16>,
    %c6_i32 = arith.constant 6 : i32
    %c7_i32_132 = arith.constant 7 : i32
    %639 = arith.subi %c7_i32_132, %c6_i32 : i32
    %640 = arith.index_cast %c6_i32 : i32 to index
    %c0_133 = arith.constant 0 : index
    %c0_134 = arith.constant 0 : index
    %641 = vector.load %arg1[%640, %c0_133, %c0_134] : memref<8x16x384xbf16, #tpu.memory_space<vmem>>, vector<1x16x384xbf16>
    %642 = vector.shape_cast %641 : vector<1x16x384xbf16> to vector<16x384xbf16>
    %643 = arith.extf %642 : vector<16x384xbf16> to vector<16x384xf32>
    %644 = arith.index_cast %639 : i32 to index
    %c0_135 = arith.constant 0 : index
    %c0_136 = arith.constant 0 : index
    %645 = vector.load %arg2[%644, %c0_135, %c0_136] : memref<8x16x384xbf16, #tpu.memory_space<vmem>>, vector<1x16x384xbf16>
    %646 = vector.shape_cast %645 : vector<1x16x384xbf16> to vector<16x384xbf16>
    %647 = arith.extf %646 : vector<16x384xbf16> to vector<16x384xf32>
    %cst_137 = arith.constant dense<0.000000e+00> : vector<16x384xf32>
    %648 = tpu.matmul %617, %4, %cst_137 {dimension_numbers = #tpu.dot_dimension_numbers<[1], [0], [0], [1], [0, 0, 1, 1], [], []>} : vector<16x128xf32>, vector<128x384xf32>, vector<16x384xf32> -> vector<16x384xf32>
    %649 = arith.addf %648, %10 : vector<16x384xf32>
    %cst_138 = arith.constant dense<0.000000e+00> : vector<16x384xf32>
    %650 = tpu.matmul %624, %6, %cst_138 {dimension_numbers = #tpu.dot_dimension_numbers<[1], [0], [0], [1], [0, 0, 1, 1], [], []>} : vector<16x128xf32>, vector<128x384xf32>, vector<16x384xf32> -> vector<16x384xf32>
    %651 = arith.addf %650, %14 : vector<16x384xf32>
    %652 = vector.extract_strided_slice %643 {offsets = [0, 0], sizes = [16, 128], strides = [1, 1]} : vector<16x384xf32> to vector<16x128xf32>
    %653 = vector.extract_strided_slice %649 {offsets = [0, 0], sizes = [16, 128], strides = [1, 1]} : vector<16x384xf32> to vector<16x128xf32>
    %654 = arith.addf %652, %653 : vector<16x128xf32>
    %655 = arith.negf %654 : vector<16x128xf32>
    %656 = math.exp %655 : vector<16x128xf32>
    %cst_139 = arith.constant 1.000000e+00 : f32
    %657 = vector.broadcast %cst_139 : f32 to vector<16x128xf32>
    %658 = arith.addf %657, %656 : vector<16x128xf32>
    %659 = arith.divf %657, %658 : vector<16x128xf32>
    %660 = vector.extract_strided_slice %643 {offsets = [0, 128], sizes = [16, 128], strides = [1, 1]} : vector<16x384xf32> to vector<16x128xf32>
    %661 = vector.extract_strided_slice %649 {offsets = [0, 128], sizes = [16, 128], strides = [1, 1]} : vector<16x384xf32> to vector<16x128xf32>
    %662 = arith.addf %660, %661 : vector<16x128xf32>
    %663 = arith.negf %662 : vector<16x128xf32>
    %664 = math.exp %663 : vector<16x128xf32>
    %cst_140 = arith.constant 1.000000e+00 : f32
    %665 = vector.broadcast %cst_140 : f32 to vector<16x128xf32>
    %666 = arith.addf %665, %664 : vector<16x128xf32>
    %667 = arith.divf %665, %666 : vector<16x128xf32>
    %668 = vector.extract_strided_slice %643 {offsets = [0, 256], sizes = [16, 128], strides = [1, 1]} : vector<16x384xf32> to vector<16x128xf32>
    %669 = vector.extract_strided_slice %649 {offsets = [0, 256], sizes = [16, 128], strides = [1, 1]} : vector<16x384xf32> to vector<16x128xf32>
    %670 = arith.mulf %659, %669 : vector<16x128xf32>
    %671 = arith.addf %668, %670 : vector<16x128xf32>
    %672 = math.tanh %671 : vector<16x128xf32>
    %cst_141 = arith.constant 1.000000e+00 : f32
    %673 = vector.broadcast %cst_141 : f32 to vector<16x128xf32>
    %674 = arith.subf %673, %667 : vector<16x128xf32>
    %675 = arith.mulf %674, %672 : vector<16x128xf32>
    %676 = arith.mulf %667, %617 : vector<16x128xf32>
    %677 = arith.addf %675, %676 : vector<16x128xf32>
    %678 = vector.extract_strided_slice %647 {offsets = [0, 0], sizes = [16, 128], strides = [1, 1]} : vector<16x384xf32> to vector<16x128xf32>
    %679 = vector.extract_strided_slice %651 {offsets = [0, 0], sizes = [16, 128], strides = [1, 1]} : vector<16x384xf32> to vector<16x128xf32>
    %680 = arith.addf %678, %679 : vector<16x128xf32>
    %681 = arith.negf %680 : vector<16x128xf32>
    %682 = math.exp %681 : vector<16x128xf32>
    %cst_142 = arith.constant 1.000000e+00 : f32
    %683 = vector.broadcast %cst_142 : f32 to vector<16x128xf32>
    %684 = arith.addf %683, %682 : vector<16x128xf32>
    %685 = arith.divf %683, %684 : vector<16x128xf32>
    %686 = vector.extract_strided_slice %647 {offsets = [0, 128], sizes = [16, 128], strides = [1, 1]} : vector<16x384xf32> to vector<16x128xf32>
    %687 = vector.extract_strided_slice %651 {offsets = [0, 128], sizes = [16, 128], strides = [1, 1]} : vector<16x384xf32> to vector<16x128xf32>
    %688 = arith.addf %686, %687 : vector<16x128xf32>
    %689 = arith.negf %688 : vector<16x128xf32>
    %690 = math.exp %689 : vector<16x128xf32>
    %cst_143 = arith.constant 1.000000e+00 : f32
    %691 = vector.broadcast %cst_143 : f32 to vector<16x128xf32>
    %692 = arith.addf %691, %690 : vector<16x128xf32>
    %693 = arith.divf %691, %692 : vector<16x128xf32>
    %694 = vector.extract_strided_slice %647 {offsets = [0, 256], sizes = [16, 128], strides = [1, 1]} : vector<16x384xf32> to vector<16x128xf32>
    %695 = vector.extract_strided_slice %651 {offsets = [0, 256], sizes = [16, 128], strides = [1, 1]} : vector<16x384xf32> to vector<16x128xf32>
    %696 = arith.mulf %685, %695 : vector<16x128xf32>
    %697 = arith.addf %694, %696 : vector<16x128xf32>
    %698 = math.tanh %697 : vector<16x128xf32>
    %cst_144 = arith.constant 1.000000e+00 : f32
    %699 = vector.broadcast %cst_144 : f32 to vector<16x128xf32>
    %700 = arith.subf %699, %693 : vector<16x128xf32>
    %701 = arith.mulf %700, %698 : vector<16x128xf32>
    %702 = arith.mulf %693, %624 : vector<16x128xf32>
    %703 = arith.addf %701, %702 : vector<16x128xf32>
    %704 = arith.addi %16, %c6_i32 : i32
    %705 = vector.broadcast %704 : i32 to vector<16x1xi32>
    %706 = arith.cmpi sgt, %15, %705 : vector<16x1xi32>
    %707 = arith.extui %706 : vector<16x1xi1> to vector<16x1xi32>
    %708 = arith.sitofp %707 : vector<16x1xi32> to vector<16x1xf32>
    %709 = arith.addi %18, %639 : i32
    %710 = vector.broadcast %709 : i32 to vector<16x1xi32>
    %711 = arith.cmpi sgt, %15, %710 : vector<16x1xi32>
    %712 = arith.extui %711 : vector<16x1xi1> to vector<16x1xi32>
    %713 = arith.sitofp %712 : vector<16x1xi32> to vector<16x1xf32>
    %714 = vector.broadcast %708 : vector<16x1xf32> to vector<16x128xf32>
    %715 = arith.mulf %714, %677 : vector<16x128xf32>
    %cst_145 = arith.constant 1.000000e+00 : f32
    %716 = vector.broadcast %cst_145 : f32 to vector<16x1xf32>
    %717 = arith.subf %716, %708 : vector<16x1xf32>
    %718 = vector.broadcast %717 : vector<16x1xf32> to vector<16x128xf32>
    %719 = arith.mulf %718, %617 : vector<16x128xf32>
    %720 = arith.addf %715, %719 : vector<16x128xf32>
    %721 = vector.broadcast %713 : vector<16x1xf32> to vector<16x128xf32>
    %722 = arith.mulf %721, %703 : vector<16x128xf32>
    %cst_146 = arith.constant 1.000000e+00 : f32
    %723 = vector.broadcast %cst_146 : f32 to vector<16x1xf32>
    %724 = arith.subf %723, %713 : vector<16x1xf32>
    %725 = vector.broadcast %724 : vector<16x1xf32> to vector<16x128xf32>
    %726 = arith.mulf %725, %624 : vector<16x128xf32>
    %727 = arith.addf %722, %726 : vector<16x128xf32>
    %728 = vector.broadcast %708 : vector<16x1xf32> to vector<16x128xf32>
    %729 = arith.mulf %720, %728 : vector<16x128xf32>
    %730 = arith.truncf %729 : vector<16x128xf32> to vector<16x128xbf16>
    %731 = arith.index_cast %c6_i32 : i32 to index
    %c0_147 = arith.constant 0 : index
    %c0_148 = arith.constant 0 : index
    %732 = vector.load %arg6[%731, %c0_147, %c0_148] : memref<8x16x128xbf16, #tpu.memory_space<vmem>>, vector<1x16x128xbf16>
    %733 = vector.shape_cast %732 : vector<1x16x128xbf16> to vector<16x128xbf16>
    %734 = vector.shape_cast %730 : vector<16x128xbf16> to vector<1x16x128xbf16>
    tpu.vector_store %arg6[%731, %c0_147, %c0_148], %734 {strides = array<i32>} : memref<8x16x128xbf16, #tpu.memory_space<vmem>>, vector<1x16x128xbf16>,
    %735 = vector.broadcast %713 : vector<16x1xf32> to vector<16x128xf32>
    %736 = arith.mulf %727, %735 : vector<16x128xf32>
    %737 = arith.truncf %736 : vector<16x128xf32> to vector<16x128xbf16>
    %738 = arith.index_cast %639 : i32 to index
    %c0_149 = arith.constant 0 : index
    %c0_150 = arith.constant 0 : index
    %739 = vector.load %arg7[%738, %c0_149, %c0_150] : memref<8x16x128xbf16, #tpu.memory_space<vmem>>, vector<1x16x128xbf16>
    %740 = vector.shape_cast %739 : vector<1x16x128xbf16> to vector<16x128xbf16>
    %741 = vector.shape_cast %737 : vector<16x128xbf16> to vector<1x16x128xbf16>
    tpu.vector_store %arg7[%738, %c0_149, %c0_150], %741 {strides = array<i32>} : memref<8x16x128xbf16, #tpu.memory_space<vmem>>, vector<1x16x128xbf16>,
    %c7_i32_151 = arith.constant 7 : i32
    %c7_i32_152 = arith.constant 7 : i32
    %742 = arith.subi %c7_i32_152, %c7_i32_151 : i32
    %743 = arith.index_cast %c7_i32_151 : i32 to index
    %c0_153 = arith.constant 0 : index
    %c0_154 = arith.constant 0 : index
    %744 = vector.load %arg1[%743, %c0_153, %c0_154] : memref<8x16x384xbf16, #tpu.memory_space<vmem>>, vector<1x16x384xbf16>
    %745 = vector.shape_cast %744 : vector<1x16x384xbf16> to vector<16x384xbf16>
    %746 = arith.extf %745 : vector<16x384xbf16> to vector<16x384xf32>
    %747 = arith.index_cast %742 : i32 to index
    %c0_155 = arith.constant 0 : index
    %c0_156 = arith.constant 0 : index
    %748 = vector.load %arg2[%747, %c0_155, %c0_156] : memref<8x16x384xbf16, #tpu.memory_space<vmem>>, vector<1x16x384xbf16>
    %749 = vector.shape_cast %748 : vector<1x16x384xbf16> to vector<16x384xbf16>
    %750 = arith.extf %749 : vector<16x384xbf16> to vector<16x384xf32>
    %cst_157 = arith.constant dense<0.000000e+00> : vector<16x384xf32>
    %751 = tpu.matmul %720, %4, %cst_157 {dimension_numbers = #tpu.dot_dimension_numbers<[1], [0], [0], [1], [0, 0, 1, 1], [], []>} : vector<16x128xf32>, vector<128x384xf32>, vector<16x384xf32> -> vector<16x384xf32>
    %752 = arith.addf %751, %10 : vector<16x384xf32>
    %cst_158 = arith.constant dense<0.000000e+00> : vector<16x384xf32>
    %753 = tpu.matmul %727, %6, %cst_158 {dimension_numbers = #tpu.dot_dimension_numbers<[1], [0], [0], [1], [0, 0, 1, 1], [], []>} : vector<16x128xf32>, vector<128x384xf32>, vector<16x384xf32> -> vector<16x384xf32>
    %754 = arith.addf %753, %14 : vector<16x384xf32>
    %755 = vector.extract_strided_slice %746 {offsets = [0, 0], sizes = [16, 128], strides = [1, 1]} : vector<16x384xf32> to vector<16x128xf32>
    %756 = vector.extract_strided_slice %752 {offsets = [0, 0], sizes = [16, 128], strides = [1, 1]} : vector<16x384xf32> to vector<16x128xf32>
    %757 = arith.addf %755, %756 : vector<16x128xf32>
    %758 = arith.negf %757 : vector<16x128xf32>
    %759 = math.exp %758 : vector<16x128xf32>
    %cst_159 = arith.constant 1.000000e+00 : f32
    %760 = vector.broadcast %cst_159 : f32 to vector<16x128xf32>
    %761 = arith.addf %760, %759 : vector<16x128xf32>
    %762 = arith.divf %760, %761 : vector<16x128xf32>
    %763 = vector.extract_strided_slice %746 {offsets = [0, 128], sizes = [16, 128], strides = [1, 1]} : vector<16x384xf32> to vector<16x128xf32>
    %764 = vector.extract_strided_slice %752 {offsets = [0, 128], sizes = [16, 128], strides = [1, 1]} : vector<16x384xf32> to vector<16x128xf32>
    %765 = arith.addf %763, %764 : vector<16x128xf32>
    %766 = arith.negf %765 : vector<16x128xf32>
    %767 = math.exp %766 : vector<16x128xf32>
    %cst_160 = arith.constant 1.000000e+00 : f32
    %768 = vector.broadcast %cst_160 : f32 to vector<16x128xf32>
    %769 = arith.addf %768, %767 : vector<16x128xf32>
    %770 = arith.divf %768, %769 : vector<16x128xf32>
    %771 = vector.extract_strided_slice %746 {offsets = [0, 256], sizes = [16, 128], strides = [1, 1]} : vector<16x384xf32> to vector<16x128xf32>
    %772 = vector.extract_strided_slice %752 {offsets = [0, 256], sizes = [16, 128], strides = [1, 1]} : vector<16x384xf32> to vector<16x128xf32>
    %773 = arith.mulf %762, %772 : vector<16x128xf32>
    %774 = arith.addf %771, %773 : vector<16x128xf32>
    %775 = math.tanh %774 : vector<16x128xf32>
    %cst_161 = arith.constant 1.000000e+00 : f32
    %776 = vector.broadcast %cst_161 : f32 to vector<16x128xf32>
    %777 = arith.subf %776, %770 : vector<16x128xf32>
    %778 = arith.mulf %777, %775 : vector<16x128xf32>
    %779 = arith.mulf %770, %720 : vector<16x128xf32>
    %780 = arith.addf %778, %779 : vector<16x128xf32>
    %781 = vector.extract_strided_slice %750 {offsets = [0, 0], sizes = [16, 128], strides = [1, 1]} : vector<16x384xf32> to vector<16x128xf32>
    %782 = vector.extract_strided_slice %754 {offsets = [0, 0], sizes = [16, 128], strides = [1, 1]} : vector<16x384xf32> to vector<16x128xf32>
    %783 = arith.addf %781, %782 : vector<16x128xf32>
    %784 = arith.negf %783 : vector<16x128xf32>
    %785 = math.exp %784 : vector<16x128xf32>
    %cst_162 = arith.constant 1.000000e+00 : f32
    %786 = vector.broadcast %cst_162 : f32 to vector<16x128xf32>
    %787 = arith.addf %786, %785 : vector<16x128xf32>
    %788 = arith.divf %786, %787 : vector<16x128xf32>
    %789 = vector.extract_strided_slice %750 {offsets = [0, 128], sizes = [16, 128], strides = [1, 1]} : vector<16x384xf32> to vector<16x128xf32>
    %790 = vector.extract_strided_slice %754 {offsets = [0, 128], sizes = [16, 128], strides = [1, 1]} : vector<16x384xf32> to vector<16x128xf32>
    %791 = arith.addf %789, %790 : vector<16x128xf32>
    %792 = arith.negf %791 : vector<16x128xf32>
    %793 = math.exp %792 : vector<16x128xf32>
    %cst_163 = arith.constant 1.000000e+00 : f32
    %794 = vector.broadcast %cst_163 : f32 to vector<16x128xf32>
    %795 = arith.addf %794, %793 : vector<16x128xf32>
    %796 = arith.divf %794, %795 : vector<16x128xf32>
    %797 = vector.extract_strided_slice %750 {offsets = [0, 256], sizes = [16, 128], strides = [1, 1]} : vector<16x384xf32> to vector<16x128xf32>
    %798 = vector.extract_strided_slice %754 {offsets = [0, 256], sizes = [16, 128], strides = [1, 1]} : vector<16x384xf32> to vector<16x128xf32>
    %799 = arith.mulf %788, %798 : vector<16x128xf32>
    %800 = arith.addf %797, %799 : vector<16x128xf32>
    %801 = math.tanh %800 : vector<16x128xf32>
    %cst_164 = arith.constant 1.000000e+00 : f32
    %802 = vector.broadcast %cst_164 : f32 to vector<16x128xf32>
    %803 = arith.subf %802, %796 : vector<16x128xf32>
    %804 = arith.mulf %803, %801 : vector<16x128xf32>
    %805 = arith.mulf %796, %727 : vector<16x128xf32>
    %806 = arith.addf %804, %805 : vector<16x128xf32>
    %807 = arith.addi %16, %c7_i32_151 : i32
    %808 = vector.broadcast %807 : i32 to vector<16x1xi32>
    %809 = arith.cmpi sgt, %15, %808 : vector<16x1xi32>
    %810 = arith.extui %809 : vector<16x1xi1> to vector<16x1xi32>
    %811 = arith.sitofp %810 : vector<16x1xi32> to vector<16x1xf32>
    %812 = arith.addi %18, %742 : i32
    %813 = vector.broadcast %812 : i32 to vector<16x1xi32>
    %814 = arith.cmpi sgt, %15, %813 : vector<16x1xi32>
    %815 = arith.extui %814 : vector<16x1xi1> to vector<16x1xi32>
    %816 = arith.sitofp %815 : vector<16x1xi32> to vector<16x1xf32>
    %817 = vector.broadcast %811 : vector<16x1xf32> to vector<16x128xf32>
    %818 = arith.mulf %817, %780 : vector<16x128xf32>
    %cst_165 = arith.constant 1.000000e+00 : f32
    %819 = vector.broadcast %cst_165 : f32 to vector<16x1xf32>
    %820 = arith.subf %819, %811 : vector<16x1xf32>
    %821 = vector.broadcast %820 : vector<16x1xf32> to vector<16x128xf32>
    %822 = arith.mulf %821, %720 : vector<16x128xf32>
    %823 = arith.addf %818, %822 : vector<16x128xf32>
    %824 = vector.broadcast %816 : vector<16x1xf32> to vector<16x128xf32>
    %825 = arith.mulf %824, %806 : vector<16x128xf32>
    %cst_166 = arith.constant 1.000000e+00 : f32
    %826 = vector.broadcast %cst_166 : f32 to vector<16x1xf32>
    %827 = arith.subf %826, %816 : vector<16x1xf32>
    %828 = vector.broadcast %827 : vector<16x1xf32> to vector<16x128xf32>
    %829 = arith.mulf %828, %727 : vector<16x128xf32>
    %830 = arith.addf %825, %829 : vector<16x128xf32>
    %831 = vector.broadcast %811 : vector<16x1xf32> to vector<16x128xf32>
    %832 = arith.mulf %823, %831 : vector<16x128xf32>
    %833 = arith.truncf %832 : vector<16x128xf32> to vector<16x128xbf16>
    %834 = arith.index_cast %c7_i32_151 : i32 to index
    %c0_167 = arith.constant 0 : index
    %c0_168 = arith.constant 0 : index
    %835 = vector.load %arg6[%834, %c0_167, %c0_168] : memref<8x16x128xbf16, #tpu.memory_space<vmem>>, vector<1x16x128xbf16>
    %836 = vector.shape_cast %835 : vector<1x16x128xbf16> to vector<16x128xbf16>
    %837 = vector.shape_cast %833 : vector<16x128xbf16> to vector<1x16x128xbf16>
    tpu.vector_store %arg6[%834, %c0_167, %c0_168], %837 {strides = array<i32>} : memref<8x16x128xbf16, #tpu.memory_space<vmem>>, vector<1x16x128xbf16>,
    %838 = vector.broadcast %816 : vector<16x1xf32> to vector<16x128xf32>
    %839 = arith.mulf %830, %838 : vector<16x128xf32>
    %840 = arith.truncf %839 : vector<16x128xf32> to vector<16x128xbf16>
    %841 = arith.index_cast %742 : i32 to index
    %c0_169 = arith.constant 0 : index
    %c0_170 = arith.constant 0 : index
    %842 = vector.load %arg7[%841, %c0_169, %c0_170] : memref<8x16x128xbf16, #tpu.memory_space<vmem>>, vector<1x16x128xbf16>
    %843 = vector.shape_cast %842 : vector<1x16x128xbf16> to vector<16x128xbf16>
    %844 = vector.shape_cast %840 : vector<16x128xbf16> to vector<1x16x128xbf16>
    tpu.vector_store %arg7[%841, %c0_169, %c0_170], %844 {strides = array<i32>} : memref<8x16x128xbf16, #tpu.memory_space<vmem>>, vector<1x16x128xbf16>,
    %c8_i32_171 = arith.constant 8 : i32
    %c0_172 = arith.constant 0 : index
    %c0_173 = arith.constant 0 : index
    %845 = vector.load %arg9[%c0_172, %c0_173] : memref<16x128xf32, #tpu.memory_space<vmem>>, vector<16x128xf32>
    tpu.vector_store %arg9[%c0_172, %c0_173], %823 {strides = array<i32>} : memref<16x128xf32, #tpu.memory_space<vmem>>, vector<16x128xf32>,
    %c0_174 = arith.constant 0 : index
    %c0_175 = arith.constant 0 : index
    %846 = vector.load %arg10[%c0_174, %c0_175] : memref<16x128xf32, #tpu.memory_space<vmem>>, vector<16x128xf32>
    tpu.vector_store %arg10[%c0_174, %c0_175], %830 {strides = array<i32>} : memref<16x128xf32, #tpu.memory_space<vmem>>, vector<16x128xf32>,
    %c0_i32_176 = arith.constant 0 : i32
    %847 = arith.cmpi eq, %arg0, %c0_i32_176 : i32
    %848 = arith.extui %847 : i1 to i32
    %c0_i32_177 = arith.constant 0 : i32
    %849 = arith.cmpi ne, %848, %c0_i32_177 : i32
    scf.if %849 {
      %c0_178 = arith.constant 0 : index
      %c0_179 = arith.constant 0 : index
      %c0_180 = arith.constant 0 : index
      %850 = vector.load %arg8[%c0_178, %c0_179, %c0_180] : memref<2x16x128xf32, #tpu.memory_space<vmem>>, vector<1x16x128xf32>
      %851 = vector.shape_cast %850 : vector<1x16x128xf32> to vector<16x128xf32>
      %852 = vector.shape_cast %823 : vector<16x128xf32> to vector<1x16x128xf32>
      tpu.vector_store %arg8[%c0_178, %c0_179, %c0_180], %852 {strides = array<i32>} : memref<2x16x128xf32, #tpu.memory_space<vmem>>, vector<1x16x128xf32>,
      %c1_181 = arith.constant 1 : index
      %c0_182 = arith.constant 0 : index
      %c0_183 = arith.constant 0 : index
      %853 = vector.load %arg8[%c1_181, %c0_182, %c0_183] : memref<2x16x128xf32, #tpu.memory_space<vmem>>, vector<1x16x128xf32>
      %854 = vector.shape_cast %853 : vector<1x16x128xf32> to vector<16x128xf32>
      %855 = vector.shape_cast %830 : vector<16x128xf32> to vector<1x16x128xf32>
      tpu.vector_store %arg8[%c1_181, %c0_182, %c0_183], %855 {strides = array<i32>} : memref<2x16x128xf32, #tpu.memory_space<vmem>>, vector<1x16x128xf32>,
    } else {
    }
    return
  }
  func.func @transform_0(%arg0: i32) -> (i32, i32, i32) {
    %c0_i32 = arith.constant 0 : i32
    %c0_i32_0 = arith.constant 0 : i32
    %c0_i32_1 = arith.constant 0 : i32
    return %arg0, %c0_i32, %c0_i32_0 : i32, i32, i32
  }
  func.func @transform_1(%arg0: i32) -> (i32, i32, i32) {
    %c0_i32 = arith.constant 0 : i32
    %0 = arith.subi %c0_i32, %arg0 : i32
    %c0_i32_0 = arith.constant 0 : i32
    %c0_i32_1 = arith.constant 0 : i32
    %c0_i32_2 = arith.constant 0 : i32
    return %0, %c0_i32_0, %c0_i32_1 : i32, i32, i32
  }
  func.func @transform_2(%arg0: i32) -> (i32, i32) {
    %c0_i32 = arith.constant 0 : i32
    %c0_i32_0 = arith.constant 0 : i32
    %c0_i32_1 = arith.constant 0 : i32
    return %c0_i32, %c0_i32_0 : i32, i32
  }
  func.func @transform_3(%arg0: i32) -> (i32, i32, i32) {
    %c0_i32 = arith.constant 0 : i32
    %c0_i32_0 = arith.constant 0 : i32
    %c0_i32_1 = arith.constant 0 : i32
    %c0_i32_2 = arith.constant 0 : i32
    return %c0_i32, %c0_i32_0, %c0_i32_1 : i32, i32, i32
  }
  func.func @transform_4(%arg0: i32) -> (i32, i32, i32) {
    %c0_i32 = arith.constant 0 : i32
    %c0_i32_0 = arith.constant 0 : i32
    %c0_i32_1 = arith.constant 0 : i32
    %c0_i32_2 = arith.constant 0 : i32
    return %c0_i32, %c0_i32_0, %c0_i32_1 : i32, i32, i32
  }
  func.func @transform_5(%arg0: i32) -> (i32, i32, i32) {
    %c0_i32 = arith.constant 0 : i32
    %c0_i32_0 = arith.constant 0 : i32
    %c0_i32_1 = arith.constant 0 : i32
    return %arg0, %c0_i32, %c0_i32_0 : i32, i32, i32
  }
  func.func @transform_6(%arg0: i32) -> (i32, i32, i32) {
    %c0_i32 = arith.constant 0 : i32
    %0 = arith.subi %c0_i32, %arg0 : i32
    %c0_i32_0 = arith.constant 0 : i32
    %c0_i32_1 = arith.constant 0 : i32
    %c0_i32_2 = arith.constant 0 : i32
    return %0, %c0_i32_0, %c0_i32_1 : i32, i32, i32
  }
  func.func @transform_7(%arg0: i32) -> (i32, i32, i32) {
    %c0_i32 = arith.constant 0 : i32
    %c0_i32_0 = arith.constant 0 : i32
    %c0_i32_1 = arith.constant 0 : i32
    %c0_i32_2 = arith.constant 0 : i32
    return %c0_i32, %c0_i32_0, %c0_i32_1 : i32, i32, i32
  }
}

</mosaic_0001>

<bundles_post_ra>
// kernel: nmt_encoder_forward.1
= control target key start
LH: loop header
LB: loop body
LE: loop exit
PB: predicated region body
PF: predicated region fallthrough
CT: control target
= control target key end

     0   :  { %v8635_v3 = vmov 0.0   ;;  %v6921_v4 = vmov 0   ;;  %s8619_s3 = inlined_call_operand.vmem [shape: f32[2,128,384], index: 3, kind: input, shape index: {}]   ;;  %s8620_s2 = inlined_call_operand.vmem [shape: s32[16,1], index: 2, kind: input, shape index: {}]   ;;  %s8621_s4 = inlined_call_operand.vmem [shape: f32[2,1,384], index: 4, kind: input, shape index: {}]   ;;  %s8622_s0 = inlined_call_operand.vmem [shape: bf16[8,16,384], index: 0, kind: input, shape index: {}]   ;;  %s8623_s1 = inlined_call_operand.vmem [shape: bf16[8,16,384], index: 1, kind: input, shape index: {}]   ;;  %s8624_s5 = inlined_call_operand.vmem [shape: bf16[8,16,128], index: 5, kind: output, shape index: {0}]   ;;  %s8625_s6 = inlined_call_operand.vmem [shape: bf16[8,16,128], index: 6, kind: output, shape index: {1}]   ;;  %s8626_s7 = inlined_call_operand.vmem [shape: f32[2,16,128], index: 7, kind: output, shape index: {2}]  }
   0x1   :  { %v73_v0 = vld [vmem:[%s8619_s3 + $0x8] sm:$0xff]  ;;  %v76_v1 = vld [vmem:[%s8619_s3 + $0x20] sm:$0xff]  ;;  %298 = vmatprep.mubr.f32.mxu0 %v8635_v3  ;;  %6588 = vset.pattern.permute.xlu0 %v6921_v4  ;;  %v75_v6 = vld [vmem:[%s8619_s3 + $0x18] sm:$0xff] }
   0x2   :  { %v72_v2 = vld [vmem:[%s8619_s3] sm:$0xff]  ;;  %v6972_v5 = vpack.c.bf16 %v76_v1, %v73_v0  ;;  %v79_v7 = vld [vmem:[%s8619_s3 + $0x38] sm:$0xff]  ;;  %v82_v8 = vld [vmem:[%s8619_s3 + $0x50] sm:$0xff]  ;;  %5034 = vmatprep.mubr.f32.mxu1 %v8635_v3  ;;  %6589 = vset.pattern.permute.xlu1 %v6921_v4 }
   0x3   :  { %v6984_v9 = vpack.c.bf16 %v75_v6, %v72_v2  ;;  %v6986_v10 = vpack.c.bf16 %v82_v8, %v79_v7  ;;  %v78_v11 = vld [vmem:[%s8619_s3 + $0x30] sm:$0xff]  ;;  %v81_v12 = vld [vmem:[%s8619_s3 + $0x48] sm:$0xff]  ;;  %v88_v14 = vld [vmem:[%s8619_s3 + $0x80] sm:$0xff] }
   0x4   :  { %v85_v13 = vld [vmem:[%s8619_s3 + $0x68] sm:$0xff]  ;;  %5563 = vmatprep.subr.bf16.mxu0 %v6972_v5  ;;  %v7002_v15 = vpack.c.bf16 %v81_v12, %v78_v11  ;;  %v84_v17 = vld [vmem:[%s8619_s3 + $0x60] sm:$0xff]  ;;  %v87_v18 = vld [vmem:[%s8619_s3 + $0x78] sm:$0xff] }
   0x5   :  { %5565 = vmatpush1.bf16.msra.mxu0 %v6984_v9  ;;  %v7005_v16 = vpack.c.bf16 %v88_v14, %v85_v13  ;;  %v91_v19 = vld [vmem:[%s8619_s3 + $0x98] sm:$0xff]  ;;  %v94_v20 = vld [vmem:[%s8619_s3 + $0xb0] sm:$0xff]  ;;  %v7020_v21 = vpack.c.bf16 %v87_v18, %v84_v17  ;;  %v93_v24 = vld [vmem:[%s8619_s3 + $0xa8] sm:$0xff] }
   0x6   :  { %5567 = vmatprep.subr.bf16.mxu0 %v6986_v10  ;;  %v90_v22 = vld [vmem:[%s8619_s3 + $0x90] sm:$0xff]  ;;  %v7026_v23 = vpack.c.bf16 %v94_v20, %v91_v19  ;;  %v77_v26 = vld [vmem:[%s8619_s3 + $0x28] sm:$0xff]  ;;  %v100_v28 = vld [vmem:[%s8619_s3 + $0xe0] sm:$0xff] }
   0x7   :  { %8736 = vst [vmem:[#allocation4_spill] sm:$0xff] %v7005_v16  ;;  %v74_v25 = vld [vmem:[%s8619_s3 + $0x10] sm:$0xff]  ;;  %v97_v27 = vld [vmem:[%s8619_s3 + $0xc8] sm:$0xff]  ;;  %v80_v30 = vld [vmem:[%s8619_s3 + $0x40] sm:$0xff]  ;;  %v7052_v32 = vpack.c.bf16 %v93_v24, %v90_v22 }
   0x8   :  { %8737 = vst [vmem:[#allocation5_spill] sm:$0xff] %v7026_v23  ;;  %v7043_v29 = vpack.c.bf16 %v77_v26, %v74_v25  ;;  %v83_v31 = vld [vmem:[%s8619_s3 + $0x58] sm:$0xff]  ;;  %v96_v33 = vld [vmem:[%s8619_s3 + $0xc0] sm:$0xff]  ;;  %v7061_v35 = vpack.c.bf16 %v100_v28, %v97_v27  ;;  %v86_v37 = vld [vmem:[%s8619_s3 + $0x70] sm:$0xff] }
   0x9   :  { %5569 = vmatpush1.bf16.msra.mxu0 %v7002_v15  ;;  %8738 = vst [vmem:[#allocation6_spill] sm:$0xff] %v7052_v32  ;;  %v7058_v34 = vpack.c.bf16 %v83_v31, %v80_v30  ;;  %v99_v36 = vld [vmem:[%s8619_s3 + $0xd8] sm:$0xff]  ;;  %v89_v38 = vld [vmem:[%s8619_s3 + $0x88] sm:$0xff]  ;;  %v106_v40 = vld [vmem:[%s8619_s3 + $0x110] sm:$0xff] }
   0xa   :  { %5571 = vmatprep.subr.bf16.mxu0 %v7005_v16  ;;  %5595 = vmatprep.subr.bf16.mxu1 %v7043_v29  ;;  %8739 = vst [vmem:[#allocation7_spill] sm:$0xff] %v7061_v35  ;;  %v103_v39 = vld [vmem:[%s8619_s3 + $0xf8] sm:$0xff]  ;;  %v7080_v41 = vpack.c.bf16 %v89_v38, %v86_v37  ;;  %v92_v42 = vld [vmem:[%s8619_s3 + $0xa0] sm:$0xff]  ;;  %v7089_v44 = vpack.c.bf16 %v99_v36, %v96_v33  ;;  %v102_v46 = vld [vmem:[%s8619_s3 + $0xf0] sm:$0xff] }
   0xb   :  { %5597 = vmatpush3.bf16.msra.mxu1 %v7043_v29  ;;  %v95_v43 = vld [vmem:[%s8619_s3 + $0xb8] sm:$0xff]  ;;  %v7092_v45 = vpack.c.bf16 %v106_v40, %v103_v39  ;;  %v105_v47 = vld [vmem:[%s8619_s3 + $0x108] sm:$0xff]  ;;  %v112_v49 = vld [vmem:[%s8619_s3 + $0x140] sm:$0xff] }
   0xc   :  { %5599 = vmatprep.subr.bf16.mxu1 %v7058_v34  ;;  %8740 = vst [vmem:[#allocation8_spill] sm:$0xff] %v7089_v44  ;;  %v109_v48 = vld [vmem:[%s8619_s3 + $0x128] sm:$0xff]  ;;  %v7108_v50 = vpack.c.bf16 %v95_v43, %v92_v42  ;;  %v7113_v51 = vld [vmem:[%s8620_s2] sm:$0xff]  ;;  %v98_v52 = vld [vmem:[%s8619_s3 + $0xd0] sm:$0xff]  ;;  %v7123_v54 = vpack.c.bf16 %v105_v47, %v102_v46 }
   0xd   :  { %5573 = vmatpush1.bf16.msra.mxu0 %v7020_v21  ;;  %8741 = vst [vmem:[#allocation9_spill] sm:$0xff] %v7092_v45  ;;  %v101_v53 = vld [vmem:[%s8619_s3 + $0xe8] sm:$0xff]  ;;  %vm623_vm0 = vcmp.gt.s32.totalorder %v7113_v51, 0  ;;  %v7129_v56 = vpack.c.bf16 %v112_v49, %v109_v48  ;;  %v108_v57 = vld [vmem:[%s8619_s3 + $0x120] sm:$0xff]  ;;  %v111_v58 = vld [vmem:[%s8619_s3 + $0x138] sm:$0xff]  ;;  %vm631_vm1 = vcmp.gt.s32.totalorder %v7113_v51, 7 }
   0xe   :  { %5575 = vmatprep.subr.bf16.mxu0 %v7026_v23  ;;  %8742 = vst [vmem:[#allocation10_spill] sm:$0xff] %v7108_v50  ;;  %8743 = vst [vmem:[#allocation11_spill] sm:$0xff] %v7123_v54  ;;  %v7126_v55 = vsel %vm623_vm0, 1.0, %v8635_v3  ;;  %v115_v59 = vld [vmem:[%s8619_s3 + $0x158] sm:$0xff]  ;;  %v118_v60 = vld [vmem:[%s8619_s3 + $0x170] sm:$0xff]  ;;  %v7145_v61 = vpack.c.bf16 %v101_v53, %v98_v52  ;;  %v7156_v1 = vpack.c.bf16 %v111_v58, %v108_v57  ;;  %v7193_v17 = vsel %vm631_vm1, 1.0, %v8635_v3 }
   0xf   :  { %5601 = vmatpush3.bf16.msra.mxu1 %v7058_v34  ;;  %8744 = vst [vmem:[#allocation12_spill] sm:$0xff] %v7129_v56  ;;  %639 = vperm.xlu0 %6588, %v7126_v55   ;;  %v8629_v62 = vsub.f32 1.0, %v7126_v55  ;;  %v104_v63 = vld [vmem:[%s8619_s3 + $0x100] sm:$0xff]  ;;  %v107_v0 = vld [vmem:[%s8619_s3 + $0x118] sm:$0xff]  ;;  %v7162_v2 = vld [vmem:[%s8620_s2 + $0x8] sm:$0xff]  ;;  %v7165_v4 = vpack.c.bf16 %v118_v60, %v115_v59  ;;  %vm1130_vm4 = vcmp.gt.s32.totalorder %v7113_v51, 1 }
  0x10   :  { %5603 = vmatprep.subr.bf16.mxu1 %v7080_v41  ;;  %8745 = vst [vmem:[#allocation13_spill] sm:$0xff] %v7145_v61  ;;  %8746 = vst [vmem:[#allocation14_spill] sm:$0xff] %v7156_v1  ;;  %v114_v6 = vld [vmem:[%s8619_s3 + $0x150] sm:$0xff]  ;;  %v117_v7 = vld [vmem:[%s8619_s3 + $0x168] sm:$0xff]  ;;  %vm624_vm2 = vcmp.gt.s32.totalorder %v7162_v2, 0  ;;  %v7182_v12 = vpack.c.bf16 %v107_v0, %v104_v63  ;;  %vm632_vm3 = vcmp.gt.s32.totalorder %v7162_v2, 7 }
  0x11   :  { %5577 = vmatpush1.bf16.msra.mxu0 %v7052_v32  ;;  %8747 = vst [vmem:[#allocation15_spill] sm:$0xff] %v7165_v4  ;;  %v4326_v8 = vld [vmem:[%s8619_s3 + $0x188] sm:$0xff]  ;;  %v4329_v11 = vld [vmem:[%s8619_s3 + $0x1a0] sm:$0xff]  ;;  %v110_v13 = vld [vmem:[%s8619_s3 + $0x130] sm:$0xff]  ;;  %v7196_v18 = vsel %vm624_vm2, 1.0, %v8635_v3  ;;  %v7199_v19 = vpack.c.bf16 %v117_v7, %v114_v6  ;;  %v7231_v33 = vsel %vm632_vm3, 1.0, %v8635_v3 }
  0x12   :  { %5579 = vmatprep.subr.bf16.mxu0 %v7061_v35  ;;  %8748 = vst [vmem:[#allocation16_spill] sm:$0xff] %v7182_v12  ;;  %v113_v14 = vld [vmem:[%s8619_s3 + $0x148] sm:$0xff]  ;;  %644 = vperm.xlu1 %6589, %v7196_v18   ;;  %v8627_v20 = vsub.f32 1.0, %v7196_v18  ;;  %v7205_v22 = vpack.c.bf16 %v4329_v11, %v4326_v8  ;;  %v4325_v24 = vld [vmem:[%s8619_s3 + $0x180] sm:$0xff]  ;;  %v4328_v25 = vld [vmem:[%s8619_s3 + $0x198] sm:$0xff]  ;;  %v7267_v48 = vsel %vm1130_vm4, 1.0, %v8635_v3 }
  0x13   :  { %5605 = vmatpush3.bf16.msra.mxu1 %v7080_v41  ;;  %653 = vperm.xlu0 %6588, %v8629_v62   ;;  %8749 = vst [vmem:[#allocation17_spill] sm:$0xff] %v7199_v19  ;;  %v4332_v26 = vld [vmem:[%s8619_s3 + $0x1b8] sm:$0xff]  ;;  %v4335_v27 = vld [vmem:[%s8619_s3 + $0x1d0] sm:$0xff]  ;;  %v7221_v28 = vpack.c.bf16 %v113_v14, %v110_v13  ;;  %v116_v30 = vld [vmem:[%s8619_s3 + $0x160] sm:$0xff]  ;;  %v7234_v36 = vpack.c.bf16 %v4328_v25, %v4325_v24  ;;  %v8628_v49 = vsub.f32 1.0, %v7193_v17  ;;  %vm1131_vm5 = vcmp.gt.s32.totalorder %v7162_v2, 1 }
  0x14   :  { %5607 = vmatprep.subr.bf16.mxu1 %v7108_v50  ;;  %8750 = vst [vmem:[#allocation18_spill] sm:$0xff] %v7205_v22  ;;  %v119_v31 = vld [vmem:[%s8619_s3 + $0x178] sm:$0xff]  ;;  %v7240_v37 = vpack.c.bf16 %v4335_v27, %v4332_v26  ;;  %v4331_v38 = vld [vmem:[%s8619_s3 + $0x1b0] sm:$0xff]  ;;  %v4334_v39 = vld [vmem:[%s8619_s3 + $0x1c8] sm:$0xff]  ;;  %v7309_v11 = vsel %vm1131_vm5, 1.0, %v8635_v3  ;;  %v8630_v13 = vsub.f32 1.0, %v7231_v33 }
  0x15   :  { %5581 = vmatpush1.bf16.msra.mxu0 %v7089_v44  ;;  %8751 = vst [vmem:[#allocation19_spill] sm:$0xff] %v7221_v28  ;;  %v4338_v40 = vld [vmem:[%s8619_s3 + $0x1e8] sm:$0xff]  ;;  %v4341_v42 = vld [vmem:[%s8619_s3 + $0x200] sm:$0xff]  ;;  %v7256_v43 = vpack.c.bf16 %v119_v31, %v116_v30  ;;  %v4327_v46 = vld [vmem:[%s8619_s3 + $0x190] sm:$0xff]  ;;  %v7272_v52 = vpack.c.bf16 %v4334_v39, %v4331_v38  ;;  %vm1138_vm6 = vcmp.gt.s32.totalorder %v7113_v51, 6  ;;  %vm1139_vm7 = vcmp.gt.s32.totalorder %v7162_v2, 6 }
  0x16   :  { %5583 = vmatprep.subr.bf16.mxu0 %v7092_v45  ;;  %658 = vperm.xlu1 %6589, %v8627_v20   ;;  %v4330_v47 = vld [vmem:[%s8619_s3 + $0x1a8] sm:$0xff]  ;;  %v7280_v58 = vpack.c.bf16 %v4341_v42, %v4338_v40  ;;  %v4337_v59 = vld [vmem:[%s8619_s3 + $0x1e0] sm:$0xff]  ;;  %v4340_v60 = vld [vmem:[%s8619_s3 + $0x1f8] sm:$0xff]  ;;  %v7346_v40 = vsel %vm1138_vm6, 1.0, %v8635_v3  ;;  %v8632_v42 = vsub.f32 1.0, %v7267_v48  ;;  %vm1638_vm8 = vcmp.gt.s32.totalorder %v7113_v51, 2 }
  0x17   :  { %5609 = vmatpush3.bf16.msra.mxu1 %v7108_v50  ;;  %667 = vperm.xlu0 %6588, %v7193_v17   ;;  %8752 = vst [vmem:[#allocation20_spill] sm:$0xff] %v7256_v43  ;;  %v4344_v63 = vld [vmem:[%s8619_s3 + $0x218] sm:$0xff]  ;;  %v4347_v0 = vld [vmem:[%s8619_s3 + $0x230] sm:$0xff]  ;;  %v7296_v6 = vpack.c.bf16 %v4330_v47, %v4327_v46  ;;  %v4333_v7 = vld [vmem:[%s8619_s3 + $0x1c0] sm:$0xff]  ;;  %v7315_v14 = vpack.c.bf16 %v4340_v60, %v4337_v59  ;;  %v8637_v62 = vsub.f32 1.0, %v7346_v40  ;;  %vm1639_vm9 = vcmp.gt.s32.totalorder %v7162_v2, 2 }
  0x18   :  { %5611 = vmatprep.subr.bf16.mxu1 %v7145_v61  ;;  %v4336_v8 = vld [vmem:[%s8619_s3 + $0x1d8] sm:$0xff]  ;;  %v7320_v24 = vpack.c.bf16 %v4347_v0, %v4344_v63  ;;  %v4343_v25 = vld [vmem:[%s8619_s3 + $0x210] sm:$0xff]  ;;  %v4346_v26 = vld [vmem:[%s8619_s3 + $0x228] sm:$0xff]  ;;  %v7456_v53 = vsel %vm1639_vm9, 1.0, %v8635_v3  ;;  %vm1646_vm10 = vcmp.gt.s32.totalorder %v7113_v51, 5  ;;  %vm1647_vm11 = vcmp.gt.s32.totalorder %v7162_v2, 5 }
  0x19   :  { %5585 = vmatpush1.bf16.msra.mxu0 %v7123_v54  ;;  %v4350_v27 = vld [vmem:[%s8619_s3 + $0x248] sm:$0xff]  ;;  %v4353_v30 = vld [vmem:[%s8619_s3 + $0x260] sm:$0xff]  ;;  %v7336_v31 = vpack.c.bf16 %v4336_v8, %v4333_v7  ;;  %v4339_v38 = vld [vmem:[%s8619_s3 + $0x1f0] sm:$0xff]  ;;  %v7352_v46 = vpack.c.bf16 %v4346_v26, %v4343_v25  ;;  %v7383_v26 = vsel %vm1139_vm7, 1.0, %v8635_v3  ;;  %vm2146_vm12 = vcmp.gt.s32.totalorder %v7113_v51, 3 }
  0x1a   :  { %5587 = vmatprep.subr.bf16.mxu0 %v7129_v56  ;;  %681 = vperm.xlu1 %6589, %v8628_v49   ;;  %v4342_v39 = vld [vmem:[%s8619_s3 + $0x208] sm:$0xff]  ;;  %v7357_v47 = vpack.c.bf16 %v4353_v30, %v4350_v27  ;;  %v4349_v59 = vld [vmem:[%s8619_s3 + $0x240] sm:$0xff]  ;;  %v4352_v60 = vld [vmem:[%s8619_s3 + $0x258] sm:$0xff]  ;;  %v8631_v27 = vsub.f32 1.0, %v7309_v11  ;;  %v7420_v49 = vsel %vm1638_vm8, 1.0, %v8635_v3  ;;  %vm2147_vm13 = vcmp.gt.s32.totalorder %v7162_v2, 3 }
  0x1b   :  { %5613 = vmatpush3.bf16.msra.mxu1 %v7145_v61  ;;  %672 = vperm.xlu0 %6588, %v7231_v33   ;;  %v4356_v63 = vld [vmem:[%s8619_s3 + $0x278] sm:$0xff]  ;;  %v4359_v0 = vld [vmem:[%s8619_s3 + $0x290] sm:$0xff]  ;;  %v7373_v7 = vpack.c.bf16 %v4342_v39, %v4339_v38  ;;  %v4345_v8 = vld [vmem:[%s8619_s3 + $0x220] sm:$0xff]  ;;  %v7390_v30 = vpack.c.bf16 %v4352_v60, %v4349_v59  ;;  %vm2154_vm14 = vcmp.gt.s32.totalorder %v7113_v51, 4  ;;  %vm2155_vm15 = vcmp.gt.s32.totalorder %v7162_v2, 4 }
  0x1c   :  { %5615 = vmatprep.subr.bf16.mxu1 %v7182_v12  ;;  %v4348_v25 = vld [vmem:[%s8619_s3 + $0x238] sm:$0xff]  ;;  %v7394_v38 = vpack.c.bf16 %v4359_v0, %v4356_v63  ;;  %v4355_v39 = vld [vmem:[%s8619_s3 + $0x270] sm:$0xff]  ;;  %v4358_v20 = vld [vmem:[%s8619_s3 + $0x288] sm:$0xff] }
  0x1d   :  { %5589 = vmatpush1.bf16.msra.mxu0 %v7156_v1  ;;  %v4362_v59 = vld [vmem:[%s8619_s3 + $0x2a8] sm:$0xff]  ;;  %v4365_v60 = vld [vmem:[%s8619_s3 + $0x2c0] sm:$0xff]  ;;  %v7410_v63 = vpack.c.bf16 %v4348_v25, %v4345_v8  ;;  %v4351_v0 = vld [vmem:[%s8619_s3 + $0x250] sm:$0xff]  ;;  %v7426_v8 = vpack.c.bf16 %v4358_v20, %v4355_v39 }
  0x1e   :  { %5591 = vmatprep.subr.bf16.mxu0 %v7165_v4  ;;  %686 = vperm.xlu1 %6589, %v8630_v13   ;;  %8753 = vst [vmem:[#allocation21_spill] sm:$0xff] %v7394_v38  ;;  %v4354_v57 = vld [vmem:[%s8619_s3 + $0x268] sm:$0xff]  ;;  %v7430_v25 = vpack.c.bf16 %v4365_v60, %v4362_v59  ;;  %v4361_v13 = vld [vmem:[%s8619_s3 + $0x2a0] sm:$0xff]  ;;  %v4368_v20 = vld [vmem:[%s8619_s3 + $0x2d8] sm:$0xff] }
  0x1f   :  { %5617 = vmatpush3.bf16.msra.mxu1 %v7182_v12  ;;  %1146 = vperm.xlu0 %6588, %v7267_v48   ;;  %8754 = vst [vmem:[#allocation22_spill] sm:$0xff] %v7426_v8  ;;  %v4371_v39 = vld [vmem:[%s8619_s3 + $0x2f0] sm:$0xff]  ;;  %v7446_v59 = vpack.c.bf16 %v4354_v57, %v4351_v0  ;;  %v4357_v60 = vld [vmem:[%s8619_s3 + $0x280] sm:$0xff] }
  0x20   :  { %5619 = vmatprep.subr.bf16.mxu1 %v7221_v28  ;;  %8755 = vst [vmem:[#allocation23_spill] sm:$0xff] %v7430_v25  ;;  %v7466_v0 = vpack.c.bf16 %v4371_v39, %v4368_v20  ;;  %v4366_v20 = vld [vmem:[%s8619_s3 + $0x2c8] sm:$0xff]  ;;  %v8757_v39 = vmov 0.0  }
  0x21   :  { %5593 = vmatpush1.bf16.msra.mxu0 %v7199_v19  ;;  %v4471_v51 = vsel %vm2155_vm15, 1.0, %v8757_v39 }
  0x22   :  { %5627 = vmatprep.subr.bf16.mxu0 %v7205_v22  ;;  %1160 = vperm.xlu1 %6589, %v8632_v42   ;;  %v4360_v42 = vld [vmem:[%s8619_s3 + $0x298] sm:$0xff]  ;;  %8756 = vst [vmem:[#allocation24_spill] sm:$0xff] %v7466_v0 }
  0x23   :  { %5621 = vmatpush3.bf16.msra.mxu1 %v7221_v28  ;;  %1151 = vperm.xlu0 %6588, %v7309_v11  }
  0x24   :  { %299 = vmatmul.mubr.f32.vlgmr.msra.gmra.mrb[0].mxu0 %v8635_v3  ;;  %5623 = vmatprep.subr.bf16.mxu1 %v7256_v43 }
  0x25   :  { %5629 = vmatpush1.bf16.msra.mxu0 %v7234_v36  ;;  %304 = vmatprep.mubr.f32.mxu0 %v8635_v3 }
  0x26   :  { %5631 = vmatprep.subr.bf16.mxu0 %v7240_v37  ;;  %1165 = vperm.xlu1 %6589, %v8631_v27   ;;  %v4364_v27 = vld [vmem:[%s8619_s3 + $0x2b8] sm:$0xff] }
  0x27   :  { %5625 = vmatpush3.bf16.msra.mxu1 %v7256_v43  ;;  %1174 = vperm.xlu0 %6588, %v7346_v40   ;;  %v7462_v57 = vpack.c.bf16 %v4364_v27, %v4361_v13  ;;  %v7476_v13 = vpack.c.bf16 %v4360_v42, %v4357_v60  ;;  %v4363_v27 = vld [vmem:[%s8619_s3 + $0x2b0] sm:$0xff] }
  0x28   :  { %305 = vmatmul.mubr.f32.gmra.mrb[2].mxu0 %v8635_v3  ;;  %5659 = vmatprep.subr.bf16.mxu1 %v7296_v6  ;;  %v7498_v60 = vpack.c.bf16 %v4366_v20, %v4363_v27  ;;  %v7523_v20 = vsel %vm2146_vm12, 1.0, %v8757_v39 }
  0x29   :  { %5633 = vmatpush1.bf16.msra.mxu0 %v7272_v52  ;;  %450 = vmatprep.mubr.f32.mxu0 %v8635_v3 }
  0x2a   :  { %5635 = vmatprep.subr.bf16.mxu0 %v7280_v58  ;;  %5035 = vmatmul.mubr.f32.vlgmr.msra.gmra.mrb[0].mxu1 %v8635_v3 }
  0x2b   :  { %5661 = vmatpush3.bf16.msra.mxu1 %v7296_v6  ;;  %5069 = vmatprep.mubr.f32.mxu1 %v8635_v3  ;;  %v4367_v3 = vld [vmem:[%s8619_s3 + $0x2d0] sm:$0xff] }
  0x2c   :  { %5663 = vmatprep.subr.bf16.mxu1 %v7336_v31  ;;  %1179 = vperm.xlu0 %6588, %v7383_v26  }
  0x2d   :  { %5637 = vmatpush1.bf16.msra.mxu0 %v7315_v14  ;;  %1188 = vperm.xlu1 %6589, %v8637_v62   ;;  %v4370_v62 = vld [vmem:[%s8619_s3 + $0x2e8] sm:$0xff] }
  0x2e   :  { %5639 = vmatprep.subr.bf16.mxu0 %v7320_v24  ;;  %v7492_v42 = vpack.c.bf16 %v4370_v62, %v4367_v3  ;;  %v4372_v3 = vld [vmem:[%s8619_s3 + $0x2f8] sm:$0xff]  ;;  %v7508_v62 = vsel %vm1647_vm11, 1.0, %v8757_v39 }
  0x2f   :  { %5665 = vmatpush3.bf16.msra.mxu1 %v7336_v31 }
  0x30   :  { %5667 = vmatprep.subr.bf16.mxu1 %v7373_v7  ;;  %1654 = vperm.xlu0 %6588, %v7420_v49  }
  0x31   :  { %5641 = vmatpush1.bf16.msra.mxu0 %v7352_v46 }
  0x32   :  { %5643 = vmatprep.subr.bf16.mxu0 %v7357_v47 }
  0x33   :  { %5669 = vmatpush3.bf16.msra.mxu1 %v7373_v7 }
  0x34   :  { %5671 = vmatprep.subr.bf16.mxu1 %v7410_v63  ;;  %1659 = vperm.xlu0 %6588, %v7456_v53  }
  0x35   :  { %5645 = vmatpush1.bf16.msra.mxu0 %v7390_v30 }
  0x36   :  { %5647 = vmatprep.subr.bf16.mxu0 %v7394_v38  ;;  %v7486_v38 = vsel %vm1646_vm10, 1.0, %v8757_v39 }
  0x37   :  { %5673 = vmatpush3.bf16.msra.mxu1 %v7410_v63 }
  0x38   :  { %5675 = vmatprep.subr.bf16.mxu1 %v7446_v59  ;;  %1682 = vperm.xlu0 %6588, %v7486_v38  }
  0x39   :  { %5649 = vmatpush1.bf16.msra.mxu0 %v7426_v8  ;;  %v8644_v8 = vsub.f32 1.0, %v7420_v49 }
  0x3a   :  { %5651 = vmatprep.subr.bf16.mxu0 %v7430_v25  ;;  %v8758_v25 = vsub.f32 1.0, %v7383_v26 }
  0x3b   :  { %5677 = vmatpush3.bf16.msra.mxu1 %v7446_v59 }
  0x3c   :  { %1193 = vperm.xlu1 %6589, %v8758_v25   ;;  %5679 = vmatprep.subr.bf16.mxu1 %v7476_v13  ;;  %v4369_v25 = vld [vmem:[%s8619_s3 + $0x2e0] sm:$0xff] }
  0x3d   :  { %5653 = vmatpush1.bf16.msra.mxu0 %v7462_v57  ;;  %v7518_v27 = vpack.c.bf16 %v4372_v3, %v4369_v25  ;;  %1687 = vperm.xlu0 %6588, %v7508_v62   ;;  %v4469_v25 = vsel %vm2147_vm13, 1.0, %v8757_v39  ;;  %v8649_v3 = vsub.f32 1.0, %v7508_v62 }
  0x3e   :  { %5655 = vmatprep.subr.bf16.mxu0 %v7466_v0  ;;  %v8645_v0 = vsub.f32 1.0, %v7456_v53 }
  0x3f   :  { %5681 = vmatpush3.bf16.msra.mxu1 %v7476_v13 }
  0x40   :  { %1668 = vperm.xlu1 %6589, %v8644_v8   ;;  %5683 = vmatprep.subr.bf16.mxu1 %v7498_v60  ;;  %v8646_v8 = vsub.f32 1.0, %v7486_v38 }
  0x41   :  { %5657 = vmatpush1.bf16.msra.mxu0 %v7492_v42  ;;  %2162 = vperm.xlu0 %6588, %v7523_v20  }
  0x42   :  { %5691 = vmatprep.subr.bf16.mxu0 %v6972_v5 }
  0x43   :  { %5685 = vmatpush3.bf16.msra.mxu1 %v7498_v60 }
  0x44   :  { %451 = vmatmul.mubr.f32.vlgmr.msra.gmra.mrb[4].mxu0 %v8757_v39  ;;  %1673 = vperm.xlu1 %6589, %v8645_v0   ;;  %v4470_v0 = vsel %vm2154_vm14, 1.0, %v8757_v39 }
  0x45   :  { %456 = vmatprep.mubr.f32.mxu0 %v8757_v39  ;;  %5693 = vmatpush1.bf16.msra.mxu0 %v6984_v9  ;;  %v2200_v2 = vsub.f32 1.0, %v4470_v0 }
  0x46   :  { %5695 = vmatprep.subr.bf16.mxu0 %v6986_v10  ;;  %5687 = vmatprep.subr.bf16.mxu1 %v7518_v27 }
  0x47   :  { %5689 = vmatpush3.bf16.msra.mxu1 %v7518_v27  ;;  %2167 = vperm.xlu0 %6588, %v4469_v25  }
  0x48   :  { %457 = vmatmul.mubr.f32.gmra.mrb[6].mxu0 %v8757_v39  ;;  %1696 = vperm.xlu1 %6589, %v8646_v8   ;;  %v2172_v8 = vsub.f32 1.0, %v7523_v20 }
  0x49   :  { %5697 = vmatpush1.bf16.msra.mxu0 %v7002_v15  ;;  %804 = vmatprep.mubr.f32.mxu0 %v8757_v39 }
  0x4a   :  { %5699 = vmatprep.subr.bf16.mxu0 %v7005_v16  ;;  %5723 = vmatprep.subr.bf16.mxu1 %v7043_v29  ;;  %v2173_v16 = vsub.f32 1.0, %v4469_v25 }
  0x4b   :  { %5070 = vmatmul.mubr.f32.vlgmr.msra.gmra.mrb[2].mxu1 %v8757_v39  ;;  %2190 = vperm.xlu0 %6588, %v4470_v0  }
  0x4c   :  { %1701 = vperm.xlu1 %6589, %v8649_v3   ;;  %5725 = vmatpush3.bf16.msra.mxu1 %v7043_v29  ;;  %v2201_v3 = vsub.f32 1.0, %v4471_v51 }
  0x4d   :  { %5701 = vmatpush1.bf16.msra.mxu0 %v7020_v21  ;;  %5727 = vmatprep.subr.bf16.mxu1 %v7058_v34 }
  0x4e   :  { %5703 = vmatprep.subr.bf16.mxu0 %v7026_v23 }
  0x4f   :  { %2195 = vperm.xlu0 %6588, %v4471_v51  }
  0x50   :  { %2176 = vperm.xlu1 %6589, %v2172_v8   ;;  %5729 = vmatpush3.bf16.msra.mxu1 %v7058_v34 }
  0x51   :  { %5705 = vmatpush1.bf16.msra.mxu0 %v7052_v32  ;;  %5731 = vmatprep.subr.bf16.mxu1 %v7080_v41 }
  0x52   :  { %5707 = vmatprep.subr.bf16.mxu0 %v7061_v35 }
  0x53   :  { %2670 = vperm.xlu0 %6588, %v4470_v0   ;;  %v8759_v0 = vsub.f32 1.0, %v7486_v38 }
  0x54   :  { %2181 = vperm.xlu1 %6589, %v2173_v16   ;;  %5733 = vmatpush3.bf16.msra.mxu1 %v7080_v41 }
  0x55   :  { %5709 = vmatpush1.bf16.msra.mxu0 %v7089_v44  ;;  %5735 = vmatprep.subr.bf16.mxu1 %v7108_v50 }
  0x56   :  { %5711 = vmatprep.subr.bf16.mxu0 %v7092_v45 }
  0x57   :  { %2675 = vperm.xlu0 %6588, %v4471_v51   ;;  %v8770_v51 = vsub.f32 1.0, %v7193_v17 }
  0x58   :  { %2204 = vperm.xlu1 %6589, %v2200_v2   ;;  %5737 = vmatpush3.bf16.msra.mxu1 %v7108_v50 }
  0x59   :  { %5713 = vmatpush1.bf16.msra.mxu0 %v7123_v54  ;;  %5739 = vmatprep.subr.bf16.mxu1 %v7145_v61 }
  0x5a   :  { %5715 = vmatprep.subr.bf16.mxu0 %v7129_v56 }
  0x5b   :  { %2698 = vperm.xlu0 %6588, %v7523_v20   ;;  %v8760_v20 = vsub.f32 1.0, %v7508_v62 }
  0x5c   :  { %2209 = vperm.xlu1 %6589, %v2201_v3   ;;  %5741 = vmatpush3.bf16.msra.mxu1 %v7145_v61 }
  0x5d   :  { %5717 = vmatpush1.bf16.msra.mxu0 %v7156_v1  ;;  %5743 = vmatprep.subr.bf16.mxu1 %v7182_v12 }
  0x5e   :  { %5719 = vmatprep.subr.bf16.mxu0 %v7165_v4 }
  0x5f   :  { %2703 = vperm.xlu0 %6588, %v4469_v25   ;;  %v8762_v25 = vsub.f32 1.0, %v7456_v53 }
  0x60   :  { %2684 = vperm.xlu1 %6589, %v2200_v2   ;;  %5745 = vmatpush3.bf16.msra.mxu1 %v7182_v12  ;;  %v8772_v2 = vsub.f32 1.0, %v7196_v18 }
  0x61   :  { %5721 = vmatpush1.bf16.msra.mxu0 %v7199_v19  ;;  %5747 = vmatprep.subr.bf16.mxu1 %v7221_v28 }
  0x62   :  { %5755 = vmatprep.subr.bf16.mxu0 %v7205_v22 }
  0x63   :  { %3178 = vperm.xlu0 %6588, %v7486_v38   ;;  %v8764_v38 = vsub.f32 1.0, %v7383_v26 }
  0x64   :  { %2689 = vperm.xlu1 %6589, %v2201_v3   ;;  %5749 = vmatpush3.bf16.msra.mxu1 %v7221_v28  ;;  %v8768_v3 = vsub.f32 1.0, %v7309_v11 }
  0x65   :  { %5751 = vmatprep.subr.bf16.mxu1 %v7256_v43 }
  0x67   :  { %3183 = vperm.xlu0 %6588, %v7508_v62   ;;  %v8765_v62 = vpack.i.bf16 %v7231_v33, %v7193_v17  ;;  %v213_v17 = vld [vmem:[%s8622_s0] sm:$0xff] }
  0x68   :  { %2712 = vperm.xlu1 %6589, %v2172_v8   ;;  %5753 = vmatpush3.bf16.msra.mxu1 %v7256_v43  ;;  %v8761_v8 = vsub.f32 1.0, %v7420_v49 }
  0x69   :  { %5787 = vmatprep.subr.bf16.mxu1 %v7296_v6 }
  0x6b   :  { %3206 = vperm.xlu0 %6588, %v7420_v49   ;;  %v8766_v49 = vsub.f32 1.0, %v7267_v48 }
  0x6c   :  { %2717 = vperm.xlu1 %6589, %v2173_v16   ;;  %v8763_v16 = vsub.f32 1.0, %v7346_v40 }
  0x6f   :  { %3211 = vperm.xlu0 %6588, %v7456_v53   ;;  %v8767_v53 = vsub.f32 1.0, %v7231_v33 }
  0x70   :  { %3192 = vperm.xlu1 %6589, %v8759_v0  }
  0x73   :  { %3686 = vperm.xlu0 %6588, %v7346_v40   ;;  %v8769_v40 = vsub.f32 1.0, %v7126_v55 }
  0x74   :  { %3197 = vperm.xlu1 %6589, %v8760_v20  }
  0x77   :  { %3691 = vperm.xlu0 %6588, %v7383_v26   ;;  %v8771_v26 = vpack.i.bf16 %v7196_v18, %v7126_v55  ;;  %v217_v18 = vunpack.c.l.bf16 %v213_v17 }
  0x78   :  { %3220 = vperm.xlu1 %6589, %v8761_v8  }
  0x7b   :  { %3714 = vperm.xlu0 %6588, %v7267_v48   ;;  %v171_v48 = vlaneseq }
  0x7c   :  { %3225 = vperm.xlu1 %6589, %v8762_v25  }
  0x7d   :  { %v7620_v0 = vshrl.u32 %v171_v48, 7 }
  0x7f   :  { %3719 = vperm.xlu0 %6588, %v7309_v11   ;;  %v173_v33 = vsub.s32 0, %v7620_v0  ;;  %v169_v11 = vld [vmem:[%s8621_s4] sm:$0x7]  ;;  %v177_v20 = vsub.s32 1, %v7620_v0 }
  0x80   :  { %3700 = vperm.xlu1 %6589, %v8763_v16   ;;  %v215_v16 = vld [vmem:[%s8622_s0 + $0xc] sm:$0xff] }
  0x81   :  { %v7630_v55 = vrot.slane %v169_v11, %v173_v33  ;;  %v7632_v8 = vrot.slane %v169_v11, %v177_v20 }
  0x83   :  { %6591 = vperm.xlu0 %6588, %v8765_v62   ;;  %8773 = vst [vmem:[#allocation25_spill] sm:$0xff] %v7630_v55  ;;  %8774 = vst [vmem:[#allocation26_spill] sm:$0xff] %v7632_v8 }
  0x84   :  { %3705 = vperm.xlu1 %6589, %v8764_v38  }
  0x87   :  { %4211 = vperm.xlu0 %6588, %v8767_v53  }
  0x88   :  { %3728 = vperm.xlu1 %6589, %v8766_v49   ;;  %v218_v49 = vunpack.c.h.bf16 %v213_v17 }
  0x8b   :  { %4234 = vperm.xlu0 %6588, %v8769_v40   ;;  %v220_v40 = vunpack.c.l.bf16 %v215_v16 }
  0x8c   :  { %3733 = vperm.xlu1 %6589, %v8768_v3  }
  0x90   :  { %4206 = vperm.xlu1 %6589, %v8770_v51  }
  0x94   :  { %6596 = vperm.xlu1 %6589, %v8771_v26   ;;  %v221_v26 = vunpack.c.h.bf16 %v215_v16 }
  0x98   :  { %4239 = vperm.xlu1 %6589, %v8772_v2  }
  0xf7   :  { %v300_v25 = vpop.f32.mrb[0].mxu0 }
  0xf8   :  { %v301_v38 = vadd.f32 %v300_v25, %v7630_v55  ;;  %v302_v62 = vpop.f32.mrb[1].mxu0 }
  0xf9   :  { %v303_v53 = vadd.f32 %v302_v62, %v7632_v8 }
  0xfa   :  { %v538_v3 = vadd.f32 %v301_v38, %v217_v18  ;;  %v8664_v38 = vsub.s32 2, %v7620_v0 }
  0xfb   :  { %v306_v51 = vpop.f32.mrb[2].mxu0  ;;  %v552_v43 = vadd.f32 %v303_v53, %v218_v49 }
  0xfc   :  { %v4378_v2 = vmul.f32 -1.442695, %v538_v3  ;;  %v307_v48 = vadd.f32 %v306_v51, %v7630_v55  ;;  %v308_v22 = vpop.f32.mrb[3].mxu0 }
  0xfd   :  { %v309_v19 = vadd.f32 %v308_v22, %v7632_v8  ;;  %v5036_v25 = vpop.f32.mrb[0].mxu1  ;;  %v4380_v56 = vmul.f32 -1.442695, %v552_v43  ;;  %v7644_v22 = vrot.slane %v169_v11, %v8664_v38  ;;  %v4374_v11 = vld [vmem:[%s8623_s1 + $0xa8] sm:$0xff] }
  0xfe   :  { %6600 = vpow2.f32 %v4378_v2  ;;  %v539_v4 = vadd.f32 %v307_v48, %v220_v40  ;;  %v377_v17 = vpop.f32.mrb[1].mxu1  ;;  %v228_v48 = vunpack.c.l.bf16 %v4374_v11 }
  0xff   :  { %v553_v28 = vadd.f32 %v309_v19, %v221_v26  ;;  %8775 = vst [vmem:[#allocation27_spill] sm:$0xff] %v7644_v22  ;;  %v378_v43 = vadd.f32 %v377_v17, %v7644_v22  ;;  %v4376_v17 = vld [vmem:[%s8623_s1 + $0xb4] sm:$0xff] }
 0x100   :  { %v4379_v1 = vmul.f32 -1.442695, %v539_v4  ;;  %v232_v54 = vunpack.c.h.bf16 %v4376_v17 }
 0x101   :  { %v4381_v62 = vmul.f32 -1.442695, %v553_v28 }
 0x102   :  { %6602 = vpow2.f32 %v4379_v1  ;;  %v216_v1 = vld [vmem:[%s8622_s0 + $0x8] ss:$12 sps:$4 sm:$0xff]  }
 0x103   :  { %6604 = vpow2.f32 %v4380_v56  ;;  %v7652_v56 = vld [vmem:[%s8621_s4 + $0x3] sm:$0x7]  ;;  %v219_v40 = vunpack.c.l.bf16 %v216_v1 }
 0x104   :  { %6606 = vpow2.f32 %v4381_v62  ;;  %v7659_v51 = vrot.slane %v7652_v56, %v173_v33  ;;  %v7662_v62 = vrot.slane %v7652_v56, %v177_v20 }
 0x106   :  { %8776 = vst [vmem:[#allocation28_spill] sm:$0xff] %v7659_v51  ;;  %8777 = vst [vmem:[#allocation29_spill] sm:$0xff] %v7662_v62 }
 0x108   :  { %v6601_v18 = vpop.eup %6600 }
 0x109   :  { %v546_v16 = vadd.f32 1.0, %v6601_v18  ;;  %v222_v18 = vunpack.c.h.bf16 %v216_v1 }
 0x10b   :  { %6608 = vrcp.f32 %v546_v16 }
 0x10c   :  { %v6603_v3 = vpop.eup %6602 }
 0x10d   :  { %v547_v49 = vadd.f32 1.0, %v6603_v3  ;;  %v6605_v19 = vpop.eup %6604  ;;  %v383_v3 = vadd.f32 %v5036_v25, %v7644_v22 }
 0x10e   :  { %v6607_v4 = vpop.eup %6606  ;;  %v560_v28 = vadd.f32 1.0, %v6605_v19 }
 0x10f   :  { %6610 = vrcp.f32 %v547_v49  ;;  %v561_v53 = vadd.f32 1.0, %v6607_v4 }
 0x110   :  { %6612 = vrcp.f32 %v560_v28  ;;  %v229_v28 = vunpack.c.h.bf16 %v4374_v11 }
 0x111   :  { %6614 = vrcp.f32 %v561_v53 }
 0x115   :  { %v6609_v26 = vpop.eup %6608 }
 0x116   :  { %v566_v2 = vmul.f32 %v6609_v26, %v378_v43  ;;  %v231_v43 = vunpack.c.l.bf16 %v4376_v17 }
 0x117   :  { %v452_v16 = vpop.f32.mrb[4].mxu0 }
 0x118   :  { %v568_v49 = vadd.f32 %v566_v2, %v219_v40  ;;  %v453_v33 = vadd.f32 %v452_v16, %v7659_v51  ;;  %v454_v19 = vpop.f32.mrb[5].mxu0 }
 0x119   :  { %v6611_v4 = vpop.eup %6610  ;;  %v455_v38 = vadd.f32 %v454_v19, %v7662_v62  ;;  %v640_v19 = vpop.permute.xlu0 %639 }
 0x11a   :  { %v567_v26 = vmul.f32 %v6611_v4, %v383_v3  ;;  %6616 = vtanh.f32 %v568_v49  ;;  %v580_v20 = vadd.f32 %v453_v33, %v228_v48  ;;  %v6613_v11 = vpop.eup %6612 }
 0x11b   :  { %v458_v8 = vpop.f32.mrb[6].mxu0  ;;  %v594_v40 = vadd.f32 %v455_v38, %v229_v28  ;;  %v6615_v33 = vpop.eup %6614  ;;  %v572_v4 = vsub.f32 1.0, %v6613_v11  ;;  %v576_v17 = vmul.f32 0.0, %v6613_v11 }
 0x11c   :  { %v569_v55 = vadd.f32 %v567_v26, %v222_v18  ;;  %v4382_v12 = vmul.f32 -1.442695, %v580_v20  ;;  %v459_v1 = vadd.f32 %v458_v8, %v7659_v51  ;;  %v460_v53 = vpop.f32.mrb[7].mxu0  ;;  %v645_v26 = vpop.permute.xlu1 %644  ;;  %v573_v20 = vsub.f32 1.0, %v6615_v33 }
 0x11d   :  { %v461_v25 = vadd.f32 %v460_v53, %v7662_v62  ;;  %v4384_v18 = vmul.f32 -1.442695, %v594_v40  ;;  %v577_v38 = vmul.f32 0.0, %v6615_v33  ;;  %v8778_v33 = vsub.s32 2, %v7620_v0  ;;  %v4375_v0 = vld [vmem:[%s8623_s1 + $0xb0] sm:$0xf] }
 0x11e   :  { %6618 = vtanh.f32 %v569_v55  ;;  %v581_v2 = vadd.f32 %v459_v1, %v231_v43  ;;  %v7672_v3 = vpop.f32.mrb[2].mxu1  ;;  %v654_v43 = vpop.permute.xlu0 %653 }
 0x11f   :  { %6620 = vpow2.f32 %v4382_v12  ;;  %v595_v48 = vadd.f32 %v461_v25, %v232_v54  ;;  %v529_v49 = vpop.f32.mrb[3].mxu1 }
 0x120   :  { %v4383_v16 = vmul.f32 -1.442695, %v581_v2  ;;  %v661_v2 = vmul.f32 0.0, %v654_v43  ;;  %v659_v62 = vpop.permute.xlu1 %658 }
 0x121   :  { %v4385_v55 = vmul.f32 -1.442695, %v595_v48 }
 0x122   :  { %6622 = vpow2.f32 %v4383_v16  ;;  %v662_v16 = vmul.f32 0.0, %v659_v62  ;;  %v7683_v62 = vrot.slane %v7652_v56, %v8778_v33 }
 0x123   :  { %6624 = vpow2.f32 %v4384_v18 }
 0x124   :  { %v6617_v8 = vpop.eup %6616  ;;  %6626 = vpow2.f32 %v4385_v55  ;;  %v530_v55 = vadd.f32 %v529_v49, %v7683_v62  ;;  %v535_v43 = vadd.f32 %v7672_v3, %v7683_v62  ;;  %v8779_v3 = vld [vmem:[#allocation21_spill] sm:$0xff] }
 0x125   :  { %v574_v53 = vmul.f32 %v6617_v8, %v572_v4 }
 0x127   :  { %v578_v12 = vadd.f32 %v576_v17, %v574_v53 }
 0x128   :  { %v6619_v28 = vpop.eup %6618 }
 0x129   :  { %v6621_v1 = vpop.eup %6620  ;;  %v575_v54 = vmul.f32 %v6619_v28, %v573_v20  ;;  %v647_v25 = vmul.f32 %v640_v19, %v578_v12 }
 0x12a   :  { %v588_v40 = vadd.f32 1.0, %v6621_v1 }
 0x12b   :  { %v7674_v51 = vadd.f32 %v661_v2, %v647_v25  ;;  %v579_v22 = vadd.f32 %v577_v38, %v575_v54 }
 0x12c   :  { %v6623_v11 = vpop.eup %6622  ;;  %6628 = vrcp.f32 %v588_v40 }
 0x12d   :  { %v589_v4 = vadd.f32 1.0, %v6623_v11  ;;  %805 = vmatmul.mubr.f32.vlgmr.msra.gmra.mrb[8].mxu0 %v7674_v51  ;;  %5104 = vmatprep.mubr.f32.mxu1 %v7674_v51  ;;  %v648_v48 = vmul.f32 %v645_v26, %v579_v22  ;;  %v6625_v8 = vpop.eup %6624  ;;  %v693_v17 = vmul.f32 %v7674_v51, %v640_v19  ;;  %v4377_v19 = vld [vmem:[%s8623_s1 + $0xbc] sm:$0xf] }
 0x12e   :  { %5757 = vmatpush1.bf16.msra.mxu0 %v7234_v36  ;;  %810 = vmatprep.mubr.f32.mxu0 %v8757_v39  ;;  %v6627_v22 = vpop.eup %6626  ;;  %v602_v56 = vadd.f32 1.0, %v6625_v8  ;;  %v233_v28 = vunpack.c.l.bf16 %v4377_v19  ;;  %v8781_v11 = vld [vmem:[#allocation23_spill] sm:$0xff]  ;;  %v668_v8 = vpop.permute.xlu0 %667 }
 0x12f   :  { %6630 = vrcp.f32 %v589_v4  ;;  %v7685_v18 = vadd.f32 %v662_v16, %v648_v48  ;;  %5759 = vmatprep.subr.bf16.mxu0 %v7240_v37  ;;  %v603_v12 = vadd.f32 1.0, %v6627_v22  ;;  %v8780_v16 = vld [vmem:[#allocation22_spill] sm:$0xff] }
 0x130   :  { %6632 = vrcp.f32 %v602_v56  ;;  %v8782_v56 = vld [vmem:[#allocation24_spill] sm:$0xff] }
 0x131   :  { %v694_v20 = vmul.f32 %v7685_v18, %v645_v26  ;;  %811 = vmatmul.mubr.f32.gmra.mrb[10].mxu0 %v7685_v18  ;;  %5105 = vmatmul.mubr.f32.vlgmr.msra.gmra.mrb[4].mxu1 %v7685_v18  ;;  %v230_v26 = vunpack.c.l.bf16 %v4375_v0  ;;  %6634 = vrcp.f32 %v603_v12 }
 0x132   :  { %5761 = vmatpush1.bf16.msra.mxu0 %v7272_v52  ;;  %5789 = vmatpush3.bf16.msra.mxu1 %v7296_v6 }
 0x133   :  { %v4623_v53 = vpack.c.bf16 %v694_v20, %v693_v17  ;;  %5763 = vmatprep.subr.bf16.mxu0 %v7280_v58  ;;  %5791 = vmatprep.subr.bf16.mxu1 %v7336_v31  ;;  %v682_v17 = vpop.permute.xlu1 %681 }
 0x134   :  { %956 = vmatprep.mubr.f32.mxu0 %v8757_v39 }
 0x135   :  { %4624 = vst [vmem:[%s8624_s5] sm:$0xff] %v4623_v53  }
 0x136   :  { %v6629_v38 = vpop.eup %6628  ;;  %5765 = vmatpush1.bf16.msra.mxu0 %v7315_v14  ;;  %5793 = vmatpush3.bf16.msra.mxu1 %v7336_v31 }
 0x137   :  { %v608_v49 = vmul.f32 %v6629_v38, %v530_v55  ;;  %5767 = vmatprep.subr.bf16.mxu0 %v7320_v24  ;;  %5795 = vmatprep.subr.bf16.mxu1 %v7373_v7  ;;  %v689_v38 = vmul.f32 0.0, %v682_v17  ;;  %v8785_v17 = vld [vmem:[#allocation16_spill] sm:$0xff] }
 0x139   :  { %v6631_v1 = vpop.eup %6630  ;;  %v610_v2 = vadd.f32 %v608_v49, %v230_v26 }
 0x13a   :  { %v609_v54 = vmul.f32 %v6631_v1, %v535_v43  ;;  %5769 = vmatpush1.bf16.msra.mxu0 %v7352_v46  ;;  %5797 = vmatpush3.bf16.msra.mxu1 %v7373_v7  ;;  %v6633_v40 = vpop.eup %6632  ;;  %v687_v43 = vpop.permute.xlu1 %686 }
 0x13b   :  { %6636 = vtanh.f32 %v610_v2  ;;  %5771 = vmatprep.subr.bf16.mxu0 %v7357_v47  ;;  %5799 = vmatprep.subr.bf16.mxu1 %v7410_v63  ;;  %v6635_v4 = vpop.eup %6634  ;;  %v614_v48 = vsub.f32 1.0, %v6633_v40  ;;  %v618_v20 = vmul.f32 0.0, %v6633_v40  ;;  %v690_v2 = vmul.f32 0.0, %v687_v43  ;;  %v8793_v43 = vld [vmem:[#allocation25_spill] sm:$0xff] }
 0x13c   :  { %v611_v25 = vadd.f32 %v609_v54, %v233_v28  ;;  %v615_v22 = vsub.f32 1.0, %v6635_v4  ;;  %v619_v19 = vmul.f32 0.0, %v6635_v4  ;;  %v673_v28 = vpop.permute.xlu0 %672 }
 0x13e   :  { %6638 = vtanh.f32 %v611_v25  ;;  %5773 = vmatpush1.bf16.msra.mxu0 %v7390_v30  ;;  %5801 = vmatpush3.bf16.msra.mxu1 %v7410_v63 }
 0x13f   :  { %5775 = vmatprep.subr.bf16.mxu0 %v8779_v3  ;;  %5803 = vmatprep.subr.bf16.mxu1 %v7446_v59 }
 0x142   :  { %5777 = vmatpush1.bf16.msra.mxu0 %v8780_v16  ;;  %5805 = vmatpush3.bf16.msra.mxu1 %v7446_v59 }
 0x143   :  { %5779 = vmatprep.subr.bf16.mxu0 %v8781_v11  ;;  %5807 = vmatprep.subr.bf16.mxu1 %v7476_v13 }
 0x145   :  { %v6637_v33 = vpop.eup %6636 }
 0x146   :  { %v616_v0 = vmul.f32 %v6637_v33, %v614_v48  ;;  %5781 = vmatpush1.bf16.msra.mxu0 %v7462_v57  ;;  %5809 = vmatpush3.bf16.msra.mxu1 %v7476_v13  ;;  %v8783_v33 = vld [vmem:[#allocation4_spill] sm:$0xff] }
 0x147   :  { %5783 = vmatprep.subr.bf16.mxu0 %v8782_v56  ;;  %5811 = vmatprep.subr.bf16.mxu1 %v7498_v60 }
 0x148   :  { %v6639_v53 = vpop.eup %6638  ;;  %v620_v55 = vadd.f32 %v618_v20, %v616_v0  ;;  %v8786_v20 = vld [vmem:[#allocation12_spill] sm:$0xff]  ;;  %v8787_v0 = vld [vmem:[#allocation14_spill] sm:$0xff] }
 0x149   :  { %v617_v26 = vmul.f32 %v6639_v53, %v615_v22  ;;  %v8788_v22 = vld [vmem:[#allocation19_spill] sm:$0xff] }
 0x14a   :  { %5785 = vmatpush1.bf16.msra.mxu0 %v7492_v42  ;;  %5813 = vmatpush3.bf16.msra.mxu1 %v7498_v60  ;;  %v675_v12 = vmul.f32 %v668_v8, %v620_v55  ;;  %v8789_v53 = vld [vmem:[#allocation15_spill] sm:$0xff]  ;;  %v8790_v55 = vld [vmem:[#allocation17_spill] sm:$0xff] }
 0x14b   :  { %5815 = vmatprep.subr.bf16.mxu1 %v7518_v27  ;;  %v621_v49 = vadd.f32 %v619_v19, %v617_v26  ;;  %5819 = vmatprep.subr.bf16.mxu0 %v6972_v5  ;;  %v8791_v19 = vld [vmem:[#allocation20_spill] sm:$0xff]  ;;  %v8792_v26 = vld [vmem:[#allocation18_spill] sm:$0xff] }
 0x14c   :  { %v7733_v1 = vadd.f32 %v689_v38, %v675_v12  ;;  %v4396_v38 = vld [vmem:[%s8622_s0 + $0x18] sm:$0xff] }
 0x14d   :  { %v676_v54 = vmul.f32 %v673_v28, %v621_v49  ;;  %v723_v12 = vunpack.c.l.bf16 %v4396_v38 }
 0x14e   :  { %957 = vmatmul.mubr.f32.vlgmr.msra.gmra.mrb[12].mxu0 %v7733_v1  ;;  %5139 = vmatprep.mubr.f32.mxu1 %v7733_v1  ;;  %v705_v40 = vmul.f32 %v7733_v1, %v668_v8  ;;  %v8784_v8 = vld [vmem:[#allocation11_spill] sm:$0xff] }
 0x14f   :  { %5817 = vmatpush3.bf16.msra.mxu1 %v7518_v27  ;;  %962 = vmatprep.mubr.f32.mxu0 %v8757_v39  ;;  %v7739_v25 = vadd.f32 %v690_v2, %v676_v54 }
 0x150   :  { %5821 = vmatpush1.bf16.msra.mxu0 %v6984_v9  ;;  %5851 = vmatprep.subr.bf16.mxu1 %v7043_v29 }
 0x151   :  { %v706_v4 = vmul.f32 %v7739_v25, %v673_v28  ;;  %5823 = vmatprep.subr.bf16.mxu0 %v6986_v10  ;;  %v4398_v28 = vld [vmem:[%s8622_s0 + $0x24] sm:$0xff] }
 0x152   :  { %963 = vmatmul.mubr.f32.gmra.mrb[14].mxu0 %v7739_v25  ;;  %5140 = vmatmul.mubr.f32.vlgmr.msra.gmra.mrb[6].mxu1 %v7739_v25 }
 0x153   :  { %v4628_v48 = vpack.c.bf16 %v706_v4, %v705_v40  ;;  %5853 = vmatpush3.bf16.msra.mxu1 %v7043_v29  ;;  %1312 = vmatprep.mubr.f32.mxu0 %v8757_v39  ;;  %v724_v40 = vunpack.c.h.bf16 %v4396_v38  ;;  %v8794_v4 = vld [vmem:[#allocation26_spill] sm:$0xff] }
 0x154   :  { %5825 = vmatpush1.bf16.msra.mxu0 %v7002_v15  ;;  %5855 = vmatprep.subr.bf16.mxu1 %v7058_v34 }
 0x155   :  { %4700 = vst [vmem:[%s8625_s6 + $0x38] sm:$0xff] %v4628_v48   ;;  %5827 = vmatprep.subr.bf16.mxu0 %v8783_v33 }
 0x157   :  { %5857 = vmatpush3.bf16.msra.mxu1 %v7058_v34 }
 0x158   :  { %5829 = vmatpush1.bf16.msra.mxu0 %v7020_v21  ;;  %5859 = vmatprep.subr.bf16.mxu1 %v7080_v41 }
 0x159   :  { %5831 = vmatprep.subr.bf16.mxu0 %v7026_v23  ;;  %v1161_v23 = vpop.permute.xlu1 %1160 }
 0x15b   :  { %5861 = vmatpush3.bf16.msra.mxu1 %v7080_v41 }
 0x15c   :  { %5833 = vmatpush1.bf16.msra.mxu0 %v7052_v32  ;;  %5863 = vmatprep.subr.bf16.mxu1 %v7108_v50 }
 0x15d   :  { %5835 = vmatprep.subr.bf16.mxu0 %v7061_v35 }
 0x15f   :  { %5865 = vmatpush3.bf16.msra.mxu1 %v7108_v50 }
 0x160   :  { %5837 = vmatpush1.bf16.msra.mxu0 %v7089_v44  ;;  %5867 = vmatprep.subr.bf16.mxu1 %v7145_v61 }
 0x161   :  { %5839 = vmatprep.subr.bf16.mxu0 %v7092_v45 }
 0x163   :  { %5869 = vmatpush3.bf16.msra.mxu1 %v7145_v61 }
 0x164   :  { %5841 = vmatpush1.bf16.msra.mxu0 %v8784_v8  ;;  %5871 = vmatprep.subr.bf16.mxu1 %v8785_v17 }
 0x165   :  { %5843 = vmatprep.subr.bf16.mxu0 %v8786_v20  ;;  %v727_v20 = vunpack.c.h.bf16 %v4398_v28 }
 0x167   :  { %5873 = vmatpush3.bf16.msra.mxu1 %v8785_v17 }
 0x168   :  { %5845 = vmatpush1.bf16.msra.mxu0 %v8787_v0  ;;  %5875 = vmatprep.subr.bf16.mxu1 %v8788_v22 }
 0x169   :  { %5847 = vmatprep.subr.bf16.mxu0 %v8789_v53 }
 0x16b   :  { %5877 = vmatpush3.bf16.msra.mxu1 %v8788_v22 }
 0x16c   :  { %5849 = vmatpush1.bf16.msra.mxu0 %v8790_v55  ;;  %5879 = vmatprep.subr.bf16.mxu1 %v8791_v19 }
 0x16d   :  { %5883 = vmatprep.subr.bf16.mxu0 %v8792_v26 }
 0x16f   :  { %5881 = vmatpush3.bf16.msra.mxu1 %v8791_v19  ;;  %v726_v19 = vunpack.c.l.bf16 %v4398_v28 }
 0x170   :  { %5915 = vmatprep.subr.bf16.mxu1 %v7296_v6 }
 0x200   :  { %v806_v49 = vpop.f32.mrb[8].mxu0 }
 0x201   :  { %v807_v2 = vadd.f32 %v806_v49, %v8793_v43  ;;  %v808_v54 = vpop.f32.mrb[9].mxu0 }
 0x202   :  { %v809_v48 = vadd.f32 %v808_v54, %v8794_v4 }
 0x203   :  { %v1044_v26 = vadd.f32 %v807_v2, %v723_v12 }
 0x204   :  { %v812_v55 = vpop.f32.mrb[10].mxu0  ;;  %v5106_v53 = vpop.f32.mrb[4].mxu1  ;;  %v1058_v45 = vadd.f32 %v809_v48, %v724_v40 }
 0x205   :  { %v4404_v22 = vmul.f32 -1.442695, %v1044_v26  ;;  %v813_v0 = vadd.f32 %v812_v55, %v8793_v43  ;;  %v814_v17 = vpop.f32.mrb[11].mxu0  ;;  %v883_v8 = vpop.f32.mrb[5].mxu1 }
 0x206   :  { %v815_v61 = vadd.f32 %v814_v17, %v8794_v4  ;;  %v4406_v38 = vmul.f32 -1.442695, %v1058_v45  ;;  %v4399_v17 = vld [vmem:[%s8622_s0 + $0x20] ss:$12 sps:$4 sm:$0xff]  }
 0x207   :  { %6640 = vpow2.f32 %v4404_v22  ;;  %v1045_v44 = vadd.f32 %v813_v0, %v726_v19 }
 0x208   :  { %v1059_v35 = vadd.f32 %v815_v61, %v727_v20  ;;  %v8795_v61 = vld [vmem:[#allocation27_spill] sm:$0xff] }
 0x209   :  { %v4405_v49 = vmul.f32 -1.442695, %v1045_v44  ;;  %v725_v44 = vunpack.c.l.bf16 %v4399_v17  ;;  %v884_v45 = vadd.f32 %v883_v8, %v8795_v61  ;;  %v8796_v8 = vld [vmem:[#allocation28_spill] sm:$0xff] }
 0x20a   :  { %v4407_v54 = vmul.f32 -1.442695, %v1059_v35  ;;  %v4400_v35 = vld [vmem:[%s8623_s1 + $0x90] sm:$0xff] }
 0x20b   :  { %6642 = vpow2.f32 %v4405_v49  ;;  %v734_v48 = vunpack.c.l.bf16 %v4400_v35  ;;  %v728_v49 = vunpack.c.h.bf16 %v4399_v17 }
 0x20c   :  { %6644 = vpow2.f32 %v4406_v38  ;;  %v889_v38 = vadd.f32 %v5106_v53, %v8795_v61 }
 0x20d   :  { %6646 = vpow2.f32 %v4407_v54 }
 0x211   :  { %v6641_v12 = vpop.eup %6640 }
 0x212   :  { %v1052_v2 = vadd.f32 1.0, %v6641_v12 }
 0x214   :  { %6648 = vrcp.f32 %v1052_v2  ;;  %v4402_v2 = vld [vmem:[%s8623_s1 + $0x9c] sm:$0xff] }
 0x215   :  { %v6643_v26 = vpop.eup %6642  ;;  %v737_v17 = vunpack.c.l.bf16 %v4402_v2  ;;  %v738_v50 = vunpack.c.h.bf16 %v4402_v2 }
 0x216   :  { %v1053_v55 = vadd.f32 1.0, %v6643_v26  ;;  %v6645_v28 = vpop.eup %6644 }
 0x217   :  { %v6647_v22 = vpop.eup %6646  ;;  %v1066_v0 = vadd.f32 1.0, %v6645_v28 }
 0x218   :  { %6650 = vrcp.f32 %v1053_v55  ;;  %v1067_v19 = vadd.f32 1.0, %v6647_v22  ;;  %v735_v22 = vunpack.c.h.bf16 %v4400_v35 }
 0x219   :  { %6652 = vrcp.f32 %v1066_v0  ;;  %v8797_v0 = vld [vmem:[#allocation29_spill] sm:$0xff] }
 0x21a   :  { %6654 = vrcp.f32 %v1067_v19 }
 0x21e   :  { %v6649_v20 = vpop.eup %6648 }
 0x21f   :  { %v1072_v40 = vmul.f32 %v6649_v20, %v884_v45 }
 0x221   :  { %v1074_v54 = vadd.f32 %v1072_v40, %v725_v44  ;;  %v958_v12 = vpop.f32.mrb[12].mxu0 }
 0x222   :  { %v6651_v26 = vpop.eup %6650  ;;  %v959_v55 = vadd.f32 %v958_v12, %v8796_v8  ;;  %v960_v28 = vpop.f32.mrb[13].mxu0 }
 0x223   :  { %v1073_v4 = vmul.f32 %v6651_v26, %v889_v38  ;;  %6656 = vtanh.f32 %v1074_v54  ;;  %v961_v45 = vadd.f32 %v960_v28, %v8797_v0  ;;  %v6653_v54 = vpop.eup %6652 }
 0x224   :  { %v1086_v20 = vadd.f32 %v959_v55, %v734_v48 }
 0x225   :  { %v1075_v43 = vadd.f32 %v1073_v4, %v728_v49  ;;  %v964_v53 = vpop.f32.mrb[14].mxu0  ;;  %v7805_v44 = vpop.f32.mrb[6].mxu1  ;;  %v1100_v12 = vadd.f32 %v961_v45, %v735_v22  ;;  %v1078_v49 = vsub.f32 1.0, %v6653_v54 }
 0x226   :  { %v4408_v40 = vmul.f32 -1.442695, %v1086_v20  ;;  %v965_v61 = vadd.f32 %v964_v53, %v8796_v8  ;;  %v966_v32 = vpop.f32.mrb[15].mxu0  ;;  %v1035_v19 = vpop.f32.mrb[7].mxu1  ;;  %v1082_v20 = vmul.f32 %v6653_v54, %v7674_v51 }
 0x227   :  { %6658 = vtanh.f32 %v1075_v43  ;;  %v967_v38 = vadd.f32 %v966_v32, %v8797_v0  ;;  %v4410_v55 = vmul.f32 -1.442695, %v1100_v12  ;;  %v6655_v4 = vpop.eup %6654  ;;  %v1147_v8 = vpop.permute.xlu0 %1146 }
 0x228   :  { %6660 = vpow2.f32 %v4408_v40  ;;  %v1087_v35 = vadd.f32 %v965_v61, %v737_v17  ;;  %v1079_v43 = vsub.f32 1.0, %v6655_v4  ;;  %v1168_v61 = vmul.f32 %v1161_v23, %v7674_v51 }
 0x229   :  { %v1101_v48 = vadd.f32 %v967_v38, %v738_v50  ;;  %v1083_v50 = vmul.f32 %v6655_v4, %v7685_v18 }
 0x22a   :  { %v4409_v26 = vmul.f32 -1.442695, %v1087_v35 }
 0x22b   :  { %v4411_v2 = vmul.f32 -1.442695, %v1101_v48  ;;  %v1152_v54 = vpop.permute.xlu0 %1151 }
 0x22c   :  { %6662 = vpow2.f32 %v4409_v26  ;;  %v1166_v26 = vpop.permute.xlu1 %1165 }
 0x22d   :  { %v6657_v28 = vpop.eup %6656  ;;  %6664 = vpow2.f32 %v4410_v55  ;;  %v1169_v23 = vmul.f32 %v1166_v26, %v7685_v18  ;;  %v4403_v18 = vld [vmem:[%s8623_s1 + $0x98] ss:$12 sps:$4 sm:$0xff]  }
 0x22e   :  { %v1080_v53 = vmul.f32 %v6657_v28, %v1078_v49  ;;  %6666 = vpow2.f32 %v4411_v2 }
 0x230   :  { %v1084_v22 = vadd.f32 %v1082_v20, %v1080_v53 }
 0x231   :  { %v6659_v32 = vpop.eup %6658 }
 0x232   :  { %v6661_v45 = vpop.eup %6660  ;;  %v1154_v17 = vmul.f32 %v1147_v8, %v1084_v22  ;;  %v1081_v40 = vmul.f32 %v6659_v32, %v1079_v43  ;;  %v1036_v22 = vadd.f32 %v1035_v19, %v7683_v62  ;;  %v1041_v19 = vadd.f32 %v7805_v44, %v7683_v62 }
 0x233   :  { %v1094_v12 = vadd.f32 1.0, %v6661_v45 }
 0x234   :  { %v7812_v38 = vadd.f32 %v1168_v61, %v1154_v17  ;;  %v1085_v35 = vadd.f32 %v1083_v50, %v1081_v40  ;;  %v739_v50 = vunpack.c.h.bf16 %v4403_v18 }
 0x235   :  { %6668 = vrcp.f32 %v1094_v12 }
 0x236   :  { %v6663_v48 = vpop.eup %6662  ;;  %1313 = vmatmul.mubr.f32.vlgmr.msra.gmra.mrb[16].mxu0 %v7812_v38  ;;  %5174 = vmatprep.mubr.f32.mxu1 %v7812_v38  ;;  %v1155_v55 = vmul.f32 %v1152_v54, %v1085_v35  ;;  %v1200_v28 = vmul.f32 %v7812_v38, %v1147_v8  ;;  %v736_v8 = vunpack.c.l.bf16 %v4403_v18 }
 0x237   :  { %v1095_v51 = vadd.f32 1.0, %v6663_v48  ;;  %5885 = vmatpush1.bf16.msra.mxu0 %v7234_v36  ;;  %1318 = vmatprep.mubr.f32.mxu0 %v8757_v39  ;;  %v6665_v49 = vpop.eup %6664 }
 0x238   :  { %v7819_v4 = vadd.f32 %v1169_v23, %v1155_v55  ;;  %5887 = vmatprep.subr.bf16.mxu0 %v7240_v37  ;;  %v6667_v53 = vpop.eup %6666  ;;  %v1108_v2 = vadd.f32 1.0, %v6665_v49  ;;  %v1189_v49 = vpop.permute.xlu1 %1188 }
 0x239   :  { %6670 = vrcp.f32 %v1095_v51  ;;  %v1109_v61 = vadd.f32 1.0, %v6667_v53  ;;  %v1175_v51 = vpop.permute.xlu0 %1174  ;;  %v1196_v53 = vmul.f32 %v1189_v49, %v7733_v1  ;;  %v8807_v49 = vld [vmem:[#allocation12_spill] sm:$0xff] }
 0x23a   :  { %v1201_v20 = vmul.f32 %v7819_v4, %v1152_v54  ;;  %1319 = vmatmul.mubr.f32.gmra.mrb[18].mxu0 %v7819_v4  ;;  %5175 = vmatmul.mubr.f32.vlgmr.msra.gmra.mrb[8].mxu1 %v7819_v4  ;;  %6672 = vrcp.f32 %v1108_v2 }
 0x23b   :  { %5889 = vmatpush1.bf16.msra.mxu0 %v7272_v52  ;;  %5917 = vmatpush3.bf16.msra.mxu1 %v7296_v6  ;;  %6674 = vrcp.f32 %v1109_v61 }
 0x23c   :  { %v4633_v43 = vpack.c.bf16 %v1201_v20, %v1200_v28  ;;  %5891 = vmatprep.subr.bf16.mxu0 %v7280_v58  ;;  %5919 = vmatprep.subr.bf16.mxu1 %v7336_v31 }
 0x23d   :  { %1464 = vmatprep.mubr.f32.mxu0 %v8757_v39  ;;  %v1180_v61 = vpop.permute.xlu0 %1179 }
 0x23e   :  { %4701 = vst [vmem:[%s8624_s5 + $0x8] sm:$0xff] %v4633_v43  }
 0x23f   :  { %v6669_v32 = vpop.eup %6668  ;;  %5893 = vmatpush1.bf16.msra.mxu0 %v7315_v14  ;;  %5921 = vmatpush3.bf16.msra.mxu1 %v7336_v31 }
 0x240   :  { %v1114_v45 = vmul.f32 %v6669_v32, %v1036_v22  ;;  %5895 = vmatprep.subr.bf16.mxu0 %v7320_v24  ;;  %5923 = vmatprep.subr.bf16.mxu1 %v7373_v7 }
 0x242   :  { %v1116_v17 = vadd.f32 %v1114_v45, %v736_v8  ;;  %v1194_v45 = vpop.permute.xlu1 %1193 }
 0x243   :  { %v6671_v40 = vpop.eup %6670  ;;  %5897 = vmatpush1.bf16.msra.mxu0 %v7352_v46  ;;  %5925 = vmatpush3.bf16.msra.mxu1 %v7373_v7 }
 0x244   :  { %v1115_v12 = vmul.f32 %v6671_v40, %v1041_v19  ;;  %6676 = vtanh.f32 %v1116_v17  ;;  %5899 = vmatprep.subr.bf16.mxu0 %v7357_v47  ;;  %5927 = vmatprep.subr.bf16.mxu1 %v7410_v63  ;;  %v6673_v44 = vpop.eup %6672 }
 0x245   :  { %v6675_v54 = vpop.eup %6674  ;;  %v1120_v26 = vsub.f32 1.0, %v6673_v44  ;;  %v1124_v55 = vmul.f32 %v6673_v44, %v7733_v1  ;;  %v8800_v44 = vld [vmem:[#allocation10_spill] sm:$0xff] }
 0x246   :  { %v1117_v35 = vadd.f32 %v1115_v12, %v739_v50  ;;  %v1121_v28 = vsub.f32 1.0, %v6675_v54  ;;  %v1125_v2 = vmul.f32 %v6675_v54, %v7739_v25  ;;  %v1197_v50 = vmul.f32 %v1194_v45, %v7739_v25  ;;  %v8798_v12 = vld [vmem:[#allocation5_spill] sm:$0xff]  ;;  %v8801_v54 = vld [vmem:[#allocation7_spill] sm:$0xff] }
 0x247   :  { %5901 = vmatpush1.bf16.msra.mxu0 %v7390_v30  ;;  %5929 = vmatpush3.bf16.msra.mxu1 %v7410_v63  ;;  %v4426_v45 = vld [vmem:[%s8622_s0 + $0x3c] sm:$0xff] }
 0x248   :  { %6678 = vtanh.f32 %v1117_v35  ;;  %5903 = vmatprep.subr.bf16.mxu0 %v8779_v3  ;;  %5931 = vmatprep.subr.bf16.mxu1 %v7446_v59  ;;  %v8799_v35 = vld [vmem:[#allocation6_spill] sm:$0xff] }
 0x24b   :  { %5905 = vmatpush1.bf16.msra.mxu0 %v8780_v16  ;;  %5933 = vmatpush3.bf16.msra.mxu1 %v7446_v59 }
 0x24c   :  { %5907 = vmatprep.subr.bf16.mxu0 %v8781_v11  ;;  %5935 = vmatprep.subr.bf16.mxu1 %v7476_v13 }
 0x24e   :  { %v6677_v48 = vpop.eup %6676 }
 0x24f   :  { %v1122_v23 = vmul.f32 %v6677_v48, %v1120_v26  ;;  %5909 = vmatpush1.bf16.msra.mxu0 %v7462_v57  ;;  %5937 = vmatpush3.bf16.msra.mxu1 %v7476_v13  ;;  %v8802_v26 = vld [vmem:[#allocation8_spill] sm:$0xff]  ;;  %v8803_v48 = vld [vmem:[#allocation13_spill] sm:$0xff] }
 0x250   :  { %5911 = vmatprep.subr.bf16.mxu0 %v8782_v56  ;;  %5939 = vmatprep.subr.bf16.mxu1 %v7498_v60 }
 0x251   :  { %v1126_v20 = vadd.f32 %v1124_v55, %v1122_v23  ;;  %v8804_v55 = vld [vmem:[#allocation9_spill] sm:$0xff]  ;;  %v8805_v23 = vld [vmem:[#allocation11_spill] sm:$0xff] }
 0x252   :  { %v6679_v18 = vpop.eup %6678 }
 0x253   :  { %5913 = vmatpush1.bf16.msra.mxu0 %v7492_v42  ;;  %5941 = vmatpush3.bf16.msra.mxu1 %v7498_v60  ;;  %v1182_v43 = vmul.f32 %v1175_v51, %v1126_v20  ;;  %v1123_v8 = vmul.f32 %v6679_v18, %v1121_v28  ;;  %v8808_v28 = vld [vmem:[#allocation14_spill] sm:$0xff]  ;;  %v8809_v20 = vld [vmem:[#allocation19_spill] sm:$0xff] }
 0x254   :  { %5943 = vmatprep.subr.bf16.mxu1 %v7518_v27  ;;  %5947 = vmatprep.subr.bf16.mxu0 %v6972_v5  ;;  %v8810_v18 = vld [vmem:[#allocation15_spill] sm:$0xff] }
 0x255   :  { %v7867_v22 = vadd.f32 %v1196_v53, %v1182_v43  ;;  %v1127_v32 = vadd.f32 %v1125_v2, %v1123_v8  ;;  %v8811_v53 = vld [vmem:[#allocation17_spill] sm:$0xff]  ;;  %v8812_v2 = vld [vmem:[#allocation20_spill] sm:$0xff]  ;;  %v8813_v43 = vld [vmem:[#allocation18_spill] sm:$0xff] }
 0x256   :  { %v4424_v8 = vld [vmem:[%s8622_s0 + $0x30] sm:$0xff] }
 0x257   :  { %1465 = vmatmul.mubr.f32.vlgmr.msra.gmra.mrb[20].mxu0 %v7867_v22  ;;  %5209 = vmatprep.mubr.f32.mxu1 %v7867_v22  ;;  %v1183_v1 = vmul.f32 %v1180_v61, %v1127_v32  ;;  %v1213_v17 = vmul.f32 %v7867_v22, %v1175_v51  ;;  %v8806_v51 = vld [vmem:[#allocation16_spill] sm:$0xff]  ;;  %v1231_v32 = vunpack.c.l.bf16 %v4424_v8 }
 0x258   :  { %5945 = vmatpush3.bf16.msra.mxu1 %v7518_v27  ;;  %1470 = vmatprep.mubr.f32.mxu0 %v8757_v39 }
 0x259   :  { %v7874_v19 = vadd.f32 %v1197_v50, %v1183_v1  ;;  %5949 = vmatpush1.bf16.msra.mxu0 %v6984_v9  ;;  %5979 = vmatprep.subr.bf16.mxu1 %v7043_v29  ;;  %v8814_v1 = vld [vmem:[#allocation25_spill] sm:$0xff] }
 0x25a   :  { %5951 = vmatprep.subr.bf16.mxu0 %v6986_v10 }
 0x25b   :  { %v1214_v40 = vmul.f32 %v7874_v19, %v1180_v61  ;;  %1471 = vmatmul.mubr.f32.gmra.mrb[22].mxu0 %v7874_v19  ;;  %5210 = vmatmul.mubr.f32.vlgmr.msra.gmra.mrb[10].mxu1 %v7874_v19 }
 0x25c   :  { %5981 = vmatpush3.bf16.msra.mxu1 %v7043_v29  ;;  %1820 = vmatprep.mubr.f32.mxu0 %v8757_v39 }
 0x25d   :  { %v4638_v25 = vpack.c.bf16 %v1214_v40, %v1213_v17  ;;  %5953 = vmatpush1.bf16.msra.mxu0 %v7002_v15  ;;  %5983 = vmatprep.subr.bf16.mxu1 %v7058_v34  ;;  %v1232_v40 = vunpack.c.h.bf16 %v4424_v8 }
 0x25e   :  { %5955 = vmatprep.subr.bf16.mxu0 %v8783_v33 }
 0x25f   :  { %4702 = vst [vmem:[%s8625_s6 + $0x30] sm:$0xff] %v4638_v25   ;;  %v8815_v25 = vld [vmem:[#allocation26_spill] sm:$0xff] }
 0x260   :  { %5985 = vmatpush3.bf16.msra.mxu1 %v7058_v34 }
 0x261   :  { %5957 = vmatpush1.bf16.msra.mxu0 %v7020_v21  ;;  %5987 = vmatprep.subr.bf16.mxu1 %v7080_v41 }
 0x262   :  { %5959 = vmatprep.subr.bf16.mxu0 %v8798_v12  ;;  %v1669_v12 = vpop.permute.xlu1 %1668 }
 0x264   :  { %5989 = vmatpush3.bf16.msra.mxu1 %v7080_v41 }
 0x265   :  { %5961 = vmatpush1.bf16.msra.mxu0 %v8799_v35  ;;  %5991 = vmatprep.subr.bf16.mxu1 %v8800_v44 }
 0x266   :  { %5963 = vmatprep.subr.bf16.mxu0 %v8801_v54 }
 0x268   :  { %5993 = vmatpush3.bf16.msra.mxu1 %v8800_v44 }
 0x269   :  { %5965 = vmatpush1.bf16.msra.mxu0 %v8802_v26  ;;  %5995 = vmatprep.subr.bf16.mxu1 %v8803_v48 }
 0x26a   :  { %5967 = vmatprep.subr.bf16.mxu0 %v8804_v55 }
 0x26c   :  { %5997 = vmatpush3.bf16.msra.mxu1 %v8803_v48 }
 0x26d   :  { %5969 = vmatpush1.bf16.msra.mxu0 %v8805_v23  ;;  %5999 = vmatprep.subr.bf16.mxu1 %v8806_v51 }
 0x26e   :  { %5971 = vmatprep.subr.bf16.mxu0 %v8807_v49 }
 0x270   :  { %6001 = vmatpush3.bf16.msra.mxu1 %v8806_v51  ;;  %v1235_v51 = vunpack.c.h.bf16 %v4426_v45 }
 0x271   :  { %5973 = vmatpush1.bf16.msra.mxu0 %v8808_v28  ;;  %6003 = vmatprep.subr.bf16.mxu1 %v8809_v20 }
 0x272   :  { %5975 = vmatprep.subr.bf16.mxu0 %v8810_v18 }
 0x274   :  { %6005 = vmatpush3.bf16.msra.mxu1 %v8809_v20 }
 0x275   :  { %5977 = vmatpush1.bf16.msra.mxu0 %v8811_v53  ;;  %6007 = vmatprep.subr.bf16.mxu1 %v8812_v2 }
 0x276   :  { %6011 = vmatprep.subr.bf16.mxu0 %v8813_v43 }
 0x278   :  { %6009 = vmatpush3.bf16.msra.mxu1 %v8812_v2  ;;  %v1234_v2 = vunpack.c.l.bf16 %v4426_v45 }
 0x279   :  { %6043 = vmatprep.subr.bf16.mxu1 %v7296_v6 }
 0x309   :  { %v1314_v61 = vpop.f32.mrb[16].mxu0 }
 0x30a   :  { %v1315_v50 = vadd.f32 %v1314_v61, %v8814_v1  ;;  %v1316_v17 = vpop.f32.mrb[17].mxu0 }
 0x30b   :  { %v1317_v43 = vadd.f32 %v1316_v17, %v8815_v25 }
 0x30c   :  { %v1552_v53 = vadd.f32 %v1315_v50, %v1231_v32 }
 0x30d   :  { %v1320_v18 = vpop.f32.mrb[18].mxu0  ;;  %v5176_v20 = vpop.f32.mrb[8].mxu1  ;;  %v1566_v48 = vadd.f32 %v1317_v43, %v1232_v40 }
 0x30e   :  { %v4432_v28 = vmul.f32 -1.442695, %v1552_v53  ;;  %v1321_v49 = vadd.f32 %v1320_v18, %v8814_v1  ;;  %v1322_v23 = vpop.f32.mrb[19].mxu0  ;;  %v1391_v55 = vpop.f32.mrb[9].mxu1 }
 0x30f   :  { %v1323_v26 = vadd.f32 %v1322_v23, %v8815_v25  ;;  %v4434_v8 = vmul.f32 -1.442695, %v1566_v48  ;;  %v4427_v23 = vld [vmem:[%s8622_s0 + $0x38] ss:$12 sps:$4 sm:$0xff]  }
 0x310   :  { %6680 = vpow2.f32 %v4432_v28  ;;  %v1553_v54 = vadd.f32 %v1321_v49, %v1234_v2 }
 0x311   :  { %v1567_v44 = vadd.f32 %v1323_v26, %v1235_v51  ;;  %v8816_v26 = vld [vmem:[#allocation27_spill] sm:$0xff] }
 0x312   :  { %v4433_v61 = vmul.f32 -1.442695, %v1553_v54  ;;  %v1233_v54 = vunpack.c.l.bf16 %v4427_v23  ;;  %v1392_v48 = vadd.f32 %v1391_v55, %v8816_v26  ;;  %v8817_v55 = vld [vmem:[#allocation28_spill] sm:$0xff] }
 0x313   :  { %v4435_v17 = vmul.f32 -1.442695, %v1567_v44  ;;  %v4428_v44 = vld [vmem:[%s8623_s1 + $0x78] sm:$0xff] }
 0x314   :  { %6682 = vpow2.f32 %v4433_v61  ;;  %v1242_v40 = vunpack.c.l.bf16 %v4428_v44  ;;  %v1236_v61 = vunpack.c.h.bf16 %v4427_v23 }
 0x315   :  { %6684 = vpow2.f32 %v4434_v8  ;;  %v1397_v8 = vadd.f32 %v5176_v20, %v8816_v26 }
 0x316   :  { %6686 = vpow2.f32 %v4435_v17 }
 0x31a   :  { %v6681_v32 = vpop.eup %6680 }
 0x31b   :  { %v1560_v50 = vadd.f32 1.0, %v6681_v32 }
 0x31d   :  { %6688 = vrcp.f32 %v1560_v50  ;;  %v4430_v50 = vld [vmem:[%s8623_s1 + $0x84] sm:$0xff] }
 0x31e   :  { %v6683_v53 = vpop.eup %6682  ;;  %v1245_v23 = vunpack.c.l.bf16 %v4430_v50  ;;  %v1246_v1 = vunpack.c.h.bf16 %v4430_v50 }
 0x31f   :  { %v1561_v18 = vadd.f32 1.0, %v6683_v53  ;;  %v6685_v45 = vpop.eup %6684 }
 0x320   :  { %v6687_v28 = vpop.eup %6686  ;;  %v1574_v49 = vadd.f32 1.0, %v6685_v45 }
 0x321   :  { %6690 = vrcp.f32 %v1561_v18  ;;  %v1575_v2 = vadd.f32 1.0, %v6687_v28  ;;  %v1243_v28 = vunpack.c.h.bf16 %v4428_v44 }
 0x322   :  { %6692 = vrcp.f32 %v1574_v49 }
 0x323   :  { %6694 = vrcp.f32 %v1575_v2 }
 0x327   :  { %v6689_v51 = vpop.eup %6688 }
 0x328   :  { %v1580_v43 = vmul.f32 %v6689_v51, %v1392_v48 }
 0x32a   :  { %v1582_v17 = vadd.f32 %v1580_v43, %v1233_v54  ;;  %v1466_v32 = vpop.f32.mrb[20].mxu0 }
 0x32b   :  { %v6691_v53 = vpop.eup %6690  ;;  %v1467_v18 = vadd.f32 %v1466_v32, %v8817_v55  ;;  %v1468_v45 = vpop.f32.mrb[21].mxu0 }
 0x32c   :  { %v1581_v25 = vmul.f32 %v6691_v53, %v1397_v8  ;;  %6696 = vtanh.f32 %v1582_v17  ;;  %v1469_v49 = vadd.f32 %v1468_v45, %v8797_v0  ;;  %v6693_v17 = vpop.eup %6692 }
 0x32d   :  { %v1594_v48 = vadd.f32 %v1467_v18, %v1242_v40 }
 0x32e   :  { %v1583_v51 = vadd.f32 %v1581_v25, %v1236_v61  ;;  %v1472_v20 = vpop.f32.mrb[22].mxu0  ;;  %v7940_v54 = vpop.f32.mrb[10].mxu1  ;;  %v1608_v32 = vadd.f32 %v1469_v49, %v1243_v28  ;;  %v1586_v61 = vsub.f32 1.0, %v6693_v17 }
 0x32f   :  { %v4436_v43 = vmul.f32 -1.442695, %v1594_v48  ;;  %v1473_v26 = vadd.f32 %v1472_v20, %v8817_v55  ;;  %v1474_v35 = vpop.f32.mrb[23].mxu0  ;;  %v1543_v2 = vpop.f32.mrb[11].mxu1  ;;  %v1590_v48 = vmul.f32 %v6693_v17, %v7812_v38 }
 0x330   :  { %6698 = vtanh.f32 %v1583_v51  ;;  %v1475_v8 = vadd.f32 %v1474_v35, %v8797_v0  ;;  %v4438_v18 = vmul.f32 -1.442695, %v1608_v32  ;;  %v6695_v25 = vpop.eup %6694  ;;  %v1655_v55 = vpop.permute.xlu0 %1654 }
 0x331   :  { %6700 = vpow2.f32 %v4436_v43  ;;  %v1595_v44 = vadd.f32 %v1473_v26, %v1245_v23  ;;  %v1587_v28 = vsub.f32 1.0, %v6695_v25  ;;  %v1676_v26 = vmul.f32 %v1669_v12, %v7812_v38 }
 0x332   :  { %v1609_v40 = vadd.f32 %v1475_v8, %v1246_v1  ;;  %v1591_v1 = vmul.f32 %v6695_v25, %v7819_v4 }
 0x333   :  { %v4437_v53 = vmul.f32 -1.442695, %v1595_v44 }
 0x334   :  { %v4439_v50 = vmul.f32 -1.442695, %v1609_v40  ;;  %v1660_v17 = vpop.permute.xlu0 %1659 }
 0x335   :  { %6702 = vpow2.f32 %v4437_v53  ;;  %v1674_v53 = vpop.permute.xlu1 %1673 }
 0x336   :  { %v6697_v45 = vpop.eup %6696  ;;  %6704 = vpow2.f32 %v4438_v18  ;;  %v1677_v38 = vmul.f32 %v1674_v53, %v7819_v4  ;;  %v4431_v4 = vld [vmem:[%s8623_s1 + $0x80] ss:$12 sps:$4 sm:$0xff]  }
 0x337   :  { %v1588_v20 = vmul.f32 %v6697_v45, %v1586_v61  ;;  %6706 = vpow2.f32 %v4439_v50 }
 0x339   :  { %v1592_v49 = vadd.f32 %v1590_v48, %v1588_v20 }
 0x33a   :  { %v6699_v35 = vpop.eup %6698 }
 0x33b   :  { %v6701_v23 = vpop.eup %6700  ;;  %v1662_v51 = vmul.f32 %v1655_v55, %v1592_v49  ;;  %v1589_v43 = vmul.f32 %v6699_v35, %v1587_v28  ;;  %v1544_v49 = vadd.f32 %v1543_v2, %v7683_v62  ;;  %v1549_v2 = vadd.f32 %v7940_v54, %v7683_v62 }
 0x33c   :  { %v1602_v32 = vadd.f32 1.0, %v6701_v23 }
 0x33d   :  { %v7947_v8 = vadd.f32 %v1676_v26, %v1662_v51  ;;  %v1593_v44 = vadd.f32 %v1591_v1, %v1589_v43  ;;  %v1247_v1 = vunpack.c.h.bf16 %v4431_v4 }
 0x33e   :  { %6708 = vrcp.f32 %v1602_v32 }
 0x33f   :  { %v6703_v40 = vpop.eup %6702  ;;  %1821 = vmatmul.mubr.f32.vlgmr.msra.gmra.mrb[24].mxu0 %v7947_v8  ;;  %5244 = vmatprep.mubr.f32.mxu1 %v7947_v8  ;;  %v1663_v18 = vmul.f32 %v1660_v17, %v1593_v44  ;;  %v1708_v45 = vmul.f32 %v7947_v8, %v1655_v55  ;;  %v1244_v55 = vunpack.c.l.bf16 %v4431_v4 }
 0x340   :  { %v1603_v12 = vadd.f32 1.0, %v6703_v40  ;;  %6013 = vmatpush1.bf16.msra.mxu0 %v7234_v36  ;;  %1826 = vmatprep.mubr.f32.mxu0 %v8757_v39  ;;  %v6705_v61 = vpop.eup %6704 }
 0x341   :  { %v7954_v25 = vadd.f32 %v1677_v38, %v1663_v18  ;;  %6015 = vmatprep.subr.bf16.mxu0 %v7240_v37  ;;  %v6707_v20 = vpop.eup %6706  ;;  %v1616_v50 = vadd.f32 1.0, %v6705_v61  ;;  %v1697_v61 = vpop.permute.xlu1 %1696 }
 0x342   :  { %6710 = vrcp.f32 %v1603_v12  ;;  %v1617_v26 = vadd.f32 1.0, %v6707_v20  ;;  %v1683_v12 = vpop.permute.xlu0 %1682  ;;  %v1704_v20 = vmul.f32 %v1697_v61, %v7867_v22  ;;  %v8827_v61 = vld [vmem:[#allocation12_spill] sm:$0xff] }
 0x343   :  { %v1709_v48 = vmul.f32 %v7954_v25, %v1660_v17  ;;  %1827 = vmatmul.mubr.f32.gmra.mrb[26].mxu0 %v7954_v25  ;;  %5245 = vmatmul.mubr.f32.vlgmr.msra.gmra.mrb[12].mxu1 %v7954_v25  ;;  %6712 = vrcp.f32 %v1616_v50 }
 0x344   :  { %6017 = vmatpush1.bf16.msra.mxu0 %v7272_v52  ;;  %6045 = vmatpush3.bf16.msra.mxu1 %v7296_v6  ;;  %6714 = vrcp.f32 %v1617_v26 }
 0x345   :  { %v4643_v28 = vpack.c.bf16 %v1709_v48, %v1708_v45  ;;  %6019 = vmatprep.subr.bf16.mxu0 %v7280_v58  ;;  %6047 = vmatprep.subr.bf16.mxu1 %v7336_v31 }
 0x346   :  { %1972 = vmatprep.mubr.f32.mxu0 %v8757_v39  ;;  %v1688_v26 = vpop.permute.xlu0 %1687 }
 0x347   :  { %4703 = vst [vmem:[%s8624_s5 + $0x10] sm:$0xff] %v4643_v28  }
 0x348   :  { %v6709_v35 = vpop.eup %6708  ;;  %6021 = vmatpush1.bf16.msra.mxu0 %v7315_v14  ;;  %6049 = vmatpush3.bf16.msra.mxu1 %v7336_v31 }
 0x349   :  { %v1622_v23 = vmul.f32 %v6709_v35, %v1544_v49  ;;  %6023 = vmatprep.subr.bf16.mxu0 %v7320_v24  ;;  %6051 = vmatprep.subr.bf16.mxu1 %v7373_v7 }
 0x34b   :  { %v1624_v51 = vadd.f32 %v1622_v23, %v1244_v55  ;;  %v1702_v23 = vpop.permute.xlu1 %1701 }
 0x34c   :  { %v6711_v43 = vpop.eup %6710  ;;  %6025 = vmatpush1.bf16.msra.mxu0 %v7352_v46  ;;  %6053 = vmatpush3.bf16.msra.mxu1 %v7373_v7 }
 0x34d   :  { %v1623_v32 = vmul.f32 %v6711_v43, %v1549_v2  ;;  %6716 = vtanh.f32 %v1624_v51  ;;  %6027 = vmatprep.subr.bf16.mxu0 %v7357_v47  ;;  %6055 = vmatprep.subr.bf16.mxu1 %v7410_v63  ;;  %v6713_v54 = vpop.eup %6712 }
 0x34e   :  { %v6715_v17 = vpop.eup %6714  ;;  %v1628_v53 = vsub.f32 1.0, %v6713_v54  ;;  %v1632_v18 = vmul.f32 %v6713_v54, %v7867_v22  ;;  %v8820_v54 = vld [vmem:[#allocation10_spill] sm:$0xff] }
 0x34f   :  { %v1625_v44 = vadd.f32 %v1623_v32, %v1247_v1  ;;  %v1629_v45 = vsub.f32 1.0, %v6715_v17  ;;  %v1633_v50 = vmul.f32 %v6715_v17, %v7874_v19  ;;  %v1705_v1 = vmul.f32 %v1702_v23, %v7874_v19  ;;  %v8818_v32 = vld [vmem:[#allocation5_spill] sm:$0xff]  ;;  %v8821_v17 = vld [vmem:[#allocation7_spill] sm:$0xff] }
 0x350   :  { %6029 = vmatpush1.bf16.msra.mxu0 %v7390_v30  ;;  %6057 = vmatpush3.bf16.msra.mxu1 %v7410_v63  ;;  %v4454_v23 = vld [vmem:[%s8622_s0 + $0x54] sm:$0xff] }
 0x351   :  { %6718 = vtanh.f32 %v1625_v44  ;;  %6031 = vmatprep.subr.bf16.mxu0 %v8779_v3  ;;  %6059 = vmatprep.subr.bf16.mxu1 %v7446_v59  ;;  %v8819_v44 = vld [vmem:[#allocation6_spill] sm:$0xff] }
 0x354   :  { %6033 = vmatpush1.bf16.msra.mxu0 %v8780_v16  ;;  %6061 = vmatpush3.bf16.msra.mxu1 %v7446_v59 }
 0x355   :  { %6035 = vmatprep.subr.bf16.mxu0 %v8781_v11  ;;  %6063 = vmatprep.subr.bf16.mxu1 %v7476_v13 }
 0x357   :  { %v6717_v40 = vpop.eup %6716 }
 0x358   :  { %v1630_v38 = vmul.f32 %v6717_v40, %v1628_v53  ;;  %6037 = vmatpush1.bf16.msra.mxu0 %v7462_v57  ;;  %6065 = vmatpush3.bf16.msra.mxu1 %v7476_v13  ;;  %v8822_v53 = vld [vmem:[#allocation8_spill] sm:$0xff]  ;;  %v8823_v40 = vld [vmem:[#allocation13_spill] sm:$0xff] }
 0x359   :  { %6039 = vmatprep.subr.bf16.mxu0 %v8782_v56  ;;  %6067 = vmatprep.subr.bf16.mxu1 %v7498_v60 }
 0x35a   :  { %v1634_v48 = vadd.f32 %v1632_v18, %v1630_v38  ;;  %v8824_v18 = vld [vmem:[#allocation9_spill] sm:$0xff]  ;;  %v8825_v38 = vld [vmem:[#allocation11_spill] sm:$0xff] }
 0x35b   :  { %v6719_v4 = vpop.eup %6718 }
 0x35c   :  { %6041 = vmatpush1.bf16.msra.mxu0 %v7492_v42  ;;  %6069 = vmatpush3.bf16.msra.mxu1 %v7498_v60  ;;  %v1690_v28 = vmul.f32 %v1683_v12, %v1634_v48  ;;  %v1631_v55 = vmul.f32 %v6719_v4, %v1629_v45  ;;  %v8828_v45 = vld [vmem:[#allocation14_spill] sm:$0xff]  ;;  %v8829_v48 = vld [vmem:[#allocation19_spill] sm:$0xff] }
 0x35d   :  { %6071 = vmatprep.subr.bf16.mxu1 %v7518_v27  ;;  %6075 = vmatprep.subr.bf16.mxu0 %v6972_v5  ;;  %v8830_v4 = vld [vmem:[#allocation15_spill] sm:$0xff] }
 0x35e   :  { %v8002_v49 = vadd.f32 %v1704_v20, %v1690_v28  ;;  %v1635_v35 = vadd.f32 %v1633_v50, %v1631_v55  ;;  %v8831_v20 = vld [vmem:[#allocation17_spill] sm:$0xff]  ;;  %v8832_v50 = vld [vmem:[#allocation20_spill] sm:$0xff]  ;;  %v8833_v28 = vld [vmem:[#allocation18_spill] sm:$0xff] }
 0x35f   :  { %v4452_v55 = vld [vmem:[%s8622_s0 + $0x48] sm:$0xff] }
 0x360   :  { %1973 = vmatmul.mubr.f32.vlgmr.msra.gmra.mrb[28].mxu0 %v8002_v49  ;;  %5279 = vmatprep.mubr.f32.mxu1 %v8002_v49  ;;  %v1691_v22 = vmul.f32 %v1688_v26, %v1635_v35  ;;  %v1721_v51 = vmul.f32 %v8002_v49, %v1683_v12  ;;  %v8826_v12 = vld [vmem:[#allocation16_spill] sm:$0xff]  ;;  %v1739_v35 = vunpack.c.l.bf16 %v4452_v55 }
 0x361   :  { %6073 = vmatpush3.bf16.msra.mxu1 %v7518_v27  ;;  %1978 = vmatprep.mubr.f32.mxu0 %v8757_v39 }
 0x362   :  { %v8009_v2 = vadd.f32 %v1705_v1, %v1691_v22  ;;  %6077 = vmatpush1.bf16.msra.mxu0 %v6984_v9  ;;  %6107 = vmatprep.subr.bf16.mxu1 %v7043_v29  ;;  %v8834_v22 = vld [vmem:[#allocation25_spill] sm:$0xff] }
 0x363   :  { %6079 = vmatprep.subr.bf16.mxu0 %v6986_v10 }
 0x364   :  { %v1722_v43 = vmul.f32 %v8009_v2, %v1688_v26  ;;  %1979 = vmatmul.mubr.f32.gmra.mrb[30].mxu0 %v8009_v2  ;;  %5280 = vmatmul.mubr.f32.vlgmr.msra.gmra.mrb[14].mxu1 %v8009_v2 }
 0x365   :  { %6109 = vmatpush3.bf16.msra.mxu1 %v7043_v29  ;;  %2328 = vmatprep.mubr.f32.mxu0 %v8757_v39 }
 0x366   :  { %v4648_v19 = vpack.c.bf16 %v1722_v43, %v1721_v51  ;;  %6081 = vmatpush1.bf16.msra.mxu0 %v7002_v15  ;;  %6111 = vmatprep.subr.bf16.mxu1 %v7058_v34  ;;  %v1740_v43 = vunpack.c.h.bf16 %v4452_v55 }
 0x367   :  { %6083 = vmatprep.subr.bf16.mxu0 %v8783_v33 }
 0x368   :  { %4704 = vst [vmem:[%s8625_s6 + $0x28] sm:$0xff] %v4648_v19   ;;  %v8835_v19 = vld [vmem:[#allocation26_spill] sm:$0xff] }
 0x369   :  { %6113 = vmatpush3.bf16.msra.mxu1 %v7058_v34 }
 0x36a   :  { %6085 = vmatpush1.bf16.msra.mxu0 %v7020_v21  ;;  %6115 = vmatprep.subr.bf16.mxu1 %v7080_v41 }
 0x36b   :  { %6087 = vmatprep.subr.bf16.mxu0 %v8818_v32  ;;  %v2177_v32 = vpop.permute.xlu1 %2176 }
 0x36d   :  { %6117 = vmatpush3.bf16.msra.mxu1 %v7080_v41 }
 0x36e   :  { %6089 = vmatpush1.bf16.msra.mxu0 %v8819_v44  ;;  %6119 = vmatprep.subr.bf16.mxu1 %v8820_v54 }
 0x36f   :  { %6091 = vmatprep.subr.bf16.mxu0 %v8821_v17 }
 0x371   :  { %6121 = vmatpush3.bf16.msra.mxu1 %v8820_v54 }
 0x372   :  { %6093 = vmatpush1.bf16.msra.mxu0 %v8822_v53  ;;  %6123 = vmatprep.subr.bf16.mxu1 %v8823_v40 }
 0x373   :  { %6095 = vmatprep.subr.bf16.mxu0 %v8824_v18 }
 0x375   :  { %6125 = vmatpush3.bf16.msra.mxu1 %v8823_v40 }
 0x376   :  { %6097 = vmatpush1.bf16.msra.mxu0 %v8825_v38  ;;  %6127 = vmatprep.subr.bf16.mxu1 %v8826_v12 }
 0x377   :  { %6099 = vmatprep.subr.bf16.mxu0 %v8827_v61 }
 0x379   :  { %6129 = vmatpush3.bf16.msra.mxu1 %v8826_v12  ;;  %v1743_v12 = vunpack.c.h.bf16 %v4454_v23 }
 0x37a   :  { %6101 = vmatpush1.bf16.msra.mxu0 %v8828_v45  ;;  %6131 = vmatprep.subr.bf16.mxu1 %v8829_v48 }
 0x37b   :  { %6103 = vmatprep.subr.bf16.mxu0 %v8830_v4 }
 0x37d   :  { %6133 = vmatpush3.bf16.msra.mxu1 %v8829_v48 }
 0x37e   :  { %6105 = vmatpush1.bf16.msra.mxu0 %v8831_v20  ;;  %6135 = vmatprep.subr.bf16.mxu1 %v8832_v50 }
 0x37f   :  { %6139 = vmatprep.subr.bf16.mxu0 %v8833_v28 }
 0x381   :  { %6137 = vmatpush3.bf16.msra.mxu1 %v8832_v50  ;;  %v1742_v50 = vunpack.c.l.bf16 %v4454_v23 }
 0x382   :  { %6171 = vmatprep.subr.bf16.mxu1 %v7296_v6 }
 0x412   :  { %v1822_v26 = vpop.f32.mrb[24].mxu0 }
 0x413   :  { %v1823_v1 = vadd.f32 %v1822_v26, %v8834_v22  ;;  %v1824_v51 = vpop.f32.mrb[25].mxu0 }
 0x414   :  { %v1825_v28 = vadd.f32 %v1824_v51, %v8835_v19 }
 0x415   :  { %v2060_v20 = vadd.f32 %v1823_v1, %v1739_v35 }
 0x416   :  { %v1828_v4 = vpop.f32.mrb[26].mxu0  ;;  %v5246_v48 = vpop.f32.mrb[12].mxu1  ;;  %v2074_v40 = vadd.f32 %v1825_v28, %v1740_v43 }
 0x417   :  { %v4460_v45 = vmul.f32 -1.442695, %v2060_v20  ;;  %v1829_v61 = vadd.f32 %v1828_v4, %v8834_v22  ;;  %v1830_v38 = vpop.f32.mrb[27].mxu0  ;;  %v1899_v18 = vpop.f32.mrb[13].mxu1 }
 0x418   :  { %v1831_v53 = vadd.f32 %v1830_v38, %v8835_v19  ;;  %v4462_v55 = vmul.f32 -1.442695, %v2074_v40  ;;  %v4455_v38 = vld [vmem:[%s8622_s0 + $0x50] ss:$12 sps:$4 sm:$0xff]  }
 0x419   :  { %6720 = vpow2.f32 %v4460_v45  ;;  %v2061_v17 = vadd.f32 %v1829_v61, %v1742_v50 }
 0x41a   :  { %v2075_v54 = vadd.f32 %v1831_v53, %v1743_v12  ;;  %v8836_v53 = vld [vmem:[#allocation27_spill] sm:$0xff] }
 0x41b   :  { %v4461_v26 = vmul.f32 -1.442695, %v2061_v17  ;;  %v1741_v17 = vunpack.c.l.bf16 %v4455_v38  ;;  %v1900_v40 = vadd.f32 %v1899_v18, %v8836_v53  ;;  %v8837_v18 = vld [vmem:[#allocation28_spill] sm:$0xff] }
 0x41c   :  { %v4463_v51 = vmul.f32 -1.442695, %v2075_v54  ;;  %v4456_v54 = vld [vmem:[%s8623_s1 + $0x60] sm:$0xff] }
 0x41d   :  { %6722 = vpow2.f32 %v4461_v26  ;;  %v1750_v43 = vunpack.c.l.bf16 %v4456_v54  ;;  %v1744_v26 = vunpack.c.h.bf16 %v4455_v38 }
 0x41e   :  { %6724 = vpow2.f32 %v4462_v55  ;;  %v1905_v55 = vadd.f32 %v5246_v48, %v8836_v53 }
 0x41f   :  { %6726 = vpow2.f32 %v4463_v51 }
 0x423   :  { %v6721_v35 = vpop.eup %6720 }
 0x424   :  { %v2068_v1 = vadd.f32 1.0, %v6721_v35 }
 0x426   :  { %6728 = vrcp.f32 %v2068_v1  ;;  %v4458_v1 = vld [vmem:[%s8623_s1 + $0x6c] sm:$0xff] }
 0x427   :  { %v6723_v20 = vpop.eup %6722  ;;  %v1753_v38 = vunpack.c.l.bf16 %v4458_v1  ;;  %v1754_v22 = vunpack.c.h.bf16 %v4458_v1 }
 0x428   :  { %v2069_v4 = vadd.f32 1.0, %v6723_v20  ;;  %v6725_v23 = vpop.eup %6724 }
 0x429   :  { %v6727_v45 = vpop.eup %6726  ;;  %v2082_v61 = vadd.f32 1.0, %v6725_v23 }
 0x42a   :  { %6730 = vrcp.f32 %v2069_v4  ;;  %v2083_v50 = vadd.f32 1.0, %v6727_v45  ;;  %v1751_v45 = vunpack.c.h.bf16 %v4456_v54 }
 0x42b   :  { %6732 = vrcp.f32 %v2082_v61 }
 0x42c   :  { %6734 = vrcp.f32 %v2083_v50 }
 0x430   :  { %v6729_v12 = vpop.eup %6728 }
 0x431   :  { %v2088_v28 = vmul.f32 %v6729_v12, %v1900_v40 }
 0x433   :  { %v2090_v51 = vadd.f32 %v2088_v28, %v1741_v17  ;;  %v1974_v35 = vpop.f32.mrb[28].mxu0 }
 0x434   :  { %v6731_v20 = vpop.eup %6730  ;;  %v1975_v4 = vadd.f32 %v1974_v35, %v8837_v18  ;;  %v1976_v23 = vpop.f32.mrb[29].mxu0 }
 0x435   :  { %v2089_v19 = vmul.f32 %v6731_v20, %v1905_v55  ;;  %6736 = vtanh.f32 %v2090_v51  ;;  %v1977_v61 = vadd.f32 %v1976_v23, %v8797_v0  ;;  %v6733_v51 = vpop.eup %6732 }
 0x436   :  { %v2102_v40 = vadd.f32 %v1975_v4, %v1750_v43 }
 0x437   :  { %v2091_v12 = vadd.f32 %v2089_v19, %v1744_v26  ;;  %v1980_v48 = vpop.f32.mrb[30].mxu0  ;;  %v8075_v17 = vpop.f32.mrb[14].mxu1  ;;  %v2116_v35 = vadd.f32 %v1977_v61, %v1751_v45  ;;  %v2094_v26 = vsub.f32 1.0, %v6733_v51 }
 0x438   :  { %v4464_v28 = vmul.f32 -1.442695, %v2102_v40  ;;  %v1981_v53 = vadd.f32 %v1980_v48, %v8837_v18  ;;  %v1982_v44 = vpop.f32.mrb[31].mxu0  ;;  %v2051_v50 = vpop.f32.mrb[15].mxu1  ;;  %v2098_v40 = vmul.f32 %v6733_v51, %v7947_v8 }
 0x439   :  { %6738 = vtanh.f32 %v2091_v12  ;;  %v1983_v55 = vadd.f32 %v1982_v44, %v8797_v0  ;;  %v4466_v4 = vmul.f32 -1.442695, %v2116_v35  ;;  %v6735_v19 = vpop.eup %6734  ;;  %v2163_v18 = vpop.permute.xlu0 %2162 }
 0x43a   :  { %6740 = vpow2.f32 %v4464_v28  ;;  %v2103_v54 = vadd.f32 %v1981_v53, %v1753_v38  ;;  %v2095_v45 = vsub.f32 1.0, %v6735_v19  ;;  %v2184_v53 = vmul.f32 %v2177_v32, %v7947_v8 }
 0x43b   :  { %v2117_v43 = vadd.f32 %v1983_v55, %v1754_v22  ;;  %v2099_v22 = vmul.f32 %v6735_v19, %v7954_v25 }
 0x43c   :  { %v4465_v20 = vmul.f32 -1.442695, %v2103_v54 }
 0x43d   :  { %v4467_v1 = vmul.f32 -1.442695, %v2117_v43  ;;  %v2168_v51 = vpop.permute.xlu0 %2167 }
 0x43e   :  { %6742 = vpow2.f32 %v4465_v20  ;;  %v2182_v20 = vpop.permute.xlu1 %2181 }
 0x43f   :  { %v6737_v23 = vpop.eup %6736  ;;  %6744 = vpow2.f32 %v4466_v4  ;;  %v2185_v8 = vmul.f32 %v2182_v20, %v7954_v25  ;;  %v4459_v25 = vld [vmem:[%s8623_s1 + $0x68] ss:$12 sps:$4 sm:$0xff]  }
 0x440   :  { %v2096_v48 = vmul.f32 %v6737_v23, %v2094_v26  ;;  %6746 = vpow2.f32 %v4467_v1 }
 0x442   :  { %v2100_v61 = vadd.f32 %v2098_v40, %v2096_v48 }
 0x443   :  { %v6739_v44 = vpop.eup %6738 }
 0x444   :  { %v6741_v38 = vpop.eup %6740  ;;  %v2170_v12 = vmul.f32 %v2163_v18, %v2100_v61  ;;  %v2097_v28 = vmul.f32 %v6739_v44, %v2095_v45  ;;  %v2052_v61 = vadd.f32 %v2051_v50, %v7683_v62  ;;  %v2057_v50 = vadd.f32 %v8075_v17, %v7683_v62 }
 0x445   :  { %v2110_v35 = vadd.f32 1.0, %v6741_v38 }
 0x446   :  { %v8082_v55 = vadd.f32 %v2184_v53, %v2170_v12  ;;  %v2101_v54 = vadd.f32 %v2099_v22, %v2097_v28  ;;  %v1755_v22 = vunpack.c.h.bf16 %v4459_v25 }
 0x447   :  { %6748 = vrcp.f32 %v2110_v35 }
 0x448   :  { %v6743_v43 = vpop.eup %6742  ;;  %2329 = vmatmul.mubr.f32.vlgmr.msra.gmra.mrb[32].mxu0 %v8082_v55  ;;  %5314 = vmatprep.mubr.f32.mxu1 %v8082_v55  ;;  %v2171_v4 = vmul.f32 %v2168_v51, %v2101_v54  ;;  %v2216_v23 = vmul.f32 %v8082_v55, %v2163_v18  ;;  %v1752_v18 = vunpack.c.l.bf16 %v4459_v25 }
 0x449   :  { %v2111_v32 = vadd.f32 1.0, %v6743_v43  ;;  %6141 = vmatpush1.bf16.msra.mxu0 %v7234_v36  ;;  %2334 = vmatprep.mubr.f32.mxu0 %v8757_v39  ;;  %v6745_v26 = vpop.eup %6744 }
 0x44a   :  { %v8089_v19 = vadd.f32 %v2185_v8, %v2171_v4  ;;  %6143 = vmatprep.subr.bf16.mxu0 %v7240_v37  ;;  %v6747_v48 = vpop.eup %6746  ;;  %v2124_v1 = vadd.f32 1.0, %v6745_v26  ;;  %v2205_v26 = vpop.permute.xlu1 %2204 }
 0x44b   :  { %6750 = vrcp.f32 %v2111_v32  ;;  %v2125_v53 = vadd.f32 1.0, %v6747_v48  ;;  %v2191_v32 = vpop.permute.xlu0 %2190  ;;  %v2212_v48 = vmul.f32 %v2205_v26, %v8002_v49  ;;  %v8847_v26 = vld [vmem:[#allocation12_spill] sm:$0xff] }
 0x44c   :  { %v2217_v40 = vmul.f32 %v8089_v19, %v2168_v51  ;;  %2335 = vmatmul.mubr.f32.gmra.mrb[34].mxu0 %v8089_v19  ;;  %5315 = vmatmul.mubr.f32.vlgmr.msra.gmra.mrb[16].mxu1 %v8089_v19  ;;  %6752 = vrcp.f32 %v2124_v1 }
 0x44d   :  { %6145 = vmatpush1.bf16.msra.mxu0 %v7272_v52  ;;  %6173 = vmatpush3.bf16.msra.mxu1 %v7296_v6  ;;  %6754 = vrcp.f32 %v2125_v53 }
 0x44e   :  { %v4653_v45 = vpack.c.bf16 %v2217_v40, %v2216_v23  ;;  %6147 = vmatprep.subr.bf16.mxu0 %v7280_v58  ;;  %6175 = vmatprep.subr.bf16.mxu1 %v7336_v31 }
 0x44f   :  { %2480 = vmatprep.mubr.f32.mxu0 %v8757_v39  ;;  %v2196_v53 = vpop.permute.xlu0 %2195 }
 0x450   :  { %4705 = vst [vmem:[%s8624_s5 + $0x18] sm:$0xff] %v4653_v45  }
 0x451   :  { %v6749_v44 = vpop.eup %6748  ;;  %6149 = vmatpush1.bf16.msra.mxu0 %v7315_v14  ;;  %6177 = vmatpush3.bf16.msra.mxu1 %v7336_v31 }
 0x452   :  { %v2130_v38 = vmul.f32 %v6749_v44, %v2052_v61  ;;  %6151 = vmatprep.subr.bf16.mxu0 %v7320_v24  ;;  %6179 = vmatprep.subr.bf16.mxu1 %v7373_v7 }
 0x454   :  { %v2132_v12 = vadd.f32 %v2130_v38, %v1752_v18  ;;  %v2210_v38 = vpop.permute.xlu1 %2209 }
 0x455   :  { %v6751_v28 = vpop.eup %6750  ;;  %6153 = vmatpush1.bf16.msra.mxu0 %v7352_v46  ;;  %6181 = vmatpush3.bf16.msra.mxu1 %v7373_v7 }
 0x456   :  { %v2131_v35 = vmul.f32 %v6751_v28, %v2057_v50  ;;  %6756 = vtanh.f32 %v2132_v12  ;;  %6155 = vmatprep.subr.bf16.mxu0 %v7357_v47  ;;  %6183 = vmatprep.subr.bf16.mxu1 %v7410_v63  ;;  %v6753_v17 = vpop.eup %6752 }
 0x457   :  { %v6755_v51 = vpop.eup %6754  ;;  %v2136_v20 = vsub.f32 1.0, %v6753_v17  ;;  %v2140_v4 = vmul.f32 %v6753_v17, %v8002_v49  ;;  %v8840_v17 = vld [vmem:[#allocation10_spill] sm:$0xff] }
 0x458   :  { %v2133_v54 = vadd.f32 %v2131_v35, %v1755_v22  ;;  %v2137_v23 = vsub.f32 1.0, %v6755_v51  ;;  %v2141_v1 = vmul.f32 %v6755_v51, %v8009_v2  ;;  %v2213_v22 = vmul.f32 %v2210_v38, %v8009_v2  ;;  %v8838_v35 = vld [vmem:[#allocation5_spill] sm:$0xff]  ;;  %v8841_v51 = vld [vmem:[#allocation7_spill] sm:$0xff] }
 0x459   :  { %6157 = vmatpush1.bf16.msra.mxu0 %v7390_v30  ;;  %6185 = vmatpush3.bf16.msra.mxu1 %v7410_v63  ;;  %v4482_v38 = vld [vmem:[%s8622_s0 + $0x6c] sm:$0xff] }
 0x45a   :  { %6758 = vtanh.f32 %v2133_v54  ;;  %6159 = vmatprep.subr.bf16.mxu0 %v8779_v3  ;;  %6187 = vmatprep.subr.bf16.mxu1 %v7446_v59  ;;  %v8839_v54 = vld [vmem:[#allocation6_spill] sm:$0xff] }
 0x45d   :  { %6161 = vmatpush1.bf16.msra.mxu0 %v8780_v16  ;;  %6189 = vmatpush3.bf16.msra.mxu1 %v7446_v59 }
 0x45e   :  { %6163 = vmatprep.subr.bf16.mxu0 %v8781_v11  ;;  %6191 = vmatprep.subr.bf16.mxu1 %v7476_v13 }
 0x460   :  { %v6757_v43 = vpop.eup %6756 }
 0x461   :  { %v2138_v8 = vmul.f32 %v6757_v43, %v2136_v20  ;;  %6165 = vmatpush1.bf16.msra.mxu0 %v7462_v57  ;;  %6193 = vmatpush3.bf16.msra.mxu1 %v7476_v13  ;;  %v8842_v20 = vld [vmem:[#allocation8_spill] sm:$0xff]  ;;  %v8843_v43 = vld [vmem:[#allocation13_spill] sm:$0xff] }
 0x462   :  { %6167 = vmatprep.subr.bf16.mxu0 %v8782_v56  ;;  %6195 = vmatprep.subr.bf16.mxu1 %v7498_v60 }
 0x463   :  { %v2142_v40 = vadd.f32 %v2140_v4, %v2138_v8  ;;  %v8844_v4 = vld [vmem:[#allocation9_spill] sm:$0xff]  ;;  %v8845_v8 = vld [vmem:[#allocation11_spill] sm:$0xff] }
 0x464   :  { %v6759_v25 = vpop.eup %6758 }
 0x465   :  { %6169 = vmatpush1.bf16.msra.mxu0 %v7492_v42  ;;  %6197 = vmatpush3.bf16.msra.mxu1 %v7498_v60  ;;  %v2198_v45 = vmul.f32 %v2191_v32, %v2142_v40  ;;  %v2139_v18 = vmul.f32 %v6759_v25, %v2137_v23  ;;  %v8848_v23 = vld [vmem:[#allocation14_spill] sm:$0xff]  ;;  %v8849_v40 = vld [vmem:[#allocation19_spill] sm:$0xff] }
 0x466   :  { %6199 = vmatprep.subr.bf16.mxu1 %v7518_v27  ;;  %6203 = vmatprep.subr.bf16.mxu0 %v6972_v5  ;;  %v8850_v25 = vld [vmem:[#allocation15_spill] sm:$0xff] }
 0x467   :  { %v8137_v61 = vadd.f32 %v2212_v48, %v2198_v45  ;;  %v2143_v44 = vadd.f32 %v2141_v1, %v2139_v18  ;;  %v8851_v48 = vld [vmem:[#allocation17_spill] sm:$0xff]  ;;  %v8852_v1 = vld [vmem:[#allocation20_spill] sm:$0xff]  ;;  %v8853_v45 = vld [vmem:[#allocation18_spill] sm:$0xff] }
 0x468   :  { %v4480_v18 = vld [vmem:[%s8622_s0 + $0x60] sm:$0xff] }
 0x469   :  { %2481 = vmatmul.mubr.f32.vlgmr.msra.gmra.mrb[36].mxu0 %v8137_v61  ;;  %5349 = vmatprep.mubr.f32.mxu1 %v8137_v61  ;;  %v2199_v49 = vmul.f32 %v2196_v53, %v2143_v44  ;;  %v2229_v12 = vmul.f32 %v8137_v61, %v2191_v32  ;;  %v8846_v32 = vld [vmem:[#allocation16_spill] sm:$0xff]  ;;  %v2247_v44 = vunpack.c.l.bf16 %v4480_v18 }
 0x46a   :  { %6201 = vmatpush3.bf16.msra.mxu1 %v7518_v27  ;;  %2486 = vmatprep.mubr.f32.mxu0 %v8757_v39 }
 0x46b   :  { %v8144_v50 = vadd.f32 %v2213_v22, %v2199_v49  ;;  %6205 = vmatpush1.bf16.msra.mxu0 %v6984_v9  ;;  %6235 = vmatprep.subr.bf16.mxu1 %v7043_v29  ;;  %v8854_v49 = vld [vmem:[#allocation25_spill] sm:$0xff] }
 0x46c   :  { %6207 = vmatprep.subr.bf16.mxu0 %v6986_v10 }
 0x46d   :  { %v2230_v28 = vmul.f32 %v8144_v50, %v2196_v53  ;;  %2487 = vmatmul.mubr.f32.gmra.mrb[38].mxu0 %v8144_v50  ;;  %5350 = vmatmul.mubr.f32.vlgmr.msra.gmra.mrb[18].mxu1 %v8144_v50 }
 0x46e   :  { %6237 = vmatpush3.bf16.msra.mxu1 %v7043_v29  ;;  %2836 = vmatprep.mubr.f32.mxu0 %v8757_v39 }
 0x46f   :  { %v4658_v2 = vpack.c.bf16 %v2230_v28, %v2229_v12  ;;  %6209 = vmatpush1.bf16.msra.mxu0 %v7002_v15  ;;  %6239 = vmatprep.subr.bf16.mxu1 %v7058_v34  ;;  %v2248_v28 = vunpack.c.h.bf16 %v4480_v18 }
 0x470   :  { %6211 = vmatprep.subr.bf16.mxu0 %v8783_v33 }
 0x471   :  { %4706 = vst [vmem:[%s8625_s6 + $0x20] sm:$0xff] %v4658_v2   ;;  %v8855_v2 = vld [vmem:[#allocation26_spill] sm:$0xff] }
 0x472   :  { %6241 = vmatpush3.bf16.msra.mxu1 %v7058_v34 }
 0x473   :  { %6213 = vmatpush1.bf16.msra.mxu0 %v7020_v21  ;;  %6243 = vmatprep.subr.bf16.mxu1 %v7080_v41 }
 0x474   :  { %6215 = vmatprep.subr.bf16.mxu0 %v8838_v35  ;;  %v2685_v35 = vpop.permute.xlu1 %2684 }
 0x476   :  { %6245 = vmatpush3.bf16.msra.mxu1 %v7080_v41 }
 0x477   :  { %6217 = vmatpush1.bf16.msra.mxu0 %v8839_v54  ;;  %6247 = vmatprep.subr.bf16.mxu1 %v8840_v17 }
 0x478   :  { %6219 = vmatprep.subr.bf16.mxu0 %v8841_v51 }
 0x47a   :  { %6249 = vmatpush3.bf16.msra.mxu1 %v8840_v17 }
 0x47b   :  { %6221 = vmatpush1.bf16.msra.mxu0 %v8842_v20  ;;  %6251 = vmatprep.subr.bf16.mxu1 %v8843_v43 }
 0x47c   :  { %6223 = vmatprep.subr.bf16.mxu0 %v8844_v4 }
 0x47e   :  { %6253 = vmatpush3.bf16.msra.mxu1 %v8843_v43 }
 0x47f   :  { %6225 = vmatpush1.bf16.msra.mxu0 %v8845_v8  ;;  %6255 = vmatprep.subr.bf16.mxu1 %v8846_v32 }
 0x480   :  { %6227 = vmatprep.subr.bf16.mxu0 %v8847_v26 }
 0x482   :  { %6257 = vmatpush3.bf16.msra.mxu1 %v8846_v32  ;;  %v2251_v32 = vunpack.c.h.bf16 %v4482_v38 }
 0x483   :  { %6229 = vmatpush1.bf16.msra.mxu0 %v8848_v23  ;;  %6259 = vmatprep.subr.bf16.mxu1 %v8849_v40 }
 0x484   :  { %6231 = vmatprep.subr.bf16.mxu0 %v8850_v25 }
 0x486   :  { %6261 = vmatpush3.bf16.msra.mxu1 %v8849_v40 }
 0x487   :  { %6233 = vmatpush1.bf16.msra.mxu0 %v8851_v48  ;;  %6263 = vmatprep.subr.bf16.mxu1 %v8852_v1 }
 0x488   :  { %6267 = vmatprep.subr.bf16.mxu0 %v8853_v45 }
 0x48a   :  { %6265 = vmatpush3.bf16.msra.mxu1 %v8852_v1  ;;  %v2250_v1 = vunpack.c.l.bf16 %v4482_v38 }
 0x48b   :  { %6299 = vmatprep.subr.bf16.mxu1 %v7296_v6 }
 0x51b   :  { %v2330_v53 = vpop.f32.mrb[32].mxu0 }
 0x51c   :  { %v2331_v22 = vadd.f32 %v2330_v53, %v8854_v49  ;;  %v2332_v12 = vpop.f32.mrb[33].mxu0 }
 0x51d   :  { %v2333_v45 = vadd.f32 %v2332_v12, %v8855_v2 }
 0x51e   :  { %v2568_v48 = vadd.f32 %v2331_v22, %v2247_v44 }
 0x51f   :  { %v2336_v25 = vpop.f32.mrb[34].mxu0  ;;  %v5316_v40 = vpop.f32.mrb[16].mxu1  ;;  %v2582_v43 = vadd.f32 %v2333_v45, %v2248_v28 }
 0x520   :  { %v4488_v23 = vmul.f32 -1.442695, %v2568_v48  ;;  %v2337_v26 = vadd.f32 %v2336_v25, %v8854_v49  ;;  %v2338_v8 = vpop.f32.mrb[35].mxu0  ;;  %v2407_v4 = vpop.f32.mrb[17].mxu1 }
 0x521   :  { %v2339_v20 = vadd.f32 %v2338_v8, %v8855_v2  ;;  %v4490_v18 = vmul.f32 -1.442695, %v2582_v43  ;;  %v4483_v8 = vld [vmem:[%s8622_s0 + $0x68] ss:$12 sps:$4 sm:$0xff]  }
 0x522   :  { %6760 = vpow2.f32 %v4488_v23  ;;  %v2569_v51 = vadd.f32 %v2337_v26, %v2250_v1 }
 0x523   :  { %v2583_v17 = vadd.f32 %v2339_v20, %v2251_v32  ;;  %v8856_v20 = vld [vmem:[#allocation27_spill] sm:$0xff] }
 0x524   :  { %v4489_v53 = vmul.f32 -1.442695, %v2569_v51  ;;  %v2249_v51 = vunpack.c.l.bf16 %v4483_v8  ;;  %v2408_v43 = vadd.f32 %v2407_v4, %v8856_v20  ;;  %v8857_v4 = vld [vmem:[#allocation28_spill] sm:$0xff] }
 0x525   :  { %v4491_v12 = vmul.f32 -1.442695, %v2583_v17  ;;  %v4484_v17 = vld [vmem:[%s8623_s1 + $0x48] sm:$0xff] }
 0x526   :  { %6762 = vpow2.f32 %v4489_v53  ;;  %v2258_v28 = vunpack.c.l.bf16 %v4484_v17  ;;  %v2252_v53 = vunpack.c.h.bf16 %v4483_v8 }
 0x527   :  { %6764 = vpow2.f32 %v4490_v18  ;;  %v2413_v18 = vadd.f32 %v5316_v40, %v8856_v20 }
 0x528   :  { %6766 = vpow2.f32 %v4491_v12 }
 0x52c   :  { %v6761_v44 = vpop.eup %6760 }
 0x52d   :  { %v2576_v22 = vadd.f32 1.0, %v6761_v44 }
 0x52f   :  { %6768 = vrcp.f32 %v2576_v22  ;;  %v4486_v22 = vld [vmem:[%s8623_s1 + $0x54] sm:$0xff] }
 0x530   :  { %v6763_v48 = vpop.eup %6762  ;;  %v2261_v8 = vunpack.c.l.bf16 %v4486_v22  ;;  %v2262_v49 = vunpack.c.h.bf16 %v4486_v22 }
 0x531   :  { %v2577_v25 = vadd.f32 1.0, %v6763_v48  ;;  %v6765_v38 = vpop.eup %6764 }
 0x532   :  { %v6767_v23 = vpop.eup %6766  ;;  %v2590_v26 = vadd.f32 1.0, %v6765_v38 }
 0x533   :  { %6770 = vrcp.f32 %v2577_v25  ;;  %v2591_v1 = vadd.f32 1.0, %v6767_v23  ;;  %v2259_v23 = vunpack.c.h.bf16 %v4484_v17 }
 0x534   :  { %6772 = vrcp.f32 %v2590_v26 }
 0x535   :  { %6774 = vrcp.f32 %v2591_v1 }
 0x539   :  { %v6769_v32 = vpop.eup %6768 }
 0x53a   :  { %v2596_v45 = vmul.f32 %v6769_v32, %v2408_v43 }
 0x53c   :  { %v2598_v12 = vadd.f32 %v2596_v45, %v2249_v51  ;;  %v2482_v44 = vpop.f32.mrb[36].mxu0 }
 0x53d   :  { %v6771_v48 = vpop.eup %6770  ;;  %v2483_v25 = vadd.f32 %v2482_v44, %v8857_v4  ;;  %v2484_v38 = vpop.f32.mrb[37].mxu0 }
 0x53e   :  { %v2597_v2 = vmul.f32 %v6771_v48, %v2413_v18  ;;  %6776 = vtanh.f32 %v2598_v12  ;;  %v2485_v26 = vadd.f32 %v2484_v38, %v8797_v0  ;;  %v6773_v12 = vpop.eup %6772 }
 0x53f   :  { %v2610_v43 = vadd.f32 %v2483_v25, %v2258_v28 }
 0x540   :  { %v2599_v32 = vadd.f32 %v2597_v2, %v2252_v53  ;;  %v2488_v40 = vpop.f32.mrb[38].mxu0  ;;  %v8210_v51 = vpop.f32.mrb[18].mxu1  ;;  %v2624_v44 = vadd.f32 %v2485_v26, %v2259_v23  ;;  %v2602_v53 = vsub.f32 1.0, %v6773_v12 }
 0x541   :  { %v4492_v45 = vmul.f32 -1.442695, %v2610_v43  ;;  %v2489_v20 = vadd.f32 %v2488_v40, %v8857_v4  ;;  %v2490_v54 = vpop.f32.mrb[39].mxu0  ;;  %v2559_v1 = vpop.f32.mrb[19].mxu1  ;;  %v2606_v43 = vmul.f32 %v6773_v12, %v8082_v55 }
 0x542   :  { %6778 = vtanh.f32 %v2599_v32  ;;  %v2491_v18 = vadd.f32 %v2490_v54, %v8797_v0  ;;  %v4494_v25 = vmul.f32 -1.442695, %v2624_v44  ;;  %v6775_v2 = vpop.eup %6774  ;;  %v2671_v4 = vpop.permute.xlu0 %2670 }
 0x543   :  { %6780 = vpow2.f32 %v4492_v45  ;;  %v2611_v17 = vadd.f32 %v2489_v20, %v2261_v8  ;;  %v2603_v23 = vsub.f32 1.0, %v6775_v2  ;;  %v2692_v20 = vmul.f32 %v2685_v35, %v8082_v55 }
 0x544   :  { %v2625_v28 = vadd.f32 %v2491_v18, %v2262_v49  ;;  %v2607_v49 = vmul.f32 %v6775_v2, %v8089_v19 }
 0x545   :  { %v4493_v48 = vmul.f32 -1.442695, %v2611_v17 }
 0x546   :  { %v4495_v22 = vmul.f32 -1.442695, %v2625_v28  ;;  %v2676_v12 = vpop.permute.xlu0 %2675 }
 0x547   :  { %6782 = vpow2.f32 %v4493_v48  ;;  %v2690_v48 = vpop.permute.xlu1 %2689 }
 0x548   :  { %v6777_v38 = vpop.eup %6776  ;;  %6784 = vpow2.f32 %v4494_v25  ;;  %v2693_v55 = vmul.f32 %v2690_v48, %v8089_v19  ;;  %v4487_v19 = vld [vmem:[%s8623_s1 + $0x50] ss:$12 sps:$4 sm:$0xff]  }
 0x549   :  { %v2604_v40 = vmul.f32 %v6777_v38, %v2602_v53  ;;  %6786 = vpow2.f32 %v4495_v22 }
 0x54b   :  { %v2608_v26 = vadd.f32 %v2606_v43, %v2604_v40 }
 0x54c   :  { %v6779_v54 = vpop.eup %6778 }
 0x54d   :  { %v6781_v8 = vpop.eup %6780  ;;  %v2678_v32 = vmul.f32 %v2671_v4, %v2608_v26  ;;  %v2605_v45 = vmul.f32 %v6779_v54, %v2603_v23  ;;  %v2560_v26 = vadd.f32 %v2559_v1, %v7683_v62  ;;  %v2565_v1 = vadd.f32 %v8210_v51, %v7683_v62 }
 0x54e   :  { %v2618_v44 = vadd.f32 1.0, %v6781_v8 }
 0x54f   :  { %v8217_v18 = vadd.f32 %v2692_v20, %v2678_v32  ;;  %v2609_v17 = vadd.f32 %v2607_v49, %v2605_v45  ;;  %v2263_v49 = vunpack.c.h.bf16 %v4487_v19 }
 0x550   :  { %6788 = vrcp.f32 %v2618_v44 }
 0x551   :  { %v6783_v28 = vpop.eup %6782  ;;  %2837 = vmatmul.mubr.f32.vlgmr.msra.gmra.mrb[40].mxu0 %v8217_v18  ;;  %5384 = vmatprep.mubr.f32.mxu1 %v8217_v18  ;;  %v2679_v25 = vmul.f32 %v2676_v12, %v2609_v17  ;;  %v2724_v38 = vmul.f32 %v8217_v18, %v2671_v4  ;;  %v2260_v4 = vunpack.c.l.bf16 %v4487_v19 }
 0x552   :  { %v2619_v35 = vadd.f32 1.0, %v6783_v28  ;;  %6269 = vmatpush1.bf16.msra.mxu0 %v7234_v36  ;;  %2842 = vmatprep.mubr.f32.mxu0 %v8757_v39  ;;  %v6785_v53 = vpop.eup %6784 }
 0x553   :  { %v8224_v2 = vadd.f32 %v2693_v55, %v2679_v25  ;;  %6271 = vmatprep.subr.bf16.mxu0 %v7240_v37  ;;  %v6787_v40 = vpop.eup %6786  ;;  %v2632_v22 = vadd.f32 1.0, %v6785_v53  ;;  %v2713_v53 = vpop.permute.xlu1 %2712 }
 0x554   :  { %6790 = vrcp.f32 %v2619_v35  ;;  %v2633_v20 = vadd.f32 1.0, %v6787_v40  ;;  %v2699_v35 = vpop.permute.xlu0 %2698  ;;  %v2720_v40 = vmul.f32 %v2713_v53, %v8137_v61  ;;  %v8867_v53 = vld [vmem:[#allocation12_spill] sm:$0xff] }
 0x555   :  { %v2725_v43 = vmul.f32 %v8224_v2, %v2676_v12  ;;  %2843 = vmatmul.mubr.f32.gmra.mrb[42].mxu0 %v8224_v2  ;;  %5385 = vmatmul.mubr.f32.vlgmr.msra.gmra.mrb[20].mxu1 %v8224_v2  ;;  %6792 = vrcp.f32 %v2632_v22 }
 0x556   :  { %6273 = vmatpush1.bf16.msra.mxu0 %v7272_v52  ;;  %6301 = vmatpush3.bf16.msra.mxu1 %v7296_v6  ;;  %6794 = vrcp.f32 %v2633_v20 }
 0x557   :  { %v4663_v23 = vpack.c.bf16 %v2725_v43, %v2724_v38  ;;  %6275 = vmatprep.subr.bf16.mxu0 %v7280_v58  ;;  %6303 = vmatprep.subr.bf16.mxu1 %v7336_v31 }
 0x558   :  { %2988 = vmatprep.mubr.f32.mxu0 %v8757_v39  ;;  %v2704_v20 = vpop.permute.xlu0 %2703 }
 0x559   :  { %4707 = vst [vmem:[%s8624_s5 + $0x20] sm:$0xff] %v4663_v23  }
 0x55a   :  { %v6789_v54 = vpop.eup %6788  ;;  %6277 = vmatpush1.bf16.msra.mxu0 %v7315_v14  ;;  %6305 = vmatpush3.bf16.msra.mxu1 %v7336_v31 }
 0x55b   :  { %v2638_v8 = vmul.f32 %v6789_v54, %v2560_v26  ;;  %6279 = vmatprep.subr.bf16.mxu0 %v7320_v24  ;;  %6307 = vmatprep.subr.bf16.mxu1 %v7373_v7 }
 0x55d   :  { %v2640_v32 = vadd.f32 %v2638_v8, %v2260_v4  ;;  %v2718_v8 = vpop.permute.xlu1 %2717 }
 0x55e   :  { %v6791_v45 = vpop.eup %6790  ;;  %6281 = vmatpush1.bf16.msra.mxu0 %v7352_v46  ;;  %6309 = vmatpush3.bf16.msra.mxu1 %v7373_v7 }
 0x55f   :  { %v2639_v44 = vmul.f32 %v6791_v45, %v2565_v1  ;;  %6796 = vtanh.f32 %v2640_v32  ;;  %6283 = vmatprep.subr.bf16.mxu0 %v7357_v47  ;;  %6311 = vmatprep.subr.bf16.mxu1 %v7410_v63  ;;  %v6793_v51 = vpop.eup %6792 }
 0x560   :  { %v6795_v12 = vpop.eup %6794  ;;  %v2644_v48 = vsub.f32 1.0, %v6793_v51  ;;  %v2648_v25 = vmul.f32 %v6793_v51, %v8137_v61  ;;  %v8860_v51 = vld [vmem:[#allocation10_spill] sm:$0xff] }
 0x561   :  { %v2641_v17 = vadd.f32 %v2639_v44, %v2263_v49  ;;  %v2645_v38 = vsub.f32 1.0, %v6795_v12  ;;  %v2649_v22 = vmul.f32 %v6795_v12, %v8144_v50  ;;  %v2721_v49 = vmul.f32 %v2718_v8, %v8144_v50  ;;  %v8858_v44 = vld [vmem:[#allocation5_spill] sm:$0xff]  ;;  %v8861_v12 = vld [vmem:[#allocation7_spill] sm:$0xff] }
 0x562   :  { %6285 = vmatpush1.bf16.msra.mxu0 %v7390_v30  ;;  %6313 = vmatpush3.bf16.msra.mxu1 %v7410_v63  ;;  %v4510_v8 = vld [vmem:[%s8622_s0 + $0x84] sm:$0xff] }
 0x563   :  { %6798 = vtanh.f32 %v2641_v17  ;;  %6287 = vmatprep.subr.bf16.mxu0 %v8779_v3  ;;  %6315 = vmatprep.subr.bf16.mxu1 %v7446_v59  ;;  %v8859_v17 = vld [vmem:[#allocation6_spill] sm:$0xff] }
 0x566   :  { %6289 = vmatpush1.bf16.msra.mxu0 %v8780_v16  ;;  %6317 = vmatpush3.bf16.msra.mxu1 %v7446_v59 }
 0x567   :  { %6291 = vmatprep.subr.bf16.mxu0 %v8781_v11  ;;  %6319 = vmatprep.subr.bf16.mxu1 %v7476_v13 }
 0x569   :  { %v6797_v28 = vpop.eup %6796 }
 0x56a   :  { %v2646_v55 = vmul.f32 %v6797_v28, %v2644_v48  ;;  %6293 = vmatpush1.bf16.msra.mxu0 %v7462_v57  ;;  %6321 = vmatpush3.bf16.msra.mxu1 %v7476_v13  ;;  %v8862_v48 = vld [vmem:[#allocation8_spill] sm:$0xff]  ;;  %v8863_v28 = vld [vmem:[#allocation13_spill] sm:$0xff] }
 0x56b   :  { %6295 = vmatprep.subr.bf16.mxu0 %v8782_v56  ;;  %6323 = vmatprep.subr.bf16.mxu1 %v7498_v60 }
 0x56c   :  { %v2650_v43 = vadd.f32 %v2648_v25, %v2646_v55  ;;  %v8864_v25 = vld [vmem:[#allocation9_spill] sm:$0xff]  ;;  %v8865_v55 = vld [vmem:[#allocation11_spill] sm:$0xff] }
 0x56d   :  { %v6799_v19 = vpop.eup %6798 }
 0x56e   :  { %6297 = vmatpush1.bf16.msra.mxu0 %v7492_v42  ;;  %6325 = vmatpush3.bf16.msra.mxu1 %v7498_v60  ;;  %v2706_v23 = vmul.f32 %v2699_v35, %v2650_v43  ;;  %v2647_v4 = vmul.f32 %v6799_v19, %v2645_v38  ;;  %v8868_v38 = vld [vmem:[#allocation14_spill] sm:$0xff]  ;;  %v8869_v43 = vld [vmem:[#allocation19_spill] sm:$0xff] }
 0x56f   :  { %6327 = vmatprep.subr.bf16.mxu1 %v7518_v27  ;;  %6331 = vmatprep.subr.bf16.mxu0 %v6972_v5  ;;  %v8870_v19 = vld [vmem:[#allocation15_spill] sm:$0xff] }
 0x570   :  { %v8272_v26 = vadd.f32 %v2720_v40, %v2706_v23  ;;  %v2651_v54 = vadd.f32 %v2649_v22, %v2647_v4  ;;  %v8871_v40 = vld [vmem:[#allocation17_spill] sm:$0xff]  ;;  %v8872_v22 = vld [vmem:[#allocation20_spill] sm:$0xff]  ;;  %v8873_v23 = vld [vmem:[#allocation18_spill] sm:$0xff] }
 0x571   :  { %v4508_v4 = vld [vmem:[%s8622_s0 + $0x78] sm:$0xff] }
 0x572   :  { %2989 = vmatmul.mubr.f32.vlgmr.msra.gmra.mrb[44].mxu0 %v8272_v26  ;;  %5419 = vmatprep.mubr.f32.mxu1 %v8272_v26  ;;  %v2707_v61 = vmul.f32 %v2704_v20, %v2651_v54  ;;  %v2737_v32 = vmul.f32 %v8272_v26, %v2699_v35  ;;  %v8866_v35 = vld [vmem:[#allocation16_spill] sm:$0xff]  ;;  %v2755_v54 = vunpack.c.l.bf16 %v4508_v4 }
 0x573   :  { %6329 = vmatpush3.bf16.msra.mxu1 %v7518_v27  ;;  %2994 = vmatprep.mubr.f32.mxu0 %v8757_v39 }
 0x574   :  { %v8279_v1 = vadd.f32 %v2721_v49, %v2707_v61  ;;  %6333 = vmatpush1.bf16.msra.mxu0 %v6984_v9  ;;  %6363 = vmatprep.subr.bf16.mxu1 %v7043_v29  ;;  %v8874_v61 = vld [vmem:[#allocation25_spill] sm:$0xff] }
 0x575   :  { %6335 = vmatprep.subr.bf16.mxu0 %v6986_v10 }
 0x576   :  { %v2738_v45 = vmul.f32 %v8279_v1, %v2704_v20  ;;  %2995 = vmatmul.mubr.f32.gmra.mrb[46].mxu0 %v8279_v1  ;;  %5420 = vmatmul.mubr.f32.vlgmr.msra.gmra.mrb[22].mxu1 %v8279_v1 }
 0x577   :  { %6365 = vmatpush3.bf16.msra.mxu1 %v7043_v29  ;;  %3344 = vmatprep.mubr.f32.mxu0 %v8757_v39 }
 0x578   :  { %v4668_v50 = vpack.c.bf16 %v2738_v45, %v2737_v32  ;;  %6337 = vmatpush1.bf16.msra.mxu0 %v7002_v15  ;;  %6367 = vmatprep.subr.bf16.mxu1 %v7058_v34  ;;  %v2756_v45 = vunpack.c.h.bf16 %v4508_v4 }
 0x579   :  { %6339 = vmatprep.subr.bf16.mxu0 %v8783_v33 }
 0x57a   :  { %4708 = vst [vmem:[%s8625_s6 + $0x18] sm:$0xff] %v4668_v50   ;;  %v8875_v50 = vld [vmem:[#allocation26_spill] sm:$0xff] }
 0x57b   :  { %6369 = vmatpush3.bf16.msra.mxu1 %v7058_v34 }
 0x57c   :  { %6341 = vmatpush1.bf16.msra.mxu0 %v7020_v21  ;;  %6371 = vmatprep.subr.bf16.mxu1 %v7080_v41 }
 0x57d   :  { %6343 = vmatprep.subr.bf16.mxu0 %v8858_v44  ;;  %v3193_v44 = vpop.permute.xlu1 %3192 }
 0x57f   :  { %6373 = vmatpush3.bf16.msra.mxu1 %v7080_v41 }
 0x580   :  { %6345 = vmatpush1.bf16.msra.mxu0 %v8859_v17  ;;  %6375 = vmatprep.subr.bf16.mxu1 %v8860_v51 }
 0x581   :  { %6347 = vmatprep.subr.bf16.mxu0 %v8861_v12 }
 0x583   :  { %6377 = vmatpush3.bf16.msra.mxu1 %v8860_v51 }
 0x584   :  { %6349 = vmatpush1.bf16.msra.mxu0 %v8862_v48  ;;  %6379 = vmatprep.subr.bf16.mxu1 %v8863_v28 }
 0x585   :  { %6351 = vmatprep.subr.bf16.mxu0 %v8864_v25 }
 0x587   :  { %6381 = vmatpush3.bf16.msra.mxu1 %v8863_v28 }
 0x588   :  { %6353 = vmatpush1.bf16.msra.mxu0 %v8865_v55  ;;  %6383 = vmatprep.subr.bf16.mxu1 %v8866_v35 }
 0x589   :  { %6355 = vmatprep.subr.bf16.mxu0 %v8867_v53 }
 0x58b   :  { %6385 = vmatpush3.bf16.msra.mxu1 %v8866_v35  ;;  %v2759_v35 = vunpack.c.h.bf16 %v4510_v8 }
 0x58c   :  { %6357 = vmatpush1.bf16.msra.mxu0 %v8868_v38  ;;  %6387 = vmatprep.subr.bf16.mxu1 %v8869_v43 }
 0x58d   :  { %6359 = vmatprep.subr.bf16.mxu0 %v8870_v19 }
 0x58f   :  { %6389 = vmatpush3.bf16.msra.mxu1 %v8869_v43 }
 0x590   :  { %6361 = vmatpush1.bf16.msra.mxu0 %v8871_v40  ;;  %6391 = vmatprep.subr.bf16.mxu1 %v8872_v22 }
 0x591   :  { %6395 = vmatprep.subr.bf16.mxu0 %v8873_v23 }
 0x593   :  { %6393 = vmatpush3.bf16.msra.mxu1 %v8872_v22  ;;  %v2758_v22 = vunpack.c.l.bf16 %v4510_v8 }
 0x594   :  { %6427 = vmatprep.subr.bf16.mxu1 %v7296_v6 }
 0x624   :  { %v2838_v20 = vpop.f32.mrb[40].mxu0 }
 0x625   :  { %v2839_v49 = vadd.f32 %v2838_v20, %v8874_v61  ;;  %v2840_v32 = vpop.f32.mrb[41].mxu0 }
 0x626   :  { %v2841_v23 = vadd.f32 %v2840_v32, %v8875_v50 }
 0x627   :  { %v3076_v40 = vadd.f32 %v2839_v49, %v2755_v54 }
 0x628   :  { %v2844_v19 = vpop.f32.mrb[42].mxu0  ;;  %v5386_v43 = vpop.f32.mrb[20].mxu1  ;;  %v3090_v28 = vadd.f32 %v2841_v23, %v2756_v45 }
 0x629   :  { %v4516_v38 = vmul.f32 -1.442695, %v3076_v40  ;;  %v2845_v53 = vadd.f32 %v2844_v19, %v8874_v61  ;;  %v2846_v55 = vpop.f32.mrb[43].mxu0  ;;  %v2915_v25 = vpop.f32.mrb[21].mxu1 }
 0x62a   :  { %v2847_v48 = vadd.f32 %v2846_v55, %v8875_v50  ;;  %v4518_v4 = vmul.f32 -1.442695, %v3090_v28  ;;  %v4511_v55 = vld [vmem:[%s8622_s0 + $0x80] ss:$12 sps:$4 sm:$0xff]  }
 0x62b   :  { %6800 = vpow2.f32 %v4516_v38  ;;  %v3077_v12 = vadd.f32 %v2845_v53, %v2758_v22 }
 0x62c   :  { %v3091_v51 = vadd.f32 %v2847_v48, %v2759_v35  ;;  %v8876_v48 = vld [vmem:[#allocation27_spill] sm:$0xff] }
 0x62d   :  { %v4517_v20 = vmul.f32 -1.442695, %v3077_v12  ;;  %v2757_v12 = vunpack.c.l.bf16 %v4511_v55  ;;  %v2916_v28 = vadd.f32 %v2915_v25, %v8876_v48  ;;  %v8877_v25 = vld [vmem:[#allocation28_spill] sm:$0xff] }
 0x62e   :  { %v4519_v32 = vmul.f32 -1.442695, %v3091_v51  ;;  %v4512_v51 = vld [vmem:[%s8623_s1 + $0x30] sm:$0xff] }
 0x62f   :  { %6802 = vpow2.f32 %v4517_v20  ;;  %v2766_v45 = vunpack.c.l.bf16 %v4512_v51  ;;  %v2760_v20 = vunpack.c.h.bf16 %v4511_v55 }
 0x630   :  { %6804 = vpow2.f32 %v4518_v4  ;;  %v2921_v4 = vadd.f32 %v5386_v43, %v8876_v48 }
 0x631   :  { %6806 = vpow2.f32 %v4519_v32 }
 0x635   :  { %v6801_v54 = vpop.eup %6800 }
 0x636   :  { %v3084_v49 = vadd.f32 1.0, %v6801_v54 }
 0x638   :  { %6808 = vrcp.f32 %v3084_v49  ;;  %v4514_v49 = vld [vmem:[%s8623_s1 + $0x3c] sm:$0xff] }
 0x639   :  { %v6803_v40 = vpop.eup %6802  ;;  %v2769_v55 = vunpack.c.l.bf16 %v4514_v49  ;;  %v2770_v61 = vunpack.c.h.bf16 %v4514_v49 }
 0x63a   :  { %v3085_v19 = vadd.f32 1.0, %v6803_v40  ;;  %v6805_v8 = vpop.eup %6804 }
 0x63b   :  { %v6807_v38 = vpop.eup %6806  ;;  %v3098_v53 = vadd.f32 1.0, %v6805_v8 }
 0x63c   :  { %6810 = vrcp.f32 %v3085_v19  ;;  %v3099_v22 = vadd.f32 1.0, %v6807_v38  ;;  %v2767_v38 = vunpack.c.h.bf16 %v4512_v51 }
 0x63d   :  { %6812 = vrcp.f32 %v3098_v53 }
 0x63e   :  { %6814 = vrcp.f32 %v3099_v22 }
 0x642   :  { %v6809_v35 = vpop.eup %6808 }
 0x643   :  { %v3104_v23 = vmul.f32 %v6809_v35, %v2916_v28 }
 0x645   :  { %v3106_v32 = vadd.f32 %v3104_v23, %v2757_v12  ;;  %v2990_v54 = vpop.f32.mrb[44].mxu0 }
 0x646   :  { %v6811_v40 = vpop.eup %6810  ;;  %v2991_v19 = vadd.f32 %v2990_v54, %v8877_v25  ;;  %v2992_v8 = vpop.f32.mrb[45].mxu0 }
 0x647   :  { %v3105_v50 = vmul.f32 %v6811_v40, %v2921_v4  ;;  %6816 = vtanh.f32 %v3106_v32  ;;  %v2993_v53 = vadd.f32 %v2992_v8, %v8797_v0  ;;  %v6813_v32 = vpop.eup %6812 }
 0x648   :  { %v3118_v28 = vadd.f32 %v2991_v19, %v2766_v45 }
 0x649   :  { %v3107_v35 = vadd.f32 %v3105_v50, %v2760_v20  ;;  %v2996_v43 = vpop.f32.mrb[46].mxu0  ;;  %v8345_v12 = vpop.f32.mrb[22].mxu1  ;;  %v3132_v54 = vadd.f32 %v2993_v53, %v2767_v38  ;;  %v3110_v20 = vsub.f32 1.0, %v6813_v32 }
 0x64a   :  { %v4520_v23 = vmul.f32 -1.442695, %v3118_v28  ;;  %v2997_v48 = vadd.f32 %v2996_v43, %v8877_v25  ;;  %v2998_v17 = vpop.f32.mrb[47].mxu0  ;;  %v3067_v22 = vpop.f32.mrb[23].mxu1  ;;  %v3114_v28 = vmul.f32 %v6813_v32, %v8217_v18 }
 0x64b   :  { %6818 = vtanh.f32 %v3107_v35  ;;  %v2999_v4 = vadd.f32 %v2998_v17, %v8797_v0  ;;  %v4522_v19 = vmul.f32 -1.442695, %v3132_v54  ;;  %v6815_v50 = vpop.eup %6814  ;;  %v3179_v25 = vpop.permute.xlu0 %3178 }
 0x64c   :  { %6820 = vpow2.f32 %v4520_v23  ;;  %v3119_v51 = vadd.f32 %v2997_v48, %v2769_v55  ;;  %v3111_v38 = vsub.f32 1.0, %v6815_v50  ;;  %v3200_v48 = vmul.f32 %v3193_v44, %v8217_v18 }
 0x64d   :  { %v3133_v45 = vadd.f32 %v2999_v4, %v2770_v61  ;;  %v3115_v61 = vmul.f32 %v6815_v50, %v8224_v2 }
 0x64e   :  { %v4521_v40 = vmul.f32 -1.442695, %v3119_v51 }
 0x64f   :  { %v4523_v49 = vmul.f32 -1.442695, %v3133_v45  ;;  %v3184_v32 = vpop.permute.xlu0 %3183 }
 0x650   :  { %6822 = vpow2.f32 %v4521_v40  ;;  %v3198_v40 = vpop.permute.xlu1 %3197 }
 0x651   :  { %v6817_v8 = vpop.eup %6816  ;;  %6824 = vpow2.f32 %v4522_v19  ;;  %v3201_v18 = vmul.f32 %v3198_v40, %v8224_v2  ;;  %v4515_v2 = vld [vmem:[%s8623_s1 + $0x38] ss:$12 sps:$4 sm:$0xff]  }
 0x652   :  { %v3112_v43 = vmul.f32 %v6817_v8, %v3110_v20  ;;  %6826 = vpow2.f32 %v4523_v49 }
 0x654   :  { %v3116_v53 = vadd.f32 %v3114_v28, %v3112_v43 }
 0x655   :  { %v6819_v17 = vpop.eup %6818 }
 0x656   :  { %v6821_v55 = vpop.eup %6820  ;;  %v3186_v35 = vmul.f32 %v3179_v25, %v3116_v53  ;;  %v3113_v23 = vmul.f32 %v6819_v17, %v3111_v38  ;;  %v3068_v53 = vadd.f32 %v3067_v22, %v7683_v62  ;;  %v3073_v22 = vadd.f32 %v8345_v12, %v7683_v62 }
 0x657   :  { %v3126_v54 = vadd.f32 1.0, %v6821_v55 }
 0x658   :  { %v8352_v4 = vadd.f32 %v3200_v48, %v3186_v35  ;;  %v3117_v51 = vadd.f32 %v3115_v61, %v3113_v23  ;;  %v2771_v61 = vunpack.c.h.bf16 %v4515_v2 }
 0x659   :  { %6828 = vrcp.f32 %v3126_v54 }
 0x65a   :  { %v6823_v45 = vpop.eup %6822  ;;  %3345 = vmatmul.mubr.f32.vlgmr.msra.gmra.mrb[48].mxu0 %v8352_v4  ;;  %5454 = vmatprep.mubr.f32.mxu1 %v8352_v4  ;;  %v3187_v19 = vmul.f32 %v3184_v32, %v3117_v51  ;;  %v3232_v8 = vmul.f32 %v8352_v4, %v3179_v25  ;;  %v2768_v25 = vunpack.c.l.bf16 %v4515_v2 }
 0x65b   :  { %v3127_v44 = vadd.f32 1.0, %v6823_v45  ;;  %6397 = vmatpush1.bf16.msra.mxu0 %v7234_v36  ;;  %3350 = vmatprep.mubr.f32.mxu0 %v8757_v39  ;;  %v6825_v20 = vpop.eup %6824 }
 0x65c   :  { %v8359_v50 = vadd.f32 %v3201_v18, %v3187_v19  ;;  %6399 = vmatprep.subr.bf16.mxu0 %v7240_v37  ;;  %v6827_v43 = vpop.eup %6826  ;;  %v3140_v49 = vadd.f32 1.0, %v6825_v20  ;;  %v3221_v20 = vpop.permute.xlu1 %3220 }
 0x65d   :  { %6830 = vrcp.f32 %v3127_v44  ;;  %v3141_v48 = vadd.f32 1.0, %v6827_v43  ;;  %v3207_v44 = vpop.permute.xlu0 %3206  ;;  %v3228_v43 = vmul.f32 %v3221_v20, %v8272_v26 }
 0x65e   :  { %v3233_v28 = vmul.f32 %v8359_v50, %v3184_v32  ;;  %3351 = vmatmul.mubr.f32.gmra.mrb[50].mxu0 %v8359_v50  ;;  %5455 = vmatmul.mubr.f32.vlgmr.msra.gmra.mrb[24].mxu1 %v8359_v50  ;;  %6832 = vrcp.f32 %v3140_v49 }
 0x65f   :  { %6401 = vmatpush1.bf16.msra.mxu0 %v7272_v52  ;;  %6429 = vmatpush3.bf16.msra.mxu1 %v7296_v6  ;;  %6834 = vrcp.f32 %v3141_v48 }
 0x660   :  { %v4673_v38 = vpack.c.bf16 %v3233_v28, %v3232_v8  ;;  %6403 = vmatprep.subr.bf16.mxu0 %v7280_v58  ;;  %6431 = vmatprep.subr.bf16.mxu1 %v7336_v31 }
 0x661   :  { %3496 = vmatprep.mubr.f32.mxu0 %v8757_v39  ;;  %v3212_v48 = vpop.permute.xlu0 %3211 }
 0x662   :  { %4709 = vst [vmem:[%s8624_s5 + $0x28] sm:$0xff] %v4673_v38  }
 0x663   :  { %v6829_v17 = vpop.eup %6828  ;;  %6405 = vmatpush1.bf16.msra.mxu0 %v7315_v14  ;;  %6433 = vmatpush3.bf16.msra.mxu1 %v7336_v31 }
 0x664   :  { %v3146_v55 = vmul.f32 %v6829_v17, %v3068_v53  ;;  %6407 = vmatprep.subr.bf16.mxu0 %v7320_v24  ;;  %6435 = vmatprep.subr.bf16.mxu1 %v7373_v7 }
 0x666   :  { %v3148_v35 = vadd.f32 %v3146_v55, %v2768_v25  ;;  %v3226_v55 = vpop.permute.xlu1 %3225 }
 0x667   :  { %v6831_v23 = vpop.eup %6830  ;;  %6409 = vmatpush1.bf16.msra.mxu0 %v7352_v46  ;;  %6437 = vmatpush3.bf16.msra.mxu1 %v7373_v7 }
 0x668   :  { %v3147_v54 = vmul.f32 %v6831_v23, %v3073_v22  ;;  %6836 = vtanh.f32 %v3148_v35  ;;  %6411 = vmatprep.subr.bf16.mxu0 %v7357_v47  ;;  %6439 = vmatprep.subr.bf16.mxu1 %v7410_v63  ;;  %v6833_v12 = vpop.eup %6832  ;;  %v8883_v23 = vld [vmem:[#allocation13_spill] sm:$0xff] }
 0x669   :  { %v6835_v32 = vpop.eup %6834  ;;  %v3152_v40 = vsub.f32 1.0, %v6833_v12  ;;  %v3156_v19 = vmul.f32 %v6833_v12, %v8272_v26  ;;  %v8889_v12 = vld [vmem:[#allocation19_spill] sm:$0xff] }
 0x66a   :  { %v3149_v51 = vadd.f32 %v3147_v54, %v2771_v61  ;;  %v3153_v8 = vsub.f32 1.0, %v6835_v32  ;;  %v3157_v49 = vmul.f32 %v6835_v32, %v8279_v1  ;;  %v3229_v61 = vmul.f32 %v3226_v55, %v8279_v1  ;;  %v8886_v54 = vld [vmem:[#allocation16_spill] sm:$0xff]  ;;  %v8890_v32 = vld [vmem:[#allocation15_spill] sm:$0xff] }
 0x66b   :  { %6413 = vmatpush1.bf16.msra.mxu0 %v7390_v30  ;;  %6441 = vmatpush3.bf16.msra.mxu1 %v7410_v63 }
 0x66c   :  { %6838 = vtanh.f32 %v3149_v51  ;;  %6415 = vmatprep.subr.bf16.mxu0 %v8779_v3  ;;  %6443 = vmatprep.subr.bf16.mxu1 %v7446_v59  ;;  %v8888_v51 = vld [vmem:[#allocation14_spill] sm:$0xff] }
 0x66f   :  { %6417 = vmatpush1.bf16.msra.mxu0 %v8780_v16  ;;  %6445 = vmatpush3.bf16.msra.mxu1 %v7446_v59 }
 0x670   :  { %6419 = vmatprep.subr.bf16.mxu0 %v8781_v11  ;;  %6447 = vmatprep.subr.bf16.mxu1 %v7476_v13 }
 0x672   :  { %v6837_v45 = vpop.eup %6836 }
 0x673   :  { %v3154_v18 = vmul.f32 %v6837_v45, %v3152_v40  ;;  %6421 = vmatpush1.bf16.msra.mxu0 %v7462_v57  ;;  %6449 = vmatpush3.bf16.msra.mxu1 %v7476_v13  ;;  %v8891_v40 = vld [vmem:[#allocation17_spill] sm:$0xff]  ;;  %v8892_v45 = vld [vmem:[#allocation20_spill] sm:$0xff] }
 0x674   :  { %6423 = vmatprep.subr.bf16.mxu0 %v8782_v56  ;;  %6451 = vmatprep.subr.bf16.mxu1 %v7498_v60 }
 0x675   :  { %v3158_v28 = vadd.f32 %v3156_v19, %v3154_v18  ;;  %v8893_v19 = vld [vmem:[#allocation18_spill] sm:$0xff] }
 0x676   :  { %v6839_v2 = vpop.eup %6838  ;;  %v4536_v18 = vld [vmem:[%s8622_s0 + $0x90] sm:$0xff] }
 0x677   :  { %6425 = vmatpush1.bf16.msra.mxu0 %v7492_v42  ;;  %6453 = vmatpush3.bf16.msra.mxu1 %v7498_v60  ;;  %v3214_v38 = vmul.f32 %v3207_v44, %v3158_v28  ;;  %v3155_v25 = vmul.f32 %v6839_v2, %v3153_v8  ;;  %v4538_v8 = vld [vmem:[%s8622_s0 + $0x9c] sm:$0xff]  ;;  %v8894_v28 = vld [vmem:[#allocation25_spill] sm:$0xff] }
 0x678   :  { %6455 = vmatprep.subr.bf16.mxu1 %v7518_v27  ;;  %6459 = vmatprep.subr.bf16.mxu0 %v6972_v5 }
 0x679   :  { %v8407_v53 = vadd.f32 %v3228_v43, %v3214_v38  ;;  %v3159_v17 = vadd.f32 %v3157_v49, %v3155_v25  ;;  %v3264_v49 = vunpack.c.h.bf16 %v4536_v18  ;;  %v8895_v38 = vld [vmem:[#allocation26_spill] sm:$0xff] }
 0x67b   :  { %3497 = vmatmul.mubr.f32.vlgmr.msra.gmra.mrb[52].mxu0 %v8407_v53  ;;  %5489 = vmatprep.mubr.f32.mxu1 %v8407_v53  ;;  %v3215_v26 = vmul.f32 %v3212_v48, %v3159_v17  ;;  %v3245_v5 = vmul.f32 %v8407_v53, %v3207_v44  ;;  %v3263_v44 = vunpack.c.l.bf16 %v4536_v18 }
 0x67c   :  { %6457 = vmatpush3.bf16.msra.mxu1 %v7518_v27  ;;  %3502 = vmatprep.mubr.f32.mxu0 %v8757_v39 }
 0x67d   :  { %v8414_v22 = vadd.f32 %v3229_v61, %v3215_v26  ;;  %6461 = vmatpush1.bf16.msra.mxu0 %v6984_v9  ;;  %6491 = vmatprep.subr.bf16.mxu1 %v7043_v29  ;;  %v8878_v9 = vld [vmem:[#allocation5_spill] sm:$0xff] }
 0x67e   :  { %6463 = vmatprep.subr.bf16.mxu0 %v6986_v10  ;;  %v8879_v10 = vld [vmem:[#allocation6_spill] sm:$0xff] }
 0x67f   :  { %v3246_v35 = vmul.f32 %v8414_v22, %v3212_v48  ;;  %3503 = vmatmul.mubr.f32.gmra.mrb[54].mxu0 %v8414_v22  ;;  %5490 = vmatmul.mubr.f32.vlgmr.msra.gmra.mrb[26].mxu1 %v8414_v22  ;;  %v3266_v48 = vunpack.c.l.bf16 %v4538_v8 }
 0x680   :  { %6493 = vmatpush3.bf16.msra.mxu1 %v7043_v29  ;;  %3851 = vmatprep.mubr.f32.mxu0 %v8757_v39  ;;  %v8881_v29 = vld [vmem:[#allocation7_spill] sm:$0xff] }
 0x681   :  { %v4678_v1 = vpack.c.bf16 %v3246_v35, %v3245_v5  ;;  %6465 = vmatpush1.bf16.msra.mxu0 %v7002_v15  ;;  %6495 = vmatprep.subr.bf16.mxu1 %v7058_v34  ;;  %v8880_v15 = vld [vmem:[#allocation10_spill] sm:$0xff]  ;;  %v3267_v35 = vunpack.c.h.bf16 %v4538_v8  ;;  %v4540_v8 = vld [vmem:[%s8623_s1 + $0x18] sm:$0xff] }
 0x682   :  { %6467 = vmatprep.subr.bf16.mxu0 %v8783_v33  ;;  %v8882_v33 = vld [vmem:[#allocation8_spill] sm:$0xff] }
 0x683   :  { %4710 = vst [vmem:[%s8625_s6 + $0x10] sm:$0xff] %v4678_v1  }
 0x684   :  { %6497 = vmatpush3.bf16.msra.mxu1 %v7058_v34  ;;  %v8884_v34 = vld [vmem:[#allocation9_spill] sm:$0xff] }
 0x685   :  { %6469 = vmatpush1.bf16.msra.mxu0 %v7020_v21  ;;  %6499 = vmatprep.subr.bf16.mxu1 %v7080_v41  ;;  %v8885_v21 = vld [vmem:[#allocation11_spill] sm:$0xff] }
 0x686   :  { %6471 = vmatprep.subr.bf16.mxu0 %v8878_v9 }
 0x688   :  { %6501 = vmatpush3.bf16.msra.mxu1 %v7080_v41  ;;  %v8887_v41 = vld [vmem:[#allocation12_spill] sm:$0xff] }
 0x689   :  { %6473 = vmatpush1.bf16.msra.mxu0 %v8879_v10  ;;  %6503 = vmatprep.subr.bf16.mxu1 %v8880_v15 }
 0x68a   :  { %6475 = vmatprep.subr.bf16.mxu0 %v8881_v29 }
 0x68c   :  { %6505 = vmatpush3.bf16.msra.mxu1 %v8880_v15 }
 0x68d   :  { %6477 = vmatpush1.bf16.msra.mxu0 %v8882_v33  ;;  %6507 = vmatprep.subr.bf16.mxu1 %v8883_v23 }
 0x68e   :  { %6479 = vmatprep.subr.bf16.mxu0 %v8884_v34 }
 0x690   :  { %6509 = vmatpush3.bf16.msra.mxu1 %v8883_v23 }
 0x691   :  { %6481 = vmatpush1.bf16.msra.mxu0 %v8885_v21  ;;  %6511 = vmatprep.subr.bf16.mxu1 %v8886_v54 }
 0x692   :  { %6483 = vmatprep.subr.bf16.mxu0 %v8887_v41 }
 0x694   :  { %6513 = vmatpush3.bf16.msra.mxu1 %v8886_v54 }
 0x695   :  { %6485 = vmatpush1.bf16.msra.mxu0 %v8888_v51  ;;  %6515 = vmatprep.subr.bf16.mxu1 %v8889_v12 }
 0x696   :  { %6487 = vmatprep.subr.bf16.mxu0 %v8890_v32 }
 0x698   :  { %6517 = vmatpush3.bf16.msra.mxu1 %v8889_v12 }
 0x699   :  { %6489 = vmatpush1.bf16.msra.mxu0 %v8891_v40  ;;  %6519 = vmatprep.subr.bf16.mxu1 %v8892_v45  ;;  %v4539_v40 = vld [vmem:[%s8622_s0 + $0x98] ss:$12 sps:$4 sm:$0xff]  }
 0x69a   :  { %6523 = vmatprep.subr.bf16.mxu0 %v8893_v19  ;;  %v3265_v18 = vunpack.c.l.bf16 %v4539_v40 }
 0x69c   :  { %6521 = vmatpush3.bf16.msra.mxu1 %v8892_v45 }
 0x69d   :  { %6555 = vmatprep.subr.bf16.mxu1 %v7296_v6 }
 0x72d   :  { %v3346_v20 = vpop.f32.mrb[48].mxu0 }
 0x72e   :  { %v3347_v2 = vadd.f32 %v3346_v20, %v8894_v28  ;;  %v3348_v43 = vpop.f32.mrb[49].mxu0 }
 0x72f   :  { %v3349_v25 = vadd.f32 %v3348_v43, %v8895_v38 }
 0x730   :  { %v3584_v17 = vadd.f32 %v3347_v2, %v3263_v44  ;;  %v8896_v44 = vld [vmem:[#allocation27_spill] sm:$0xff] }
 0x731   :  { %v3352_v55 = vpop.f32.mrb[50].mxu0  ;;  %v5456_v26 = vpop.f32.mrb[24].mxu1  ;;  %v3598_v10 = vadd.f32 %v3349_v25, %v3264_v49  ;;  %v3274_v25 = vunpack.c.l.bf16 %v4540_v8 }
 0x732   :  { %v4544_v61 = vmul.f32 -1.442695, %v3584_v17  ;;  %v3353_v5 = vadd.f32 %v3352_v55, %v8894_v28  ;;  %v3354_v1 = vpop.f32.mrb[51].mxu0  ;;  %v3423_v9 = vpop.f32.mrb[25].mxu1  ;;  %v3268_v17 = vunpack.c.h.bf16 %v4539_v40 }
 0x733   :  { %v3355_v15 = vadd.f32 %v3354_v1, %v8895_v38  ;;  %v4546_v34 = vmul.f32 -1.442695, %v3598_v10  ;;  %v3424_v20 = vadd.f32 %v3423_v9, %v8896_v44  ;;  %v8897_v1 = vld [vmem:[#allocation28_spill] sm:$0xff] }
 0x734   :  { %6840 = vpow2.f32 %v4544_v61  ;;  %v3585_v29 = vadd.f32 %v3353_v5, %v3266_v48  ;;  %v3429_v48 = vadd.f32 %v5456_v26, %v8896_v44  ;;  %v4542_v5 = vld [vmem:[%s8623_s1 + $0x24] sm:$0xff] }
 0x735   :  { %v3599_v23 = vadd.f32 %v3355_v15, %v3267_v35 }
 0x736   :  { %v4545_v33 = vmul.f32 -1.442695, %v3585_v29  ;;  %v3275_v29 = vunpack.c.h.bf16 %v4540_v8 }
 0x737   :  { %v4547_v21 = vmul.f32 -1.442695, %v3599_v23 }
 0x738   :  { %6842 = vpow2.f32 %v4545_v33 }
 0x739   :  { %6844 = vpow2.f32 %v4546_v34  ;;  %v3277_v34 = vunpack.c.l.bf16 %v4542_v5 }
 0x73a   :  { %6846 = vpow2.f32 %v4547_v21 }
 0x73e   :  { %v6841_v54 = vpop.eup %6840 }
 0x73f   :  { %v3592_v41 = vadd.f32 1.0, %v6841_v54 }
 0x741   :  { %6848 = vrcp.f32 %v3592_v41 }
 0x742   :  { %v6843_v51 = vpop.eup %6842 }
 0x743   :  { %v3593_v12 = vadd.f32 1.0, %v6843_v51  ;;  %v6845_v32 = vpop.eup %6844 }
 0x744   :  { %v6847_v45 = vpop.eup %6846  ;;  %v3606_v19 = vadd.f32 1.0, %v6845_v32 }
 0x745   :  { %6850 = vrcp.f32 %v3593_v12  ;;  %v3607_v43 = vadd.f32 1.0, %v6847_v45  ;;  %v3278_v12 = vunpack.c.h.bf16 %v4542_v5  ;;  %v3687_v5 = vpop.permute.xlu0 %3686 }
 0x746   :  { %6852 = vrcp.f32 %v3606_v19 }
 0x747   :  { %6854 = vrcp.f32 %v3607_v43 }
 0x74b   :  { %v6849_v2 = vpop.eup %6848 }
 0x74c   :  { %v3612_v49 = vmul.f32 %v6849_v2, %v3424_v20 }
 0x74e   :  { %v3614_v55 = vadd.f32 %v3612_v49, %v3265_v18  ;;  %v3498_v61 = vpop.f32.mrb[52].mxu0 }
 0x74f   :  { %v6851_v35 = vpop.eup %6850  ;;  %v3499_v9 = vadd.f32 %v3498_v61, %v8897_v1  ;;  %v3500_v10 = vpop.f32.mrb[53].mxu0 }
 0x750   :  { %v3613_v15 = vmul.f32 %v6851_v35, %v3429_v48  ;;  %6856 = vtanh.f32 %v3614_v55  ;;  %v3501_v33 = vadd.f32 %v3500_v10, %v8797_v0  ;;  %v6853_v20 = vpop.eup %6852  ;;  %v3701_v35 = vpop.permute.xlu1 %3700 }
 0x751   :  { %v3626_v23 = vadd.f32 %v3499_v9, %v3274_v25  ;;  %v6855_v49 = vpop.eup %6854  ;;  %v3618_v25 = vsub.f32 1.0, %v6853_v20  ;;  %v3622_v48 = vmul.f32 %v6853_v20, %v8352_v4 }
 0x752   :  { %v3615_v21 = vadd.f32 %v3613_v15, %v3268_v17  ;;  %v3504_v26 = vpop.f32.mrb[54].mxu0  ;;  %v8480_v54 = vpop.f32.mrb[26].mxu1  ;;  %v3640_v45 = vadd.f32 %v3501_v33, %v3275_v29  ;;  %v3619_v9 = vsub.f32 1.0, %v6855_v49  ;;  %v3708_v29 = vmul.f32 %v3701_v35, %v8352_v4 }
 0x753   :  { %v4548_v41 = vmul.f32 -1.442695, %v3626_v23  ;;  %v3505_v51 = vadd.f32 %v3504_v26, %v8897_v1  ;;  %v3506_v32 = vpop.f32.mrb[55].mxu0  ;;  %v3575_v40 = vpop.f32.mrb[27].mxu1  ;;  %v3623_v23 = vmul.f32 %v6855_v49, %v8359_v50 }
 0x754   :  { %6858 = vtanh.f32 %v3615_v21  ;;  %v3507_v19 = vadd.f32 %v3506_v32, %v8797_v0  ;;  %v4550_v43 = vmul.f32 -1.442695, %v3640_v45  ;;  %v3706_v32 = vpop.permute.xlu1 %3705 }
 0x755   :  { %6860 = vpow2.f32 %v4548_v41  ;;  %v3627_v18 = vadd.f32 %v3505_v51, %v3277_v34  ;;  %v3709_v4 = vmul.f32 %v3706_v32, %v8359_v50 }
 0x756   :  { %v3641_v2 = vadd.f32 %v3507_v19, %v3278_v12  ;;  %v3692_v12 = vpop.permute.xlu0 %3691 }
 0x757   :  { %v4549_v8 = vmul.f32 -1.442695, %v3627_v18 }
 0x758   :  { %v4551_v61 = vmul.f32 -1.442695, %v3641_v2 }
 0x759   :  { %6862 = vpow2.f32 %v4549_v8 }
 0x75a   :  { %v6857_v17 = vpop.eup %6856  ;;  %6864 = vpow2.f32 %v4550_v43 }
 0x75b   :  { %v3620_v55 = vmul.f32 %v6857_v17, %v3618_v25  ;;  %6866 = vpow2.f32 %v4551_v61  ;;  %v3576_v17 = vadd.f32 %v3575_v40, %v7683_v62  ;;  %v3581_v40 = vadd.f32 %v8480_v54, %v7683_v62  ;;  %v3729_v54 = vpop.permute.xlu1 %3728 }
 0x75d   :  { %v3624_v10 = vadd.f32 %v3622_v48, %v3620_v55 }
 0x75e   :  { %v6859_v15 = vpop.eup %6858 }
 0x75f   :  { %v6861_v33 = vpop.eup %6860  ;;  %v3694_v34 = vmul.f32 %v3687_v5, %v3624_v10  ;;  %v3621_v21 = vmul.f32 %v6859_v15, %v3619_v9  ;;  %v3734_v15 = vpop.permute.xlu1 %3733 }
 0x760   :  { %v3634_v26 = vadd.f32 1.0, %v6861_v33 }
 0x761   :  { %v8487_v41 = vadd.f32 %v3708_v29, %v3694_v34  ;;  %v3625_v51 = vadd.f32 %v3623_v23, %v3621_v21  ;;  %v3737_v29 = vmul.f32 %v3734_v15, %v8414_v22  ;;  %v4566_v34 = vld [vmem:[%s8622_s0 + $0xb4] sm:$0xff] }
 0x762   :  { %6868 = vrcp.f32 %v3634_v26 }
 0x763   :  { %v6863_v45 = vpop.eup %6862  ;;  %3852 = vmatmul.mubr.f32.vlgmr.msra.gmra.mrb[56].mxu0 %v8487_v41  ;;  %5524 = vmatprep.mubr.f32.mxu1 %v8487_v41  ;;  %v3695_v19 = vmul.f32 %v3692_v12, %v3625_v51  ;;  %v3740_v2 = vmul.f32 %v8487_v41, %v3687_v5  ;;  %v3736_v5 = vmul.f32 %v3729_v54, %v8407_v53 }
 0x764   :  { %v3635_v18 = vadd.f32 1.0, %v6863_v45  ;;  %6525 = vmatpush1.bf16.msra.mxu0 %v7234_v36  ;;  %3857 = vmatprep.mubr.f32.mxu0 %v8757_v39  ;;  %v6865_v8 = vpop.eup %6864  ;;  %v4543_v36 = vld [vmem:[%s8623_s1 + $0x20] ss:$12 sps:$4 sm:$0xff]   ;;  %v3774_v45 = vunpack.c.l.bf16 %v4566_v34 }
 0x765   :  { %v8494_v20 = vadd.f32 %v3709_v4, %v3695_v19  ;;  %6527 = vmatprep.subr.bf16.mxu0 %v7240_v37  ;;  %v6867_v50 = vpop.eup %6866  ;;  %v3648_v37 = vadd.f32 1.0, %v6865_v8  ;;  %v3276_v25 = vunpack.c.l.bf16 %v4543_v36 }
 0x766   :  { %6870 = vrcp.f32 %v3635_v18 }
 0x767   :  { %v3741_v43 = vmul.f32 %v8494_v20, %v3692_v12  ;;  %3858 = vmatmul.mubr.f32.gmra.mrb[58].mxu0 %v8494_v20  ;;  %5525 = vmatmul.mubr.f32.vlgmr.msra.gmra.mrb[28].mxu1 %v8494_v20  ;;  %6872 = vrcp.f32 %v3648_v37 }
 0x768   :  { %6529 = vmatpush1.bf16.msra.mxu0 %v7272_v52  ;;  %6557 = vmatpush3.bf16.msra.mxu1 %v7296_v6  ;;  %v3649_v52 = vadd.f32 1.0, %v6867_v50 }
 0x769   :  { %v4683_v49 = vpack.c.bf16 %v3741_v43, %v3740_v2  ;;  %6531 = vmatprep.subr.bf16.mxu0 %v7280_v58  ;;  %6559 = vmatprep.subr.bf16.mxu1 %v7336_v31  ;;  %v3279_v58 = vunpack.c.h.bf16 %v4543_v36  ;;  %v3775_v2 = vunpack.c.h.bf16 %v4566_v34 }
 0x76a   :  { %4003 = vmatprep.mubr.f32.mxu0 %v8757_v39  ;;  %6874 = vrcp.f32 %v3649_v52 }
 0x76b   :  { %4711 = vst [vmem:[%s8624_s5 + $0x30] sm:$0xff] %v4683_v49  }
 0x76c   :  { %v6869_v48 = vpop.eup %6868  ;;  %6533 = vmatpush1.bf16.msra.mxu0 %v7315_v14  ;;  %6561 = vmatpush3.bf16.msra.mxu1 %v7336_v31 }
 0x76d   :  { %v3654_v6 = vmul.f32 %v6869_v48, %v3576_v17  ;;  %6535 = vmatprep.subr.bf16.mxu0 %v7320_v24  ;;  %6563 = vmatprep.subr.bf16.mxu1 %v7373_v7 }
 0x76f   :  { %v3656_v55 = vadd.f32 %v3654_v6, %v3276_v25 }
 0x770   :  { %v6871_v61 = vpop.eup %6870  ;;  %6537 = vmatpush1.bf16.msra.mxu0 %v7352_v46  ;;  %6565 = vmatpush3.bf16.msra.mxu1 %v7373_v7 }
 0x771   :  { %v3655_v14 = vmul.f32 %v6871_v61, %v3581_v40  ;;  %6876 = vtanh.f32 %v3656_v55  ;;  %6539 = vmatprep.subr.bf16.mxu0 %v7357_v47  ;;  %6567 = vmatprep.subr.bf16.mxu1 %v7410_v63  ;;  %v6873_v31 = vpop.eup %6872 }
 0x772   :  { %v3660_v47 = vsub.f32 1.0, %v6873_v31 }
 0x773   :  { %v3657_v24 = vadd.f32 %v3655_v14, %v3279_v58 }
 0x774   :  { %6541 = vmatpush1.bf16.msra.mxu0 %v7390_v30  ;;  %6569 = vmatpush3.bf16.msra.mxu1 %v7410_v63  ;;  %v6875_v46 = vpop.eup %6874  ;;  %v3664_v30 = vmul.f32 %v6873_v31, %v8407_v53 }
 0x775   :  { %6878 = vtanh.f32 %v3657_v24  ;;  %6543 = vmatprep.subr.bf16.mxu0 %v8779_v3  ;;  %6571 = vmatprep.subr.bf16.mxu1 %v7446_v59  ;;  %v3715_v3 = vpop.permute.xlu0 %3714  ;;  %v3665_v35 = vmul.f32 %v6875_v46, %v8414_v22 }
 0x778   :  { %6545 = vmatpush1.bf16.msra.mxu0 %v8780_v16  ;;  %6573 = vmatpush3.bf16.msra.mxu1 %v7446_v59  ;;  %v3661_v59 = vsub.f32 1.0, %v6875_v46  ;;  %v3777_v46 = vld [vmem:[%s8623_s1] sm:$0xff] }
 0x779   :  { %6547 = vmatprep.subr.bf16.mxu0 %v8781_v11  ;;  %6575 = vmatprep.subr.bf16.mxu1 %v7476_v13  ;;  %v3720_v10 = vpop.permute.xlu0 %3719 }
 0x77b   :  { %v6877_v7 = vpop.eup %6876 }
 0x77c   :  { %v3662_v63 = vmul.f32 %v6877_v7, %v3660_v47  ;;  %6549 = vmatpush1.bf16.msra.mxu0 %v7462_v57  ;;  %6577 = vmatpush3.bf16.msra.mxu1 %v7476_v13  ;;  %v4567_v7 = vld [vmem:[%s8622_s0 + $0xbc] sm:$0xf] }
 0x77d   :  { %6551 = vmatprep.subr.bf16.mxu0 %v8782_v56  ;;  %6579 = vmatprep.subr.bf16.mxu1 %v7498_v60  ;;  %v3776_v54 = vunpack.c.l.bf16 %v4567_v7 }
 0x77e   :  { %v3666_v16 = vadd.f32 %v3664_v30, %v3662_v63 }
 0x77f   :  { %v6879_v11 = vpop.eup %6878 }
 0x780   :  { %6553 = vmatpush1.bf16.msra.mxu0 %v7492_v42  ;;  %6581 = vmatpush3.bf16.msra.mxu1 %v7498_v60  ;;  %v3722_v57 = vmul.f32 %v3715_v3, %v3666_v16  ;;  %v3663_v9 = vmul.f32 %v6879_v11, %v3661_v59 }
 0x781   :  { %6583 = vmatprep.subr.bf16.mxu1 %v7518_v27 }
 0x782   :  { %v8541_v13 = vadd.f32 %v3736_v5, %v3722_v57  ;;  %v3667_v56 = vadd.f32 %v3665_v35, %v3663_v9  ;;  %v3779_v5 = vld [vmem:[%s8623_s1 + $0xc] sm:$0xff] }
 0x784   :  { %4004 = vmatmul.mubr.f32.vlgmr.msra.gmra.mrb[60].mxu0 %v8541_v13  ;;  %5559 = vmatprep.mubr.f32.mxu1 %v8541_v13  ;;  %v3723_v53 = vmul.f32 %v3720_v10, %v3667_v56  ;;  %v3753_v60 = vmul.f32 %v8541_v13, %v3715_v3  ;;  %v3781_v3 = vunpack.c.l.bf16 %v3777_v46 }
 0x785   :  { %6585 = vmatpush3.bf16.msra.mxu1 %v7518_v27  ;;  %4009 = vmatprep.mubr.f32.mxu0 %v8757_v39  ;;  %v4564_v27 = vld [vmem:[%s8622_s0 + $0xa8] sm:$0xff] }
 0x786   :  { %v8548_v42 = vadd.f32 %v3737_v29, %v3723_v53  ;;  %v3771_v39 = vunpack.c.l.bf16 %v4564_v27  ;;  %v3772_v51 = vunpack.c.h.bf16 %v4564_v27  ;;  %v3784_v29 = vunpack.c.l.bf16 %v3779_v5 }
 0x788   :  { %v3754_v33 = vmul.f32 %v8548_v42, %v3720_v10  ;;  %4010 = vmatmul.mubr.f32.gmra.mrb[62].mxu0 %v8548_v42  ;;  %5560 = vmatmul.mubr.f32.vlgmr.msra.gmra.mrb[30].mxu1 %v8548_v42  ;;  %v3782_v10 = vunpack.c.h.bf16 %v3777_v46 }
 0x78a   :  { %v4688_v23 = vpack.c.bf16 %v3754_v33, %v3753_v60 }
 0x78c   :  { %4712 = vst [vmem:[%s8625_s6 + $0x8] sm:$0xff] %v4688_v23  }
 0x836   :  { %v3853_v22 = vpop.f32.mrb[56].mxu0 }
 0x837   :  { %v3854_v21 = vadd.f32 %v3853_v22, %v8894_v28  ;;  %v3855_v26 = vpop.f32.mrb[57].mxu0 }
 0x838   :  { %v3856_v12 = vadd.f32 %v3855_v26, %v8895_v38 }
 0x839   :  { %v4091_v32 = vadd.f32 %v3854_v21, %v3771_v39  ;;  %v3785_v39 = vunpack.c.h.bf16 %v3779_v5 }
 0x83a   :  { %v3859_v19 = vpop.f32.mrb[58].mxu0  ;;  %v5526_v4 = vpop.f32.mrb[28].mxu1  ;;  %v4105_v50 = vadd.f32 %v3856_v12, %v3772_v51 }
 0x83b   :  { %v4568_v18 = vmul.f32 -1.442695, %v4091_v32  ;;  %v3860_v8 = vadd.f32 %v3859_v19, %v8894_v28  ;;  %v3861_v43 = vpop.f32.mrb[59].mxu0  ;;  %v3930_v36 = vpop.f32.mrb[29].mxu1  ;;  %v3936_v59 = vadd.f32 %v5526_v4, %v8896_v44 }
 0x83c   :  { %v3862_v37 = vadd.f32 %v3861_v43, %v8895_v38  ;;  %v4570_v48 = vmul.f32 -1.442695, %v4105_v50  ;;  %v4565_v38 = vld [vmem:[%s8622_s0 + $0xb0] sm:$0xf]  ;;  %v3931_v31 = vadd.f32 %v3930_v36, %v8896_v44  ;;  %v6592_v36 = vpop.permute.xlu0 %6591 }
 0x83d   :  { %6880 = vpow2.f32 %v4568_v18  ;;  %v4092_v49 = vadd.f32 %v3860_v8, %v3774_v45  ;;  %v3773_v24 = vunpack.c.l.bf16 %v4565_v38  ;;  %v6593_v50 = vunpack.i.l.bf16 %v6592_v36 }
 0x83e   :  { %v4106_v17 = vadd.f32 %v3862_v37, %v3775_v2  ;;  %v4207_v37 = vpop.permute.xlu1 %4206 }
 0x83f   :  { %v4569_v25 = vmul.f32 -1.442695, %v4092_v49 }
 0x840   :  { %v4571_v52 = vmul.f32 -1.442695, %v4106_v17  ;;  %v4214_v17 = vmul.f32 %v4207_v37, %v8487_v41 }
 0x841   :  { %6882 = vpow2.f32 %v4569_v25 }
 0x842   :  { %6884 = vpow2.f32 %v4570_v48 }
 0x843   :  { %6886 = vpow2.f32 %v4571_v52 }
 0x847   :  { %v6881_v6 = vpop.eup %6880 }
 0x848   :  { %v4099_v58 = vadd.f32 1.0, %v6881_v6 }
 0x84a   :  { %6888 = vrcp.f32 %v4099_v58 }
 0x84b   :  { %v6883_v40 = vpop.eup %6882 }
 0x84c   :  { %v4100_v28 = vadd.f32 1.0, %v6883_v40  ;;  %v6885_v55 = vpop.eup %6884 }
 0x84d   :  { %v6887_v61 = vpop.eup %6886  ;;  %v4113_v14 = vadd.f32 1.0, %v6885_v55 }
 0x84e   :  { %6890 = vrcp.f32 %v4100_v28  ;;  %v4114_v30 = vadd.f32 1.0, %v6887_v61  ;;  %v6594_v28 = vunpack.i.h.bf16 %v6592_v36  ;;  %v4212_v61 = vpop.permute.xlu0 %4211 }
 0x84f   :  { %6892 = vrcp.f32 %v4113_v14 }
 0x850   :  { %6894 = vrcp.f32 %v4114_v30 }
 0x854   :  { %v6889_v47 = vpop.eup %6888 }
 0x855   :  { %v4119_v63 = vmul.f32 %v6889_v47, %v3931_v31 }
 0x857   :  { %v4121_v16 = vadd.f32 %v4119_v63, %v3773_v24  ;;  %v4005_v11 = vpop.f32.mrb[60].mxu0  ;;  %v4215_v24 = vmul.f32 %v4212_v61, %v8494_v20  ;;  %v3780_v63 = vld [vmem:[%s8623_s1 + $0x8] ss:$12 sps:$4 sm:$0xff]  }
 0x858   :  { %v6891_v35 = vpop.eup %6890  ;;  %v4006_v57 = vadd.f32 %v4005_v11, %v8897_v1  ;;  %v4007_v9 = vpop.f32.mrb[61].mxu0 }
 0x859   :  { %v4120_v56 = vmul.f32 %v6891_v35, %v3936_v59  ;;  %6896 = vtanh.f32 %v4121_v16  ;;  %v4008_v15 = vadd.f32 %v4007_v9, %v8797_v0  ;;  %v6893_v12 = vpop.eup %6892  ;;  %v3783_v59 = vunpack.c.l.bf16 %v3780_v63 }
 0x85a   :  { %v4133_v53 = vadd.f32 %v4006_v57, %v3781_v3  ;;  %v6895_v4 = vpop.eup %6894  ;;  %v4125_v18 = vsub.f32 1.0, %v6893_v12  ;;  %v4129_v2 = vmul.f32 %v6893_v12, %v8487_v41  ;;  %v3786_v57 = vunpack.c.h.bf16 %v3780_v63 }
 0x85b   :  { %v4122_v60 = vadd.f32 %v4120_v56, %v3776_v54  ;;  %v4011_v44 = vpop.f32.mrb[62].mxu0  ;;  %v8583_v33 = vpop.f32.mrb[30].mxu1  ;;  %v4147_v21 = vadd.f32 %v4008_v15, %v3782_v10  ;;  %v4126_v49 = vsub.f32 1.0, %v6895_v4  ;;  %v4130_v6 = vmul.f32 %v6895_v4, %v8494_v20 }
 0x85c   :  { %v4572_v23 = vmul.f32 -1.442695, %v4133_v53  ;;  %v4012_v27 = vadd.f32 %v4011_v44, %v8897_v1  ;;  %v4013_v22 = vpop.f32.mrb[63].mxu0  ;;  %v4082_v34 = vpop.f32.mrb[31].mxu1  ;;  %v4088_v9 = vadd.f32 %v8583_v33, %v7683_v62 }
 0x85d   :  { %6898 = vtanh.f32 %v4122_v60  ;;  %v4014_v26 = vadd.f32 %v4013_v22, %v8797_v0  ;;  %v4574_v19 = vmul.f32 -1.442695, %v4147_v21  ;;  %v4083_v16 = vadd.f32 %v4082_v34, %v7683_v62  ;;  %v6597_v22 = vpop.permute.xlu1 %6596  ;;  %v4235_v62 = vpop.permute.xlu0 %4234 }
 0x85e   :  { %6900 = vpow2.f32 %v4572_v23  ;;  %v4134_v51 = vadd.f32 %v4012_v27, %v3784_v29  ;;  %v6598_v34 = vunpack.i.l.bf16 %v6597_v22 }
 0x85f   :  { %v4148_v45 = vadd.f32 %v4014_v26, %v3785_v39 }
 0x860   :  { %v4573_v32 = vmul.f32 -1.442695, %v4134_v51 }
 0x861   :  { %v4575_v43 = vmul.f32 -1.442695, %v4148_v45  ;;  %v4242_v45 = vmul.f32 %v4235_v62, %v8541_v13 }
 0x862   :  { %6902 = vpow2.f32 %v4573_v32 }
 0x863   :  { %v6897_v8 = vpop.eup %6896  ;;  %6904 = vpow2.f32 %v4574_v19  ;;  %v6599_v19 = vunpack.i.h.bf16 %v6597_v22 }
 0x864   :  { %v4127_v1 = vmul.f32 %v6897_v8, %v4125_v18  ;;  %6906 = vpow2.f32 %v4575_v43  ;;  %v4240_v8 = vpop.permute.xlu1 %4239 }
 0x866   :  { %v4131_v0 = vadd.f32 %v4129_v2, %v4127_v1  ;;  %v4243_v2 = vmul.f32 %v4240_v8, %v8548_v42 }
 0x867   :  { %v6899_v25 = vpop.eup %6898 }
 0x868   :  { %v6901_v48 = vpop.eup %6900  ;;  %v4128_v52 = vmul.f32 %v6899_v25, %v4126_v49  ;;  %v4200_v58 = vmul.f32 %v6593_v50, %v4131_v0 }
 0x869   :  { %v4141_v40 = vadd.f32 1.0, %v6901_v48 }
 0x86a   :  { %v4132_v55 = vadd.f32 %v4130_v6, %v4128_v52  ;;  %v4216_v38 = vadd.f32 %v4214_v17, %v4200_v58 }
 0x86b   :  { %6908 = vrcp.f32 %v4141_v40 }
 0x86c   :  { %v6903_v14 = vpop.eup %6902  ;;  %v4201_v31 = vmul.f32 %v6594_v28, %v4132_v55  ;;  %4278 = vst [vmem:[%s8626_s7] sm:$0xff] %v4216_v38  ;;  %v4246_v30 = vmul.f32 %v6593_v50, %v4216_v38 }
 0x86d   :  { %v4142_v41 = vadd.f32 1.0, %v6903_v14  ;;  %v6905_v47 = vpop.eup %6904 }
 0x86e   :  { %v4217_v46 = vadd.f32 %v4215_v24, %v4201_v31  ;;  %v6907_v20 = vpop.eup %6906  ;;  %v4155_v54 = vadd.f32 1.0, %v6905_v47 }
 0x86f   :  { %6910 = vrcp.f32 %v4142_v41  ;;  %v4156_v5 = vadd.f32 1.0, %v6907_v20 }
 0x870   :  { %v4247_v7 = vmul.f32 %v6594_v28, %v4217_v46  ;;  %4279 = vst [vmem:[%s8626_s7 + $0x8] sm:$0xff] %v4217_v46  ;;  %6912 = vrcp.f32 %v4155_v54 }
 0x871   :  { %6914 = vrcp.f32 %v4156_v5 }
 0x872   :  { %v4693_v3 = vpack.c.bf16 %v4247_v7, %v4246_v30 }
 0x874   :  { %4713 = vst [vmem:[%s8624_s5 + $0x38] sm:$0xff] %v4693_v3  }
 0x875   :  { %v6909_v11 = vpop.eup %6908 }
 0x876   :  { %v4161_v35 = vmul.f32 %v6909_v11, %v4083_v16 }
 0x878   :  { %v4163_v56 = vadd.f32 %v4161_v35, %v3783_v59 }
 0x879   :  { %v6911_v10 = vpop.eup %6910 }
 0x87a   :  { %v4162_v15 = vmul.f32 %v6911_v10, %v4088_v9  ;;  %6916 = vtanh.f32 %v4163_v56  ;;  %v6913_v29 = vpop.eup %6912 }
 0x87b   :  { %v6915_v60 = vpop.eup %6914  ;;  %v4167_v44 = vsub.f32 1.0, %v6913_v29  ;;  %v4171_v27 = vmul.f32 %v6913_v29, %v8541_v13 }
 0x87c   :  { %v4164_v53 = vadd.f32 %v4162_v15, %v3786_v57  ;;  %v4168_v21 = vsub.f32 1.0, %v6915_v60  ;;  %v4172_v12 = vmul.f32 %v6915_v60, %v8548_v42 }
 0x87e   :  { %6918 = vtanh.f32 %v4164_v53 }
 0x884   :  { %v6917_v23 = vpop.eup %6916 }
 0x885   :  { %v4169_v39 = vmul.f32 %v6917_v23, %v4167_v44 }
 0x887   :  { %v4173_v26 = vadd.f32 %v4171_v27, %v4169_v39 }
 0x888   :  { %v6919_v51 = vpop.eup %6918 }
 0x889   :  { %v4170_v33 = vmul.f32 %v6919_v51, %v4168_v21  ;;  %v4228_v32 = vmul.f32 %v6598_v34, %v4173_v26 }
 0x88b   :  { %v4174_v4 = vadd.f32 %v4172_v12, %v4170_v33  ;;  %v4244_v18 = vadd.f32 %v4242_v45, %v4228_v32 }
 0x88d   :  { %v4229_v1 = vmul.f32 %v6599_v19, %v4174_v4  ;;  %4586 = vst [vmem:[%s8626_s7 + $0x10] sm:$0xff] %v4244_v18  ;;  %v4259_v50 = vmul.f32 %v6598_v34, %v4244_v18 }
 0x88f   :  { %v4245_v43 = vadd.f32 %v4243_v2, %v4229_v1 }
 0x891   :  { %v4260_v36 = vmul.f32 %v6599_v19, %v4245_v43  ;;  %4587 = vst [vmem:[%s8626_s7 + $0x18] sm:$0xff] %v4245_v43 }
 0x893   :  { %v4698_v37 = vpack.c.bf16 %v4260_v36, %v4259_v50 }
 0x895   :  { %4699 = vst [vmem:[%s8625_s6] sm:$0xff] %v4698_v37  }

</bundles_post_ra>
